<compile_context>
chip_gen: v7x
topology: tpu7x:2x2x1
jax: 0.10.0
libtpu: 0.0.40
codegen_flags: <defaults>
</compile_context>

<pallas_src>
import jax
import jax.numpy as jnp
from jax.experimental import pallas as pl
from jax.experimental.pallas import tpu as pltpu

# ---- model dims (from the PyTorch module) ----
EMB_DIM = 192
HIDDEN_DIM = 96
LABEL_COLS = ['toxic', 'severe_toxic', 'obscene', 'threat', 'insult', 'identity_hate']
OUTPUT_DIM = len(LABEL_COLS)
VOCAB_SIZE = 50          # synthetic small vocab (len(word2idx) stand-in)

# ---- small example shapes ----
BATCH = 2
SEQ_LEN = 8

# ---- TPU-friendly padded dims ----
HP = 128                 # hidden padded to one lane tile
G4 = 4 * HP              # per-direction gate width
OP = 128                 # classifier output padded to one lane tile
BP = 8                   # batch rows per grid tile (one sublane tile).
                         # For real throughput, raise BP toward 128 (v5e) / 256 (v6e, v7x):
                         # the per-step (BP,HP)@(HP,G4) matmul is latency-bound, so more rows
                         # are nearly free.


def _bilstm_kernel(xpf_ref, xpb_ref,          # (T*BP, G4) f32: projected inputs (+bias), time-major
                   whf_ref, whb_ref,          # (HP, G4)   f32: recurrent weights per direction
                   w1_ref, b1_ref,            # (2*HP, HP), (1, HP) f32: classifier L1 (stacked)
                   w2_ref, b2_ref,            # (HP, OP),  (1, OP) f32: classifier L2 (lane-padded)
                   out_ref):                  # (BP, OP)   f32
    Bp = out_ref.shape[0]
    Hp = whf_ref.shape[0]
    T = xpf_ref.shape[0] // Bp

    def cell(gates, c):
        i = jax.nn.sigmoid(gates[:, 0 * Hp:1 * Hp])      # 128-aligned gate slices (whole vregs)
        f = jax.nn.sigmoid(gates[:, 1 * Hp:2 * Hp])
        g = jnp.tanh(gates[:, 2 * Hp:3 * Hp])
        o = jax.nn.sigmoid(gates[:, 3 * Hp:4 * Hp])
        c_new = f * c + i * g
        return o * jnp.tanh(c_new), c_new

    zeros = jnp.zeros((Bp, Hp), jnp.float32)
    hf, cf = zeros, zeros
    hb, cb = zeros, zeros

    # TODO(synk): on v6e/v7x the recurrent weights could be held in the MXU across steps via
    # pltpu.matmul_push_rhs / matmul_acc_lhs (one push per direction) instead of per-step dots.
    for t in range(T):                                   # static unroll: static ref slices, and
        gates_f = xpf_ref[t * Bp:(t + 1) * Bp, :] + jnp.dot(          # fwd/bwd chains interleave
            hf, whf_ref[...], preferred_element_type=jnp.float32)
        gates_b = xpb_ref[(T - 1 - t) * Bp:(T - t) * Bp, :] + jnp.dot(
            hb, whb_ref[...], preferred_element_type=jnp.float32)
        hf, cf = cell(gates_f, cf)
        hb, cb = cell(gates_b, cb)

    # concat(hidden[-2], hidden[-1]) @ W1 as ONE K=2*HP matmul (lane-aligned vreg concat).
    h2 = jnp.concatenate([hf, hb], axis=1)                            # (Bp, 2*Hp)
    hid = jnp.dot(h2, w1_ref[...], preferred_element_type=jnp.float32) + b1_ref[...]
    hid = jnp.maximum(hid, 0.0)                                       # ReLU; Dropout(0.2) = identity (eval)
    out_ref[...] = (jnp.dot(hid, w2_ref[...], preferred_element_type=jnp.float32)
                    + b2_ref[...]).astype(out_ref.dtype)


def _pad_gate_cols(w, h, hp):
    """(..., 4*h) -> (..., 4*hp) with per-gate zero padding (gate order [i, f, g, o])."""
    lead = w.shape[:-1]
    w4 = w.reshape(lead + (4, h))
    w4 = jnp.pad(w4, [(0, 0)] * len(lead) + [(0, 0), (0, hp - h)])
    return w4.reshape(lead + (4 * hp,))


def prepare_params(params):
    """Pack/pad PyTorch-shaped params into kernel layout (all f32). Zero padding keeps the
    padded hidden units exactly at h = c = 0 every step, so results are unchanged."""
    H = HIDDEN_DIM
    f32 = jnp.float32

    # Precompute per-token input projections (weights frozen at inference):
    #   proj_d[tok] = emb[tok] @ W_x_d + (b_ih_d + b_hh_d), gate columns padded H -> HP.
    # emb row 0 (padding_idx) is zero, so proj_d[0] is exactly the bias — same as the LSTM
    # would compute for a zero embedding.
    emb = params['embedding'].astype(f32)
    proj_f = emb @ _pad_gate_cols(params['wx_f'], H, HP) + _pad_gate_cols(params['b_f'], H, HP)
    proj_b = emb @ _pad_gate_cols(params['wx_b'], H, HP) + _pad_gate_cols(params['b_b'], H, HP)

    def pad_wh(wh):                                      # (H, 4H) -> (HP, G4)
        return jnp.pad(_pad_gate_cols(wh, H, HP), ((0, HP - H), (0, 0)))

    # Classifier L1 stacked so concat(hf, hb) @ W1 is one (2*HP)-deep matmul.
    w1 = params['w1']                                    # (2H, H) pre-transposed
    w1s = jnp.zeros((2 * HP, HP), f32)
    w1s = w1s.at[:H, :H].set(w1[:H])                     # forward-half rows
    w1s = w1s.at[HP:HP + H, :H].set(w1[H:])              # backward-half rows

    return {
        'proj_f': proj_f.astype(f32),                                        # (V, G4)
        'proj_b': proj_b.astype(f32),                                        # (V, G4)
        'wh_f': pad_wh(params['wh_f']).astype(f32),                          # (HP, G4)
        'wh_b': pad_wh(params['wh_b']).astype(f32),                          # (HP, G4)
        'w1': w1s,                                                           # (2*HP, HP)
        'b1': jnp.pad(params['b1'], ((0, 0), (0, HP - H))).astype(f32),      # (1, HP)
        'w2': jnp.pad(params['w2'],
                      ((0, HP - H), (0, OP - OUTPUT_DIM))).astype(f32),      # (HP, OP)
        'b2': jnp.pad(params['b2'], ((0, 0), (0, OP - OUTPUT_DIM))).astype(f32),  # (1, OP)
    }


def bilstm_forward(tokens, packed):
    """tokens: (B, T) int32 token ids. Returns logits (B, OUTPUT_DIM) float32."""
    B, T = tokens.shape
    nb = pl.cdiv(B, BP)
    bpad = nb * BP
    tokens_p = jnp.pad(tokens, ((0, bpad - B), (0, 0)))            # pad rows use token 0
    # (nb, BP, T) -> time-major within each batch tile -> flat gather index
    idx = tokens_p.reshape(nb, BP, T).transpose(0, 2, 1).reshape(nb * T * BP)
    xpf = jnp.take(packed['proj_f'], idx, axis=0)                  # (nb*T*BP, G4) f32
    xpb = jnp.take(packed['proj_b'], idx, axis=0)
    # TODO(synk): at high call rates the gather could move in-kernel (tokens via scalar prefetch,
    # proj tables resident in VMEM) to avoid materializing xpf/xpb in HBM.

    const = lambda b: (0, 0)                                       # weights: VMEM-resident
    grid_spec = pltpu.PrefetchScalarGridSpec(
        num_scalar_prefetch=0,
        grid=(nb,),
        in_specs=[
            pl.BlockSpec((T * BP, G4), lambda b: (b, 0)),          # xpf tile
            pl.BlockSpec((T * BP, G4), lambda b: (b, 0)),          # xpb tile
            pl.BlockSpec((HP, G4), const),                         # wh_f
            pl.BlockSpec((HP, G4), const),                         # wh_b
            pl.BlockSpec((2 * HP, HP), const),                     # w1 (stacked)
            pl.BlockSpec((1, HP), const),                          # b1
            pl.BlockSpec((HP, OP), const),                         # w2
            pl.BlockSpec((1, OP), const),                          # b2
        ],
        out_specs=pl.BlockSpec((BP, OP), lambda b: (b, 0)),
    )
    logits_p = pl.pallas_call(
        _bilstm_kernel,
        out_shape=jax.ShapeDtypeStruct((bpad, OP), jnp.float32),
        grid_spec=grid_spec,
        compiler_params=pltpu.CompilerParams(
            dimension_semantics=("parallel",)),                    # batch tiles across cores (v7x)
    )(xpf, xpb, packed['wh_f'], packed['wh_b'],
      packed['w1'], packed['b1'], packed['w2'], packed['b2'])
    return logits_p[:B, :OUTPUT_DIM]


def init_params(key):
    """Deterministic synthetic parameters matching the PyTorch module's shapes."""
    ks = jax.random.split(key, 13)
    H, E, O, V = HIDDEN_DIM, EMB_DIM, OUTPUT_DIM, VOCAB_SIZE
    s_lstm = 1.0 / jnp.sqrt(H)      # PyTorch LSTM init scale
    s_l1 = 1.0 / jnp.sqrt(2 * H)    # Linear(2H, H) init scale
    s_l2 = 1.0 / jnp.sqrt(H)        # Linear(H, O) init scale

    emb = jax.random.normal(ks[0], (V, E), jnp.float32)
    emb = emb.at[0].set(0.0)        # padding_idx=0 row is zero

    def u(k, shape, s):
        return jax.random.uniform(k, shape, jnp.float32, -s, s)

    return {
        'embedding': emb,
        # forward direction (W_ih^T, W_hh^T, b_ih + b_hh), gate order [i,f,g,o]
        'wx_f': u(ks[1], (E, 4 * H), s_lstm),
        'wh_f': u(ks[2], (H, 4 * H), s_lstm),
        'b_f':  u(ks[3], (1, 4 * H), s_lstm) + u(ks[4], (1, 4 * H), s_lstm),
        # backward direction
        'wx_b': u(ks[5], (E, 4 * H), s_lstm),
        'wh_b': u(ks[6], (H, 4 * H), s_lstm),
        'b_b':  u(ks[7], (1, 4 * H), s_lstm) + u(ks[8], (1, 4 * H), s_lstm),
        # classifier
        'w1': u(ks[9], (2 * H, H), s_l1),
        'b1': u(ks[10], (1, H), s_l1),
        'w2': u(ks[11], (H, O), s_l2),
        'b2': u(ks[12], (1, O), s_l2),
    }


if __name__ == "__main__":
    key = jax.random.PRNGKey(0)
    pkey, tkey = jax.random.split(key)
    params = init_params(pkey)
    packed = prepare_params(params)
    tokens = jax.random.randint(tkey, (BATCH, SEQ_LEN), 1, VOCAB_SIZE, dtype=jnp.int32)

    logits = jax.jit(bilstm_forward)(tokens, packed)
    jax.block_until_ready(logits)
    assert logits.shape == (BATCH, OUTPUT_DIM) and logits.dtype == jnp.float32
    print("KERNEL_OK")
</pallas_src>

<mosaic_0001>
module attributes {stable_mosaic.version = 11 : i64} {
  func.func @_bilstm_kernel(%arg0: i32, %arg1: memref<64x512xf32, #tpu.memory_space<vmem>>, %arg2: memref<64x512xf32, #tpu.memory_space<vmem>>, %arg3: memref<128x512xf32, #tpu.memory_space<vmem>>, %arg4: memref<128x512xf32, #tpu.memory_space<vmem>>, %arg5: memref<256x128xf32, #tpu.memory_space<vmem>>, %arg6: memref<1x128xf32, #tpu.memory_space<vmem>>, %arg7: memref<128x128xf32, #tpu.memory_space<vmem>>, %arg8: memref<1x128xf32, #tpu.memory_space<vmem>>, %arg9: memref<8x128xf32, #tpu.memory_space<vmem>>) attributes {dimension_semantics = [#tpu.dimension_semantics<parallel>], iteration_bounds = array<i64: 1>, scalar_prefetch = 0 : i64, scratch_operands = 0 : i64, tpu.core_type = #tpu.core_type<tc>, window_params = [{transform_indices = @transform_0, window_bounds = array<i64: 64, 512>}, {transform_indices = @transform_1, window_bounds = array<i64: 64, 512>}, {pipeline_mode = #tpu.pipeline_mode<synchronous>, transform_indices = @transform_2, window_bounds = array<i64: 128, 512>}, {pipeline_mode = #tpu.pipeline_mode<synchronous>, transform_indices = @transform_3, window_bounds = array<i64: 128, 512>}, {pipeline_mode = #tpu.pipeline_mode<synchronous>, transform_indices = @transform_4, window_bounds = array<i64: 256, 128>}, {pipeline_mode = #tpu.pipeline_mode<synchronous>, transform_indices = @transform_5, window_bounds = array<i64: 1, 128>}, {pipeline_mode = #tpu.pipeline_mode<synchronous>, transform_indices = @transform_6, window_bounds = array<i64: 128, 128>}, {pipeline_mode = #tpu.pipeline_mode<synchronous>, transform_indices = @transform_7, window_bounds = array<i64: 1, 128>}, {transform_indices = @transform_8, window_bounds = array<i64: 8, 128>}]} {
    %cst = arith.constant 0.000000e+00 : f32
    %0 = vector.broadcast %cst : f32 to vector<8x128xf32>
    %c0 = arith.constant 0 : index
    %c0_0 = arith.constant 0 : index
    %1 = vector.load %arg1[%c0, %c0_0] : memref<64x512xf32, #tpu.memory_space<vmem>>, vector<8x512xf32>
    %c0_1 = arith.constant 0 : index
    %c0_2 = arith.constant 0 : index
    %2 = vector.load %arg3[%c0_1, %c0_2] : memref<128x512xf32, #tpu.memory_space<vmem>>, vector<128x512xf32>
    %cst_3 = arith.constant dense<0.000000e+00> : vector<8x512xf32>
    %3 = tpu.matmul %0, %2, %cst_3 {dimension_numbers = #tpu.dot_dimension_numbers<[1], [0], [0], [1], [0, 0, 1, 1], [], []>} : vector<8x128xf32>, vector<128x512xf32>, vector<8x512xf32> -> vector<8x512xf32>
    %4 = arith.addf %1, %3 : vector<8x512xf32>
    %c56 = arith.constant 56 : index
    %c0_4 = arith.constant 0 : index
    %5 = vector.load %arg2[%c56, %c0_4] : memref<64x512xf32, #tpu.memory_space<vmem>>, vector<8x512xf32>
    %c0_5 = arith.constant 0 : index
    %c0_6 = arith.constant 0 : index
    %6 = vector.load %arg4[%c0_5, %c0_6] : memref<128x512xf32, #tpu.memory_space<vmem>>, vector<128x512xf32>
    %cst_7 = arith.constant dense<0.000000e+00> : vector<8x512xf32>
    %7 = tpu.matmul %0, %6, %cst_7 {dimension_numbers = #tpu.dot_dimension_numbers<[1], [0], [0], [1], [0, 0, 1, 1], [], []>} : vector<8x128xf32>, vector<128x512xf32>, vector<8x512xf32> -> vector<8x512xf32>
    %8 = arith.addf %5, %7 : vector<8x512xf32>
    %9 = vector.extract_strided_slice %4 {offsets = [0, 0], sizes = [8, 128], strides = [1, 1]} : vector<8x512xf32> to vector<8x128xf32>
    %10 = arith.negf %9 : vector<8x128xf32>
    %11 = math.exp %10 : vector<8x128xf32>
    %cst_8 = arith.constant 1.000000e+00 : f32
    %12 = vector.broadcast %cst_8 : f32 to vector<8x128xf32>
    %13 = arith.addf %12, %11 : vector<8x128xf32>
    %14 = arith.divf %12, %13 : vector<8x128xf32>
    %15 = vector.extract_strided_slice %4 {offsets = [0, 128], sizes = [8, 128], strides = [1, 1]} : vector<8x512xf32> to vector<8x128xf32>
    %16 = arith.negf %15 : vector<8x128xf32>
    %17 = math.exp %16 : vector<8x128xf32>
    %cst_9 = arith.constant 1.000000e+00 : f32
    %18 = vector.broadcast %cst_9 : f32 to vector<8x128xf32>
    %19 = arith.addf %18, %17 : vector<8x128xf32>
    %20 = arith.divf %18, %19 : vector<8x128xf32>
    %21 = vector.extract_strided_slice %4 {offsets = [0, 256], sizes = [8, 128], strides = [1, 1]} : vector<8x512xf32> to vector<8x128xf32>
    %22 = math.tanh %21 : vector<8x128xf32>
    %23 = vector.extract_strided_slice %4 {offsets = [0, 384], sizes = [8, 128], strides = [1, 1]} : vector<8x512xf32> to vector<8x128xf32>
    %24 = arith.negf %23 : vector<8x128xf32>
    %25 = math.exp %24 : vector<8x128xf32>
    %cst_10 = arith.constant 1.000000e+00 : f32
    %26 = vector.broadcast %cst_10 : f32 to vector<8x128xf32>
    %27 = arith.addf %26, %25 : vector<8x128xf32>
    %28 = arith.divf %26, %27 : vector<8x128xf32>
    %29 = arith.mulf %20, %0 : vector<8x128xf32>
    %30 = arith.mulf %14, %22 : vector<8x128xf32>
    %31 = arith.addf %29, %30 : vector<8x128xf32>
    %32 = math.tanh %31 : vector<8x128xf32>
    %33 = arith.mulf %28, %32 : vector<8x128xf32>
    %34 = vector.extract_strided_slice %8 {offsets = [0, 0], sizes = [8, 128], strides = [1, 1]} : vector<8x512xf32> to vector<8x128xf32>
    %35 = arith.negf %34 : vector<8x128xf32>
    %36 = math.exp %35 : vector<8x128xf32>
    %cst_11 = arith.constant 1.000000e+00 : f32
    %37 = vector.broadcast %cst_11 : f32 to vector<8x128xf32>
    %38 = arith.addf %37, %36 : vector<8x128xf32>
    %39 = arith.divf %37, %38 : vector<8x128xf32>
    %40 = vector.extract_strided_slice %8 {offsets = [0, 128], sizes = [8, 128], strides = [1, 1]} : vector<8x512xf32> to vector<8x128xf32>
    %41 = arith.negf %40 : vector<8x128xf32>
    %42 = math.exp %41 : vector<8x128xf32>
    %cst_12 = arith.constant 1.000000e+00 : f32
    %43 = vector.broadcast %cst_12 : f32 to vector<8x128xf32>
    %44 = arith.addf %43, %42 : vector<8x128xf32>
    %45 = arith.divf %43, %44 : vector<8x128xf32>
    %46 = vector.extract_strided_slice %8 {offsets = [0, 256], sizes = [8, 128], strides = [1, 1]} : vector<8x512xf32> to vector<8x128xf32>
    %47 = math.tanh %46 : vector<8x128xf32>
    %48 = vector.extract_strided_slice %8 {offsets = [0, 384], sizes = [8, 128], strides = [1, 1]} : vector<8x512xf32> to vector<8x128xf32>
    %49 = arith.negf %48 : vector<8x128xf32>
    %50 = math.exp %49 : vector<8x128xf32>
    %cst_13 = arith.constant 1.000000e+00 : f32
    %51 = vector.broadcast %cst_13 : f32 to vector<8x128xf32>
    %52 = arith.addf %51, %50 : vector<8x128xf32>
    %53 = arith.divf %51, %52 : vector<8x128xf32>
    %54 = arith.mulf %45, %0 : vector<8x128xf32>
    %55 = arith.mulf %39, %47 : vector<8x128xf32>
    %56 = arith.addf %54, %55 : vector<8x128xf32>
    %57 = math.tanh %56 : vector<8x128xf32>
    %58 = arith.mulf %53, %57 : vector<8x128xf32>
    %c8 = arith.constant 8 : index
    %c0_14 = arith.constant 0 : index
    %59 = vector.load %arg1[%c8, %c0_14] : memref<64x512xf32, #tpu.memory_space<vmem>>, vector<8x512xf32>
    %c0_15 = arith.constant 0 : index
    %c0_16 = arith.constant 0 : index
    %60 = vector.load %arg3[%c0_15, %c0_16] : memref<128x512xf32, #tpu.memory_space<vmem>>, vector<128x512xf32>
    %cst_17 = arith.constant dense<0.000000e+00> : vector<8x512xf32>
    %61 = tpu.matmul %33, %60, %cst_17 {dimension_numbers = #tpu.dot_dimension_numbers<[1], [0], [0], [1], [0, 0, 1, 1], [], []>} : vector<8x128xf32>, vector<128x512xf32>, vector<8x512xf32> -> vector<8x512xf32>
    %62 = arith.addf %59, %61 : vector<8x512xf32>
    %c48 = arith.constant 48 : index
    %c0_18 = arith.constant 0 : index
    %63 = vector.load %arg2[%c48, %c0_18] : memref<64x512xf32, #tpu.memory_space<vmem>>, vector<8x512xf32>
    %c0_19 = arith.constant 0 : index
    %c0_20 = arith.constant 0 : index
    %64 = vector.load %arg4[%c0_19, %c0_20] : memref<128x512xf32, #tpu.memory_space<vmem>>, vector<128x512xf32>
    %cst_21 = arith.constant dense<0.000000e+00> : vector<8x512xf32>
    %65 = tpu.matmul %58, %64, %cst_21 {dimension_numbers = #tpu.dot_dimension_numbers<[1], [0], [0], [1], [0, 0, 1, 1], [], []>} : vector<8x128xf32>, vector<128x512xf32>, vector<8x512xf32> -> vector<8x512xf32>
    %66 = arith.addf %63, %65 : vector<8x512xf32>
    %67 = vector.extract_strided_slice %62 {offsets = [0, 0], sizes = [8, 128], strides = [1, 1]} : vector<8x512xf32> to vector<8x128xf32>
    %68 = arith.negf %67 : vector<8x128xf32>
    %69 = math.exp %68 : vector<8x128xf32>
    %cst_22 = arith.constant 1.000000e+00 : f32
    %70 = vector.broadcast %cst_22 : f32 to vector<8x128xf32>
    %71 = arith.addf %70, %69 : vector<8x128xf32>
    %72 = arith.divf %70, %71 : vector<8x128xf32>
    %73 = vector.extract_strided_slice %62 {offsets = [0, 128], sizes = [8, 128], strides = [1, 1]} : vector<8x512xf32> to vector<8x128xf32>
    %74 = arith.negf %73 : vector<8x128xf32>
    %75 = math.exp %74 : vector<8x128xf32>
    %cst_23 = arith.constant 1.000000e+00 : f32
    %76 = vector.broadcast %cst_23 : f32 to vector<8x128xf32>
    %77 = arith.addf %76, %75 : vector<8x128xf32>
    %78 = arith.divf %76, %77 : vector<8x128xf32>
    %79 = vector.extract_strided_slice %62 {offsets = [0, 256], sizes = [8, 128], strides = [1, 1]} : vector<8x512xf32> to vector<8x128xf32>
    %80 = math.tanh %79 : vector<8x128xf32>
    %81 = vector.extract_strided_slice %62 {offsets = [0, 384], sizes = [8, 128], strides = [1, 1]} : vector<8x512xf32> to vector<8x128xf32>
    %82 = arith.negf %81 : vector<8x128xf32>
    %83 = math.exp %82 : vector<8x128xf32>
    %cst_24 = arith.constant 1.000000e+00 : f32
    %84 = vector.broadcast %cst_24 : f32 to vector<8x128xf32>
    %85 = arith.addf %84, %83 : vector<8x128xf32>
    %86 = arith.divf %84, %85 : vector<8x128xf32>
    %87 = arith.mulf %78, %31 : vector<8x128xf32>
    %88 = arith.mulf %72, %80 : vector<8x128xf32>
    %89 = arith.addf %87, %88 : vector<8x128xf32>
    %90 = math.tanh %89 : vector<8x128xf32>
    %91 = arith.mulf %86, %90 : vector<8x128xf32>
    %92 = vector.extract_strided_slice %66 {offsets = [0, 0], sizes = [8, 128], strides = [1, 1]} : vector<8x512xf32> to vector<8x128xf32>
    %93 = arith.negf %92 : vector<8x128xf32>
    %94 = math.exp %93 : vector<8x128xf32>
    %cst_25 = arith.constant 1.000000e+00 : f32
    %95 = vector.broadcast %cst_25 : f32 to vector<8x128xf32>
    %96 = arith.addf %95, %94 : vector<8x128xf32>
    %97 = arith.divf %95, %96 : vector<8x128xf32>
    %98 = vector.extract_strided_slice %66 {offsets = [0, 128], sizes = [8, 128], strides = [1, 1]} : vector<8x512xf32> to vector<8x128xf32>
    %99 = arith.negf %98 : vector<8x128xf32>
    %100 = math.exp %99 : vector<8x128xf32>
    %cst_26 = arith.constant 1.000000e+00 : f32
    %101 = vector.broadcast %cst_26 : f32 to vector<8x128xf32>
    %102 = arith.addf %101, %100 : vector<8x128xf32>
    %103 = arith.divf %101, %102 : vector<8x128xf32>
    %104 = vector.extract_strided_slice %66 {offsets = [0, 256], sizes = [8, 128], strides = [1, 1]} : vector<8x512xf32> to vector<8x128xf32>
    %105 = math.tanh %104 : vector<8x128xf32>
    %106 = vector.extract_strided_slice %66 {offsets = [0, 384], sizes = [8, 128], strides = [1, 1]} : vector<8x512xf32> to vector<8x128xf32>
    %107 = arith.negf %106 : vector<8x128xf32>
    %108 = math.exp %107 : vector<8x128xf32>
    %cst_27 = arith.constant 1.000000e+00 : f32
    %109 = vector.broadcast %cst_27 : f32 to vector<8x128xf32>
    %110 = arith.addf %109, %108 : vector<8x128xf32>
    %111 = arith.divf %109, %110 : vector<8x128xf32>
    %112 = arith.mulf %103, %56 : vector<8x128xf32>
    %113 = arith.mulf %97, %105 : vector<8x128xf32>
    %114 = arith.addf %112, %113 : vector<8x128xf32>
    %115 = math.tanh %114 : vector<8x128xf32>
    %116 = arith.mulf %111, %115 : vector<8x128xf32>
    %c16 = arith.constant 16 : index
    %c0_28 = arith.constant 0 : index
    %117 = vector.load %arg1[%c16, %c0_28] : memref<64x512xf32, #tpu.memory_space<vmem>>, vector<8x512xf32>
    %c0_29 = arith.constant 0 : index
    %c0_30 = arith.constant 0 : index
    %118 = vector.load %arg3[%c0_29, %c0_30] : memref<128x512xf32, #tpu.memory_space<vmem>>, vector<128x512xf32>
    %cst_31 = arith.constant dense<0.000000e+00> : vector<8x512xf32>
    %119 = tpu.matmul %91, %118, %cst_31 {dimension_numbers = #tpu.dot_dimension_numbers<[1], [0], [0], [1], [0, 0, 1, 1], [], []>} : vector<8x128xf32>, vector<128x512xf32>, vector<8x512xf32> -> vector<8x512xf32>
    %120 = arith.addf %117, %119 : vector<8x512xf32>
    %c40 = arith.constant 40 : index
    %c0_32 = arith.constant 0 : index
    %121 = vector.load %arg2[%c40, %c0_32] : memref<64x512xf32, #tpu.memory_space<vmem>>, vector<8x512xf32>
    %c0_33 = arith.constant 0 : index
    %c0_34 = arith.constant 0 : index
    %122 = vector.load %arg4[%c0_33, %c0_34] : memref<128x512xf32, #tpu.memory_space<vmem>>, vector<128x512xf32>
    %cst_35 = arith.constant dense<0.000000e+00> : vector<8x512xf32>
    %123 = tpu.matmul %116, %122, %cst_35 {dimension_numbers = #tpu.dot_dimension_numbers<[1], [0], [0], [1], [0, 0, 1, 1], [], []>} : vector<8x128xf32>, vector<128x512xf32>, vector<8x512xf32> -> vector<8x512xf32>
    %124 = arith.addf %121, %123 : vector<8x512xf32>
    %125 = vector.extract_strided_slice %120 {offsets = [0, 0], sizes = [8, 128], strides = [1, 1]} : vector<8x512xf32> to vector<8x128xf32>
    %126 = arith.negf %125 : vector<8x128xf32>
    %127 = math.exp %126 : vector<8x128xf32>
    %cst_36 = arith.constant 1.000000e+00 : f32
    %128 = vector.broadcast %cst_36 : f32 to vector<8x128xf32>
    %129 = arith.addf %128, %127 : vector<8x128xf32>
    %130 = arith.divf %128, %129 : vector<8x128xf32>
    %131 = vector.extract_strided_slice %120 {offsets = [0, 128], sizes = [8, 128], strides = [1, 1]} : vector<8x512xf32> to vector<8x128xf32>
    %132 = arith.negf %131 : vector<8x128xf32>
    %133 = math.exp %132 : vector<8x128xf32>
    %cst_37 = arith.constant 1.000000e+00 : f32
    %134 = vector.broadcast %cst_37 : f32 to vector<8x128xf32>
    %135 = arith.addf %134, %133 : vector<8x128xf32>
    %136 = arith.divf %134, %135 : vector<8x128xf32>
    %137 = vector.extract_strided_slice %120 {offsets = [0, 256], sizes = [8, 128], strides = [1, 1]} : vector<8x512xf32> to vector<8x128xf32>
    %138 = math.tanh %137 : vector<8x128xf32>
    %139 = vector.extract_strided_slice %120 {offsets = [0, 384], sizes = [8, 128], strides = [1, 1]} : vector<8x512xf32> to vector<8x128xf32>
    %140 = arith.negf %139 : vector<8x128xf32>
    %141 = math.exp %140 : vector<8x128xf32>
    %cst_38 = arith.constant 1.000000e+00 : f32
    %142 = vector.broadcast %cst_38 : f32 to vector<8x128xf32>
    %143 = arith.addf %142, %141 : vector<8x128xf32>
    %144 = arith.divf %142, %143 : vector<8x128xf32>
    %145 = arith.mulf %136, %89 : vector<8x128xf32>
    %146 = arith.mulf %130, %138 : vector<8x128xf32>
    %147 = arith.addf %145, %146 : vector<8x128xf32>
    %148 = math.tanh %147 : vector<8x128xf32>
    %149 = arith.mulf %144, %148 : vector<8x128xf32>
    %150 = vector.extract_strided_slice %124 {offsets = [0, 0], sizes = [8, 128], strides = [1, 1]} : vector<8x512xf32> to vector<8x128xf32>
    %151 = arith.negf %150 : vector<8x128xf32>
    %152 = math.exp %151 : vector<8x128xf32>
    %cst_39 = arith.constant 1.000000e+00 : f32
    %153 = vector.broadcast %cst_39 : f32 to vector<8x128xf32>
    %154 = arith.addf %153, %152 : vector<8x128xf32>
    %155 = arith.divf %153, %154 : vector<8x128xf32>
    %156 = vector.extract_strided_slice %124 {offsets = [0, 128], sizes = [8, 128], strides = [1, 1]} : vector<8x512xf32> to vector<8x128xf32>
    %157 = arith.negf %156 : vector<8x128xf32>
    %158 = math.exp %157 : vector<8x128xf32>
    %cst_40 = arith.constant 1.000000e+00 : f32
    %159 = vector.broadcast %cst_40 : f32 to vector<8x128xf32>
    %160 = arith.addf %159, %158 : vector<8x128xf32>
    %161 = arith.divf %159, %160 : vector<8x128xf32>
    %162 = vector.extract_strided_slice %124 {offsets = [0, 256], sizes = [8, 128], strides = [1, 1]} : vector<8x512xf32> to vector<8x128xf32>
    %163 = math.tanh %162 : vector<8x128xf32>
    %164 = vector.extract_strided_slice %124 {offsets = [0, 384], sizes = [8, 128], strides = [1, 1]} : vector<8x512xf32> to vector<8x128xf32>
    %165 = arith.negf %164 : vector<8x128xf32>
    %166 = math.exp %165 : vector<8x128xf32>
    %cst_41 = arith.constant 1.000000e+00 : f32
    %167 = vector.broadcast %cst_41 : f32 to vector<8x128xf32>
    %168 = arith.addf %167, %166 : vector<8x128xf32>
    %169 = arith.divf %167, %168 : vector<8x128xf32>
    %170 = arith.mulf %161, %114 : vector<8x128xf32>
    %171 = arith.mulf %155, %163 : vector<8x128xf32>
    %172 = arith.addf %170, %171 : vector<8x128xf32>
    %173 = math.tanh %172 : vector<8x128xf32>
    %174 = arith.mulf %169, %173 : vector<8x128xf32>
    %c24 = arith.constant 24 : index
    %c0_42 = arith.constant 0 : index
    %175 = vector.load %arg1[%c24, %c0_42] : memref<64x512xf32, #tpu.memory_space<vmem>>, vector<8x512xf32>
    %c0_43 = arith.constant 0 : index
    %c0_44 = arith.constant 0 : index
    %176 = vector.load %arg3[%c0_43, %c0_44] : memref<128x512xf32, #tpu.memory_space<vmem>>, vector<128x512xf32>
    %cst_45 = arith.constant dense<0.000000e+00> : vector<8x512xf32>
    %177 = tpu.matmul %149, %176, %cst_45 {dimension_numbers = #tpu.dot_dimension_numbers<[1], [0], [0], [1], [0, 0, 1, 1], [], []>} : vector<8x128xf32>, vector<128x512xf32>, vector<8x512xf32> -> vector<8x512xf32>
    %178 = arith.addf %175, %177 : vector<8x512xf32>
    %c32 = arith.constant 32 : index
    %c0_46 = arith.constant 0 : index
    %179 = vector.load %arg2[%c32, %c0_46] : memref<64x512xf32, #tpu.memory_space<vmem>>, vector<8x512xf32>
    %c0_47 = arith.constant 0 : index
    %c0_48 = arith.constant 0 : index
    %180 = vector.load %arg4[%c0_47, %c0_48] : memref<128x512xf32, #tpu.memory_space<vmem>>, vector<128x512xf32>
    %cst_49 = arith.constant dense<0.000000e+00> : vector<8x512xf32>
    %181 = tpu.matmul %174, %180, %cst_49 {dimension_numbers = #tpu.dot_dimension_numbers<[1], [0], [0], [1], [0, 0, 1, 1], [], []>} : vector<8x128xf32>, vector<128x512xf32>, vector<8x512xf32> -> vector<8x512xf32>
    %182 = arith.addf %179, %181 : vector<8x512xf32>
    %183 = vector.extract_strided_slice %178 {offsets = [0, 0], sizes = [8, 128], strides = [1, 1]} : vector<8x512xf32> to vector<8x128xf32>
    %184 = arith.negf %183 : vector<8x128xf32>
    %185 = math.exp %184 : vector<8x128xf32>
    %cst_50 = arith.constant 1.000000e+00 : f32
    %186 = vector.broadcast %cst_50 : f32 to vector<8x128xf32>
    %187 = arith.addf %186, %185 : vector<8x128xf32>
    %188 = arith.divf %186, %187 : vector<8x128xf32>
    %189 = vector.extract_strided_slice %178 {offsets = [0, 128], sizes = [8, 128], strides = [1, 1]} : vector<8x512xf32> to vector<8x128xf32>
    %190 = arith.negf %189 : vector<8x128xf32>
    %191 = math.exp %190 : vector<8x128xf32>
    %cst_51 = arith.constant 1.000000e+00 : f32
    %192 = vector.broadcast %cst_51 : f32 to vector<8x128xf32>
    %193 = arith.addf %192, %191 : vector<8x128xf32>
    %194 = arith.divf %192, %193 : vector<8x128xf32>
    %195 = vector.extract_strided_slice %178 {offsets = [0, 256], sizes = [8, 128], strides = [1, 1]} : vector<8x512xf32> to vector<8x128xf32>
    %196 = math.tanh %195 : vector<8x128xf32>
    %197 = vector.extract_strided_slice %178 {offsets = [0, 384], sizes = [8, 128], strides = [1, 1]} : vector<8x512xf32> to vector<8x128xf32>
    %198 = arith.negf %197 : vector<8x128xf32>
    %199 = math.exp %198 : vector<8x128xf32>
    %cst_52 = arith.constant 1.000000e+00 : f32
    %200 = vector.broadcast %cst_52 : f32 to vector<8x128xf32>
    %201 = arith.addf %200, %199 : vector<8x128xf32>
    %202 = arith.divf %200, %201 : vector<8x128xf32>
    %203 = arith.mulf %194, %147 : vector<8x128xf32>
    %204 = arith.mulf %188, %196 : vector<8x128xf32>
    %205 = arith.addf %203, %204 : vector<8x128xf32>
    %206 = math.tanh %205 : vector<8x128xf32>
    %207 = arith.mulf %202, %206 : vector<8x128xf32>
    %208 = vector.extract_strided_slice %182 {offsets = [0, 0], sizes = [8, 128], strides = [1, 1]} : vector<8x512xf32> to vector<8x128xf32>
    %209 = arith.negf %208 : vector<8x128xf32>
    %210 = math.exp %209 : vector<8x128xf32>
    %cst_53 = arith.constant 1.000000e+00 : f32
    %211 = vector.broadcast %cst_53 : f32 to vector<8x128xf32>
    %212 = arith.addf %211, %210 : vector<8x128xf32>
    %213 = arith.divf %211, %212 : vector<8x128xf32>
    %214 = vector.extract_strided_slice %182 {offsets = [0, 128], sizes = [8, 128], strides = [1, 1]} : vector<8x512xf32> to vector<8x128xf32>
    %215 = arith.negf %214 : vector<8x128xf32>
    %216 = math.exp %215 : vector<8x128xf32>
    %cst_54 = arith.constant 1.000000e+00 : f32
    %217 = vector.broadcast %cst_54 : f32 to vector<8x128xf32>
    %218 = arith.addf %217, %216 : vector<8x128xf32>
    %219 = arith.divf %217, %218 : vector<8x128xf32>
    %220 = vector.extract_strided_slice %182 {offsets = [0, 256], sizes = [8, 128], strides = [1, 1]} : vector<8x512xf32> to vector<8x128xf32>
    %221 = math.tanh %220 : vector<8x128xf32>
    %222 = vector.extract_strided_slice %182 {offsets = [0, 384], sizes = [8, 128], strides = [1, 1]} : vector<8x512xf32> to vector<8x128xf32>
    %223 = arith.negf %222 : vector<8x128xf32>
    %224 = math.exp %223 : vector<8x128xf32>
    %cst_55 = arith.constant 1.000000e+00 : f32
    %225 = vector.broadcast %cst_55 : f32 to vector<8x128xf32>
    %226 = arith.addf %225, %224 : vector<8x128xf32>
    %227 = arith.divf %225, %226 : vector<8x128xf32>
    %228 = arith.mulf %219, %172 : vector<8x128xf32>
    %229 = arith.mulf %213, %221 : vector<8x128xf32>
    %230 = arith.addf %228, %229 : vector<8x128xf32>
    %231 = math.tanh %230 : vector<8x128xf32>
    %232 = arith.mulf %227, %231 : vector<8x128xf32>
    %c32_56 = arith.constant 32 : index
    %c0_57 = arith.constant 0 : index
    %233 = vector.load %arg1[%c32_56, %c0_57] : memref<64x512xf32, #tpu.memory_space<vmem>>, vector<8x512xf32>
    %c0_58 = arith.constant 0 : index
    %c0_59 = arith.constant 0 : index
    %234 = vector.load %arg3[%c0_58, %c0_59] : memref<128x512xf32, #tpu.memory_space<vmem>>, vector<128x512xf32>
    %cst_60 = arith.constant dense<0.000000e+00> : vector<8x512xf32>
    %235 = tpu.matmul %207, %234, %cst_60 {dimension_numbers = #tpu.dot_dimension_numbers<[1], [0], [0], [1], [0, 0, 1, 1], [], []>} : vector<8x128xf32>, vector<128x512xf32>, vector<8x512xf32> -> vector<8x512xf32>
    %236 = arith.addf %233, %235 : vector<8x512xf32>
    %c24_61 = arith.constant 24 : index
    %c0_62 = arith.constant 0 : index
    %237 = vector.load %arg2[%c24_61, %c0_62] : memref<64x512xf32, #tpu.memory_space<vmem>>, vector<8x512xf32>
    %c0_63 = arith.constant 0 : index
    %c0_64 = arith.constant 0 : index
    %238 = vector.load %arg4[%c0_63, %c0_64] : memref<128x512xf32, #tpu.memory_space<vmem>>, vector<128x512xf32>
    %cst_65 = arith.constant dense<0.000000e+00> : vector<8x512xf32>
    %239 = tpu.matmul %232, %238, %cst_65 {dimension_numbers = #tpu.dot_dimension_numbers<[1], [0], [0], [1], [0, 0, 1, 1], [], []>} : vector<8x128xf32>, vector<128x512xf32>, vector<8x512xf32> -> vector<8x512xf32>
    %240 = arith.addf %237, %239 : vector<8x512xf32>
    %241 = vector.extract_strided_slice %236 {offsets = [0, 0], sizes = [8, 128], strides = [1, 1]} : vector<8x512xf32> to vector<8x128xf32>
    %242 = arith.negf %241 : vector<8x128xf32>
    %243 = math.exp %242 : vector<8x128xf32>
    %cst_66 = arith.constant 1.000000e+00 : f32
    %244 = vector.broadcast %cst_66 : f32 to vector<8x128xf32>
    %245 = arith.addf %244, %243 : vector<8x128xf32>
    %246 = arith.divf %244, %245 : vector<8x128xf32>
    %247 = vector.extract_strided_slice %236 {offsets = [0, 128], sizes = [8, 128], strides = [1, 1]} : vector<8x512xf32> to vector<8x128xf32>
    %248 = arith.negf %247 : vector<8x128xf32>
    %249 = math.exp %248 : vector<8x128xf32>
    %cst_67 = arith.constant 1.000000e+00 : f32
    %250 = vector.broadcast %cst_67 : f32 to vector<8x128xf32>
    %251 = arith.addf %250, %249 : vector<8x128xf32>
    %252 = arith.divf %250, %251 : vector<8x128xf32>
    %253 = vector.extract_strided_slice %236 {offsets = [0, 256], sizes = [8, 128], strides = [1, 1]} : vector<8x512xf32> to vector<8x128xf32>
    %254 = math.tanh %253 : vector<8x128xf32>
    %255 = vector.extract_strided_slice %236 {offsets = [0, 384], sizes = [8, 128], strides = [1, 1]} : vector<8x512xf32> to vector<8x128xf32>
    %256 = arith.negf %255 : vector<8x128xf32>
    %257 = math.exp %256 : vector<8x128xf32>
    %cst_68 = arith.constant 1.000000e+00 : f32
    %258 = vector.broadcast %cst_68 : f32 to vector<8x128xf32>
    %259 = arith.addf %258, %257 : vector<8x128xf32>
    %260 = arith.divf %258, %259 : vector<8x128xf32>
    %261 = arith.mulf %252, %205 : vector<8x128xf32>
    %262 = arith.mulf %246, %254 : vector<8x128xf32>
    %263 = arith.addf %261, %262 : vector<8x128xf32>
    %264 = math.tanh %263 : vector<8x128xf32>
    %265 = arith.mulf %260, %264 : vector<8x128xf32>
    %266 = vector.extract_strided_slice %240 {offsets = [0, 0], sizes = [8, 128], strides = [1, 1]} : vector<8x512xf32> to vector<8x128xf32>
    %267 = arith.negf %266 : vector<8x128xf32>
    %268 = math.exp %267 : vector<8x128xf32>
    %cst_69 = arith.constant 1.000000e+00 : f32
    %269 = vector.broadcast %cst_69 : f32 to vector<8x128xf32>
    %270 = arith.addf %269, %268 : vector<8x128xf32>
    %271 = arith.divf %269, %270 : vector<8x128xf32>
    %272 = vector.extract_strided_slice %240 {offsets = [0, 128], sizes = [8, 128], strides = [1, 1]} : vector<8x512xf32> to vector<8x128xf32>
    %273 = arith.negf %272 : vector<8x128xf32>
    %274 = math.exp %273 : vector<8x128xf32>
    %cst_70 = arith.constant 1.000000e+00 : f32
    %275 = vector.broadcast %cst_70 : f32 to vector<8x128xf32>
    %276 = arith.addf %275, %274 : vector<8x128xf32>
    %277 = arith.divf %275, %276 : vector<8x128xf32>
    %278 = vector.extract_strided_slice %240 {offsets = [0, 256], sizes = [8, 128], strides = [1, 1]} : vector<8x512xf32> to vector<8x128xf32>
    %279 = math.tanh %278 : vector<8x128xf32>
    %280 = vector.extract_strided_slice %240 {offsets = [0, 384], sizes = [8, 128], strides = [1, 1]} : vector<8x512xf32> to vector<8x128xf32>
    %281 = arith.negf %280 : vector<8x128xf32>
    %282 = math.exp %281 : vector<8x128xf32>
    %cst_71 = arith.constant 1.000000e+00 : f32
    %283 = vector.broadcast %cst_71 : f32 to vector<8x128xf32>
    %284 = arith.addf %283, %282 : vector<8x128xf32>
    %285 = arith.divf %283, %284 : vector<8x128xf32>
    %286 = arith.mulf %277, %230 : vector<8x128xf32>
    %287 = arith.mulf %271, %279 : vector<8x128xf32>
    %288 = arith.addf %286, %287 : vector<8x128xf32>
    %289 = math.tanh %288 : vector<8x128xf32>
    %290 = arith.mulf %285, %289 : vector<8x128xf32>
    %c40_72 = arith.constant 40 : index
    %c0_73 = arith.constant 0 : index
    %291 = vector.load %arg1[%c40_72, %c0_73] : memref<64x512xf32, #tpu.memory_space<vmem>>, vector<8x512xf32>
    %c0_74 = arith.constant 0 : index
    %c0_75 = arith.constant 0 : index
    %292 = vector.load %arg3[%c0_74, %c0_75] : memref<128x512xf32, #tpu.memory_space<vmem>>, vector<128x512xf32>
    %cst_76 = arith.constant dense<0.000000e+00> : vector<8x512xf32>
    %293 = tpu.matmul %265, %292, %cst_76 {dimension_numbers = #tpu.dot_dimension_numbers<[1], [0], [0], [1], [0, 0, 1, 1], [], []>} : vector<8x128xf32>, vector<128x512xf32>, vector<8x512xf32> -> vector<8x512xf32>
    %294 = arith.addf %291, %293 : vector<8x512xf32>
    %c16_77 = arith.constant 16 : index
    %c0_78 = arith.constant 0 : index
    %295 = vector.load %arg2[%c16_77, %c0_78] : memref<64x512xf32, #tpu.memory_space<vmem>>, vector<8x512xf32>
    %c0_79 = arith.constant 0 : index
    %c0_80 = arith.constant 0 : index
    %296 = vector.load %arg4[%c0_79, %c0_80] : memref<128x512xf32, #tpu.memory_space<vmem>>, vector<128x512xf32>
    %cst_81 = arith.constant dense<0.000000e+00> : vector<8x512xf32>
    %297 = tpu.matmul %290, %296, %cst_81 {dimension_numbers = #tpu.dot_dimension_numbers<[1], [0], [0], [1], [0, 0, 1, 1], [], []>} : vector<8x128xf32>, vector<128x512xf32>, vector<8x512xf32> -> vector<8x512xf32>
    %298 = arith.addf %295, %297 : vector<8x512xf32>
    %299 = vector.extract_strided_slice %294 {offsets = [0, 0], sizes = [8, 128], strides = [1, 1]} : vector<8x512xf32> to vector<8x128xf32>
    %300 = arith.negf %299 : vector<8x128xf32>
    %301 = math.exp %300 : vector<8x128xf32>
    %cst_82 = arith.constant 1.000000e+00 : f32
    %302 = vector.broadcast %cst_82 : f32 to vector<8x128xf32>
    %303 = arith.addf %302, %301 : vector<8x128xf32>
    %304 = arith.divf %302, %303 : vector<8x128xf32>
    %305 = vector.extract_strided_slice %294 {offsets = [0, 128], sizes = [8, 128], strides = [1, 1]} : vector<8x512xf32> to vector<8x128xf32>
    %306 = arith.negf %305 : vector<8x128xf32>
    %307 = math.exp %306 : vector<8x128xf32>
    %cst_83 = arith.constant 1.000000e+00 : f32
    %308 = vector.broadcast %cst_83 : f32 to vector<8x128xf32>
    %309 = arith.addf %308, %307 : vector<8x128xf32>
    %310 = arith.divf %308, %309 : vector<8x128xf32>
    %311 = vector.extract_strided_slice %294 {offsets = [0, 256], sizes = [8, 128], strides = [1, 1]} : vector<8x512xf32> to vector<8x128xf32>
    %312 = math.tanh %311 : vector<8x128xf32>
    %313 = vector.extract_strided_slice %294 {offsets = [0, 384], sizes = [8, 128], strides = [1, 1]} : vector<8x512xf32> to vector<8x128xf32>
    %314 = arith.negf %313 : vector<8x128xf32>
    %315 = math.exp %314 : vector<8x128xf32>
    %cst_84 = arith.constant 1.000000e+00 : f32
    %316 = vector.broadcast %cst_84 : f32 to vector<8x128xf32>
    %317 = arith.addf %316, %315 : vector<8x128xf32>
    %318 = arith.divf %316, %317 : vector<8x128xf32>
    %319 = arith.mulf %310, %263 : vector<8x128xf32>
    %320 = arith.mulf %304, %312 : vector<8x128xf32>
    %321 = arith.addf %319, %320 : vector<8x128xf32>
    %322 = math.tanh %321 : vector<8x128xf32>
    %323 = arith.mulf %318, %322 : vector<8x128xf32>
    %324 = vector.extract_strided_slice %298 {offsets = [0, 0], sizes = [8, 128], strides = [1, 1]} : vector<8x512xf32> to vector<8x128xf32>
    %325 = arith.negf %324 : vector<8x128xf32>
    %326 = math.exp %325 : vector<8x128xf32>
    %cst_85 = arith.constant 1.000000e+00 : f32
    %327 = vector.broadcast %cst_85 : f32 to vector<8x128xf32>
    %328 = arith.addf %327, %326 : vector<8x128xf32>
    %329 = arith.divf %327, %328 : vector<8x128xf32>
    %330 = vector.extract_strided_slice %298 {offsets = [0, 128], sizes = [8, 128], strides = [1, 1]} : vector<8x512xf32> to vector<8x128xf32>
    %331 = arith.negf %330 : vector<8x128xf32>
    %332 = math.exp %331 : vector<8x128xf32>
    %cst_86 = arith.constant 1.000000e+00 : f32
    %333 = vector.broadcast %cst_86 : f32 to vector<8x128xf32>
    %334 = arith.addf %333, %332 : vector<8x128xf32>
    %335 = arith.divf %333, %334 : vector<8x128xf32>
    %336 = vector.extract_strided_slice %298 {offsets = [0, 256], sizes = [8, 128], strides = [1, 1]} : vector<8x512xf32> to vector<8x128xf32>
    %337 = math.tanh %336 : vector<8x128xf32>
    %338 = vector.extract_strided_slice %298 {offsets = [0, 384], sizes = [8, 128], strides = [1, 1]} : vector<8x512xf32> to vector<8x128xf32>
    %339 = arith.negf %338 : vector<8x128xf32>
    %340 = math.exp %339 : vector<8x128xf32>
    %cst_87 = arith.constant 1.000000e+00 : f32
    %341 = vector.broadcast %cst_87 : f32 to vector<8x128xf32>
    %342 = arith.addf %341, %340 : vector<8x128xf32>
    %343 = arith.divf %341, %342 : vector<8x128xf32>
    %344 = arith.mulf %335, %288 : vector<8x128xf32>
    %345 = arith.mulf %329, %337 : vector<8x128xf32>
    %346 = arith.addf %344, %345 : vector<8x128xf32>
    %347 = math.tanh %346 : vector<8x128xf32>
    %348 = arith.mulf %343, %347 : vector<8x128xf32>
    %c48_88 = arith.constant 48 : index
    %c0_89 = arith.constant 0 : index
    %349 = vector.load %arg1[%c48_88, %c0_89] : memref<64x512xf32, #tpu.memory_space<vmem>>, vector<8x512xf32>
    %c0_90 = arith.constant 0 : index
    %c0_91 = arith.constant 0 : index
    %350 = vector.load %arg3[%c0_90, %c0_91] : memref<128x512xf32, #tpu.memory_space<vmem>>, vector<128x512xf32>
    %cst_92 = arith.constant dense<0.000000e+00> : vector<8x512xf32>
    %351 = tpu.matmul %323, %350, %cst_92 {dimension_numbers = #tpu.dot_dimension_numbers<[1], [0], [0], [1], [0, 0, 1, 1], [], []>} : vector<8x128xf32>, vector<128x512xf32>, vector<8x512xf32> -> vector<8x512xf32>
    %352 = arith.addf %349, %351 : vector<8x512xf32>
    %c8_93 = arith.constant 8 : index
    %c0_94 = arith.constant 0 : index
    %353 = vector.load %arg2[%c8_93, %c0_94] : memref<64x512xf32, #tpu.memory_space<vmem>>, vector<8x512xf32>
    %c0_95 = arith.constant 0 : index
    %c0_96 = arith.constant 0 : index
    %354 = vector.load %arg4[%c0_95, %c0_96] : memref<128x512xf32, #tpu.memory_space<vmem>>, vector<128x512xf32>
    %cst_97 = arith.constant dense<0.000000e+00> : vector<8x512xf32>
    %355 = tpu.matmul %348, %354, %cst_97 {dimension_numbers = #tpu.dot_dimension_numbers<[1], [0], [0], [1], [0, 0, 1, 1], [], []>} : vector<8x128xf32>, vector<128x512xf32>, vector<8x512xf32> -> vector<8x512xf32>
    %356 = arith.addf %353, %355 : vector<8x512xf32>
    %357 = vector.extract_strided_slice %352 {offsets = [0, 0], sizes = [8, 128], strides = [1, 1]} : vector<8x512xf32> to vector<8x128xf32>
    %358 = arith.negf %357 : vector<8x128xf32>
    %359 = math.exp %358 : vector<8x128xf32>
    %cst_98 = arith.constant 1.000000e+00 : f32
    %360 = vector.broadcast %cst_98 : f32 to vector<8x128xf32>
    %361 = arith.addf %360, %359 : vector<8x128xf32>
    %362 = arith.divf %360, %361 : vector<8x128xf32>
    %363 = vector.extract_strided_slice %352 {offsets = [0, 128], sizes = [8, 128], strides = [1, 1]} : vector<8x512xf32> to vector<8x128xf32>
    %364 = arith.negf %363 : vector<8x128xf32>
    %365 = math.exp %364 : vector<8x128xf32>
    %cst_99 = arith.constant 1.000000e+00 : f32
    %366 = vector.broadcast %cst_99 : f32 to vector<8x128xf32>
    %367 = arith.addf %366, %365 : vector<8x128xf32>
    %368 = arith.divf %366, %367 : vector<8x128xf32>
    %369 = vector.extract_strided_slice %352 {offsets = [0, 256], sizes = [8, 128], strides = [1, 1]} : vector<8x512xf32> to vector<8x128xf32>
    %370 = math.tanh %369 : vector<8x128xf32>
    %371 = vector.extract_strided_slice %352 {offsets = [0, 384], sizes = [8, 128], strides = [1, 1]} : vector<8x512xf32> to vector<8x128xf32>
    %372 = arith.negf %371 : vector<8x128xf32>
    %373 = math.exp %372 : vector<8x128xf32>
    %cst_100 = arith.constant 1.000000e+00 : f32
    %374 = vector.broadcast %cst_100 : f32 to vector<8x128xf32>
    %375 = arith.addf %374, %373 : vector<8x128xf32>
    %376 = arith.divf %374, %375 : vector<8x128xf32>
    %377 = arith.mulf %368, %321 : vector<8x128xf32>
    %378 = arith.mulf %362, %370 : vector<8x128xf32>
    %379 = arith.addf %377, %378 : vector<8x128xf32>
    %380 = math.tanh %379 : vector<8x128xf32>
    %381 = arith.mulf %376, %380 : vector<8x128xf32>
    %382 = vector.extract_strided_slice %356 {offsets = [0, 0], sizes = [8, 128], strides = [1, 1]} : vector<8x512xf32> to vector<8x128xf32>
    %383 = arith.negf %382 : vector<8x128xf32>
    %384 = math.exp %383 : vector<8x128xf32>
    %cst_101 = arith.constant 1.000000e+00 : f32
    %385 = vector.broadcast %cst_101 : f32 to vector<8x128xf32>
    %386 = arith.addf %385, %384 : vector<8x128xf32>
    %387 = arith.divf %385, %386 : vector<8x128xf32>
    %388 = vector.extract_strided_slice %356 {offsets = [0, 128], sizes = [8, 128], strides = [1, 1]} : vector<8x512xf32> to vector<8x128xf32>
    %389 = arith.negf %388 : vector<8x128xf32>
    %390 = math.exp %389 : vector<8x128xf32>
    %cst_102 = arith.constant 1.000000e+00 : f32
    %391 = vector.broadcast %cst_102 : f32 to vector<8x128xf32>
    %392 = arith.addf %391, %390 : vector<8x128xf32>
    %393 = arith.divf %391, %392 : vector<8x128xf32>
    %394 = vector.extract_strided_slice %356 {offsets = [0, 256], sizes = [8, 128], strides = [1, 1]} : vector<8x512xf32> to vector<8x128xf32>
    %395 = math.tanh %394 : vector<8x128xf32>
    %396 = vector.extract_strided_slice %356 {offsets = [0, 384], sizes = [8, 128], strides = [1, 1]} : vector<8x512xf32> to vector<8x128xf32>
    %397 = arith.negf %396 : vector<8x128xf32>
    %398 = math.exp %397 : vector<8x128xf32>
    %cst_103 = arith.constant 1.000000e+00 : f32
    %399 = vector.broadcast %cst_103 : f32 to vector<8x128xf32>
    %400 = arith.addf %399, %398 : vector<8x128xf32>
    %401 = arith.divf %399, %400 : vector<8x128xf32>
    %402 = arith.mulf %393, %346 : vector<8x128xf32>
    %403 = arith.mulf %387, %395 : vector<8x128xf32>
    %404 = arith.addf %402, %403 : vector<8x128xf32>
    %405 = math.tanh %404 : vector<8x128xf32>
    %406 = arith.mulf %401, %405 : vector<8x128xf32>
    %c56_104 = arith.constant 56 : index
    %c0_105 = arith.constant 0 : index
    %407 = vector.load %arg1[%c56_104, %c0_105] : memref<64x512xf32, #tpu.memory_space<vmem>>, vector<8x512xf32>
    %c0_106 = arith.constant 0 : index
    %c0_107 = arith.constant 0 : index
    %408 = vector.load %arg3[%c0_106, %c0_107] : memref<128x512xf32, #tpu.memory_space<vmem>>, vector<128x512xf32>
    %cst_108 = arith.constant dense<0.000000e+00> : vector<8x512xf32>
    %409 = tpu.matmul %381, %408, %cst_108 {dimension_numbers = #tpu.dot_dimension_numbers<[1], [0], [0], [1], [0, 0, 1, 1], [], []>} : vector<8x128xf32>, vector<128x512xf32>, vector<8x512xf32> -> vector<8x512xf32>
    %410 = arith.addf %407, %409 : vector<8x512xf32>
    %c0_109 = arith.constant 0 : index
    %c0_110 = arith.constant 0 : index
    %411 = vector.load %arg2[%c0_109, %c0_110] : memref<64x512xf32, #tpu.memory_space<vmem>>, vector<8x512xf32>
    %c0_111 = arith.constant 0 : index
    %c0_112 = arith.constant 0 : index
    %412 = vector.load %arg4[%c0_111, %c0_112] : memref<128x512xf32, #tpu.memory_space<vmem>>, vector<128x512xf32>
    %cst_113 = arith.constant dense<0.000000e+00> : vector<8x512xf32>
    %413 = tpu.matmul %406, %412, %cst_113 {dimension_numbers = #tpu.dot_dimension_numbers<[1], [0], [0], [1], [0, 0, 1, 1], [], []>} : vector<8x128xf32>, vector<128x512xf32>, vector<8x512xf32> -> vector<8x512xf32>
    %414 = arith.addf %411, %413 : vector<8x512xf32>
    %415 = vector.extract_strided_slice %410 {offsets = [0, 0], sizes = [8, 128], strides = [1, 1]} : vector<8x512xf32> to vector<8x128xf32>
    %416 = arith.negf %415 : vector<8x128xf32>
    %417 = math.exp %416 : vector<8x128xf32>
    %cst_114 = arith.constant 1.000000e+00 : f32
    %418 = vector.broadcast %cst_114 : f32 to vector<8x128xf32>
    %419 = arith.addf %418, %417 : vector<8x128xf32>
    %420 = arith.divf %418, %419 : vector<8x128xf32>
    %421 = vector.extract_strided_slice %410 {offsets = [0, 128], sizes = [8, 128], strides = [1, 1]} : vector<8x512xf32> to vector<8x128xf32>
    %422 = arith.negf %421 : vector<8x128xf32>
    %423 = math.exp %422 : vector<8x128xf32>
    %cst_115 = arith.constant 1.000000e+00 : f32
    %424 = vector.broadcast %cst_115 : f32 to vector<8x128xf32>
    %425 = arith.addf %424, %423 : vector<8x128xf32>
    %426 = arith.divf %424, %425 : vector<8x128xf32>
    %427 = vector.extract_strided_slice %410 {offsets = [0, 256], sizes = [8, 128], strides = [1, 1]} : vector<8x512xf32> to vector<8x128xf32>
    %428 = math.tanh %427 : vector<8x128xf32>
    %429 = vector.extract_strided_slice %410 {offsets = [0, 384], sizes = [8, 128], strides = [1, 1]} : vector<8x512xf32> to vector<8x128xf32>
    %430 = arith.negf %429 : vector<8x128xf32>
    %431 = math.exp %430 : vector<8x128xf32>
    %cst_116 = arith.constant 1.000000e+00 : f32
    %432 = vector.broadcast %cst_116 : f32 to vector<8x128xf32>
    %433 = arith.addf %432, %431 : vector<8x128xf32>
    %434 = arith.divf %432, %433 : vector<8x128xf32>
    %435 = arith.mulf %426, %379 : vector<8x128xf32>
    %436 = arith.mulf %420, %428 : vector<8x128xf32>
    %437 = arith.addf %435, %436 : vector<8x128xf32>
    %438 = math.tanh %437 : vector<8x128xf32>
    %439 = arith.mulf %434, %438 : vector<8x128xf32>
    %440 = vector.extract_strided_slice %414 {offsets = [0, 0], sizes = [8, 128], strides = [1, 1]} : vector<8x512xf32> to vector<8x128xf32>
    %441 = arith.negf %440 : vector<8x128xf32>
    %442 = math.exp %441 : vector<8x128xf32>
    %cst_117 = arith.constant 1.000000e+00 : f32
    %443 = vector.broadcast %cst_117 : f32 to vector<8x128xf32>
    %444 = arith.addf %443, %442 : vector<8x128xf32>
    %445 = arith.divf %443, %444 : vector<8x128xf32>
    %446 = vector.extract_strided_slice %414 {offsets = [0, 128], sizes = [8, 128], strides = [1, 1]} : vector<8x512xf32> to vector<8x128xf32>
    %447 = arith.negf %446 : vector<8x128xf32>
    %448 = math.exp %447 : vector<8x128xf32>
    %cst_118 = arith.constant 1.000000e+00 : f32
    %449 = vector.broadcast %cst_118 : f32 to vector<8x128xf32>
    %450 = arith.addf %449, %448 : vector<8x128xf32>
    %451 = arith.divf %449, %450 : vector<8x128xf32>
    %452 = vector.extract_strided_slice %414 {offsets = [0, 256], sizes = [8, 128], strides = [1, 1]} : vector<8x512xf32> to vector<8x128xf32>
    %453 = math.tanh %452 : vector<8x128xf32>
    %454 = vector.extract_strided_slice %414 {offsets = [0, 384], sizes = [8, 128], strides = [1, 1]} : vector<8x512xf32> to vector<8x128xf32>
    %455 = arith.negf %454 : vector<8x128xf32>
    %456 = math.exp %455 : vector<8x128xf32>
    %cst_119 = arith.constant 1.000000e+00 : f32
    %457 = vector.broadcast %cst_119 : f32 to vector<8x128xf32>
    %458 = arith.addf %457, %456 : vector<8x128xf32>
    %459 = arith.divf %457, %458 : vector<8x128xf32>
    %460 = arith.mulf %451, %404 : vector<8x128xf32>
    %461 = arith.mulf %445, %453 : vector<8x128xf32>
    %462 = arith.addf %460, %461 : vector<8x128xf32>
    %463 = math.tanh %462 : vector<8x128xf32>
    %464 = arith.mulf %459, %463 : vector<8x128xf32>
    %465 = tpu.concatenate %439, %464 in 1 : vector<8x128xf32>, vector<8x128xf32> -> vector<8x256xf32>
    %c0_120 = arith.constant 0 : index
    %c0_121 = arith.constant 0 : index
    %466 = vector.load %arg5[%c0_120, %c0_121] : memref<256x128xf32, #tpu.memory_space<vmem>>, vector<256x128xf32>
    %cst_122 = arith.constant dense<0.000000e+00> : vector<8x128xf32>
    %467 = tpu.matmul %465, %466, %cst_122 {dimension_numbers = #tpu.dot_dimension_numbers<[1], [0], [0], [1], [0, 0, 1, 1], [], []>} : vector<8x256xf32>, vector<256x128xf32>, vector<8x128xf32> -> vector<8x128xf32>
    %c0_123 = arith.constant 0 : index
    %c0_124 = arith.constant 0 : index
    %468 = vector.load %arg6[%c0_123, %c0_124] : memref<1x128xf32, #tpu.memory_space<vmem>>, vector<1x128xf32>
    %469 = vector.broadcast %468 : vector<1x128xf32> to vector<8x128xf32>
    %470 = arith.addf %467, %469 : vector<8x128xf32>
    %cst_125 = arith.constant 0.000000e+00 : f32
    %471 = vector.broadcast %cst_125 : f32 to vector<8x128xf32>
    %472 = arith.maximumf %470, %471 : vector<8x128xf32>
    %c0_126 = arith.constant 0 : index
    %c0_127 = arith.constant 0 : index
    %473 = vector.load %arg7[%c0_126, %c0_127] : memref<128x128xf32, #tpu.memory_space<vmem>>, vector<128x128xf32>
    %cst_128 = arith.constant dense<0.000000e+00> : vector<8x128xf32>
    %474 = tpu.matmul %472, %473, %cst_128 {dimension_numbers = #tpu.dot_dimension_numbers<[1], [0], [0], [1], [0, 0, 1, 1], [], []>} : vector<8x128xf32>, vector<128x128xf32>, vector<8x128xf32> -> vector<8x128xf32>
    %c0_129 = arith.constant 0 : index
    %c0_130 = arith.constant 0 : index
    %475 = vector.load %arg8[%c0_129, %c0_130] : memref<1x128xf32, #tpu.memory_space<vmem>>, vector<1x128xf32>
    %476 = vector.broadcast %475 : vector<1x128xf32> to vector<8x128xf32>
    %477 = arith.addf %474, %476 : vector<8x128xf32>
    %c0_131 = arith.constant 0 : index
    %c0_132 = arith.constant 0 : index
    %478 = vector.load %arg9[%c0_131, %c0_132] : memref<8x128xf32, #tpu.memory_space<vmem>>, vector<8x128xf32>
    tpu.vector_store %arg9[%c0_131, %c0_132], %477 {strides = array<i32>} : memref<8x128xf32, #tpu.memory_space<vmem>>, vector<8x128xf32>,
    return
  }
  func.func @transform_0(%arg0: i32) -> (i32, i32) {
    %c0_i32 = arith.constant 0 : i32
    %c0_i32_0 = arith.constant 0 : i32
    return %arg0, %c0_i32 : i32, i32
  }
  func.func @transform_1(%arg0: i32) -> (i32, i32) {
    %c0_i32 = arith.constant 0 : i32
    %c0_i32_0 = arith.constant 0 : i32
    return %arg0, %c0_i32 : i32, i32
  }
  func.func @transform_2(%arg0: i32) -> (i32, i32) {
    %c0_i32 = arith.constant 0 : i32
    %c0_i32_0 = arith.constant 0 : i32
    %c0_i32_1 = arith.constant 0 : i32
    return %c0_i32, %c0_i32_0 : i32, i32
  }
  func.func @transform_3(%arg0: i32) -> (i32, i32) {
    %c0_i32 = arith.constant 0 : i32
    %c0_i32_0 = arith.constant 0 : i32
    %c0_i32_1 = arith.constant 0 : i32
    return %c0_i32, %c0_i32_0 : i32, i32
  }
  func.func @transform_4(%arg0: i32) -> (i32, i32) {
    %c0_i32 = arith.constant 0 : i32
    %c0_i32_0 = arith.constant 0 : i32
    %c0_i32_1 = arith.constant 0 : i32
    return %c0_i32, %c0_i32_0 : i32, i32
  }
  func.func @transform_5(%arg0: i32) -> (i32, i32) {
    %c0_i32 = arith.constant 0 : i32
    %c0_i32_0 = arith.constant 0 : i32
    %c0_i32_1 = arith.constant 0 : i32
    return %c0_i32, %c0_i32_0 : i32, i32
  }
  func.func @transform_6(%arg0: i32) -> (i32, i32) {
    %c0_i32 = arith.constant 0 : i32
    %c0_i32_0 = arith.constant 0 : i32
    %c0_i32_1 = arith.constant 0 : i32
    return %c0_i32, %c0_i32_0 : i32, i32
  }
  func.func @transform_7(%arg0: i32) -> (i32, i32) {
    %c0_i32 = arith.constant 0 : i32
    %c0_i32_0 = arith.constant 0 : i32
    %c0_i32_1 = arith.constant 0 : i32
    return %c0_i32, %c0_i32_0 : i32, i32
  }
  func.func @transform_8(%arg0: i32) -> (i32, i32) {
    %c0_i32 = arith.constant 0 : i32
    %c0_i32_0 = arith.constant 0 : i32
    return %arg0, %c0_i32 : i32, i32
  }
}

</mosaic_0001>

<bundles_post_ra>
// kernel: bilstm_forward.1
= control target key start
LH: loop header
LB: loop body
LE: loop exit
PB: predicated region body
PF: predicated region fallthrough
CT: control target
= control target key end

     0   :  { %v6152_v3 = vmov 0.0   ;;  %vm4627_vm0 = vmmov 0   ;;  %s6143_s2 = inlined_call_operand.vmem [shape: f32[128,512], index: 2, kind: input, shape index: {}]   ;;  %s6144_s3 = inlined_call_operand.vmem [shape: f32[128,512], index: 3, kind: input, shape index: {}]   ;;  %s6145_s0 = inlined_call_operand.vmem [shape: f32[64,512], index: 0, kind: input, shape index: {}]   ;;  %s6146_s1 = inlined_call_operand.vmem [shape: f32[64,512], index: 1, kind: input, shape index: {}]   ;;  %s6147_s4 = inlined_call_operand.vmem [shape: f32[256,128], index: 4, kind: input, shape index: {}]   ;;  %s6148_s6 = inlined_call_operand.vmem [shape: f32[128,128], index: 6, kind: input, shape index: {}]   ;;  %s6149_s5 = inlined_call_operand.vmem [shape: f32[1,128], index: 5, kind: input, shape index: {}]   ;;  %s6150_s7 = inlined_call_operand.vmem [shape: f32[1,128], index: 7, kind: input, shape index: {}]   ;;  %s6151_s8 = inlined_call_operand.vmem [shape: f32[8,128], index: 8, kind: output, shape index: {}]  }
   0x1   :  { %v34_v0 = vld [vmem:[%s6143_s2 + $0x8] sm:$0xff]  ;;  %v33_v2 = vld [vmem:[%s6143_s2] sm:$0xff]  ;;  %161 = vmatprep.mubr.f32.mxu0 %v6152_v3  ;;  %232 = vmatprep.mubr.f32.mxu1 %v6152_v3  ;;  %v36_v19 = vld [vmem:[%s6143_s2 + $0x18] sm:$0xff] }
   0x2   :  { %v38_v1 = vld [vmem:[%s6143_s2 + $0x28] sm:$0xff]  ;;  %v37_v5 = vld [vmem:[%s6143_s2 + $0x20] sm:$0xff]  ;;  %v40_v20 = vld [vmem:[%s6143_s2 + $0x38] sm:$0xff] }
   0x3   :  { %v4684_v4 = vpack.c.bf16 %v38_v1, %v34_v0  ;;  %v42_v6 = vld [vmem:[%s6143_s2 + $0x48] sm:$0xff]  ;;  %v4695_v8 = vpack.c.bf16 %v37_v5, %v33_v2  ;;  %v41_v10 = vld [vmem:[%s6143_s2 + $0x40] sm:$0xff]  ;;  %v4736_v22 = vpack.c.bf16 %v40_v20, %v36_v19  ;;  %v35_v23 = vld [vmem:[%s6143_s2 + $0x10] sm:$0xff] }
   0x4   :  { %v46_v7 = vld [vmem:[%s6143_s2 + $0x68] sm:$0xff]  ;;  %v45_v11 = vld [vmem:[%s6143_s2 + $0x60] sm:$0xff]  ;;  %v39_v24 = vld [vmem:[%s6143_s2 + $0x30] sm:$0xff] }
   0x5   :  { %v4697_v9 = vpack.c.bf16 %v46_v7, %v42_v6  ;;  %v50_v12 = vld [vmem:[%s6143_s2 + $0x88] sm:$0xff]  ;;  %3287 = vmatprep.subr.bf16.mxu0 %v4684_v4  ;;  %v4713_v14 = vpack.c.bf16 %v45_v11, %v41_v10  ;;  %v49_v15 = vld [vmem:[%s6143_s2 + $0x80] sm:$0xff]  ;;  %v4744_v25 = vpack.c.bf16 %v39_v24, %v35_v23  ;;  %3319 = vmatprep.subr.bf16.mxu1 %v4736_v22  ;;  %v44_v27 = vld [vmem:[%s6143_s2 + $0x58] sm:$0xff] }
   0x6   :  { %v54_v13 = vld [vmem:[%s6143_s2 + $0xa8] sm:$0xff]  ;;  %3289 = vmatpush1.bf16.msra.mxu0 %v4695_v8  ;;  %v53_v16 = vld [vmem:[%s6143_s2 + $0xa0] sm:$0xff]  ;;  %v48_v28 = vld [vmem:[%s6143_s2 + $0x78] sm:$0xff] }
   0x7   :  { %3291 = vmatprep.subr.bf16.mxu0 %v4697_v9  ;;  %v4722_v17 = vpack.c.bf16 %v54_v13, %v50_v12  ;;  %v58_v18 = vld [vmem:[%s6143_s2 + $0xc8] sm:$0xff]  ;;  %v4747_v26 = vpack.c.bf16 %v53_v16, %v49_v15  ;;  %v43_v29 = vld [vmem:[%s6143_s2 + $0x50] sm:$0xff]  ;;  %v57_v31 = vld [vmem:[%s6143_s2 + $0xc0] sm:$0xff]  ;;  %3321 = vmatpush1.bf16.msra.mxu1 %v4744_v25  ;;  %v4769_v33 = vpack.c.bf16 %v48_v28, %v44_v27 }
   0x8   :  { %v62_v21 = vld [vmem:[%s6143_s2 + $0xe8] sm:$0xff]  ;;  %v61_v32 = vld [vmem:[%s6143_s2 + $0xe0] sm:$0xff]  ;;  %v47_v34 = vld [vmem:[%s6143_s2 + $0x70] sm:$0xff] }
   0x9   :  { %v4760_v30 = vpack.c.bf16 %v62_v21, %v58_v18  ;;  %v66_v35 = vld [vmem:[%s6143_s2 + $0x108] sm:$0xff]  ;;  %v4780_v37 = vpack.c.bf16 %v47_v34, %v43_v29  ;;  %v52_v38 = vld [vmem:[%s6143_s2 + $0x98] sm:$0xff]  ;;  %3323 = vmatprep.subr.bf16.mxu1 %v4769_v33  ;;  %v51_v40 = vld [vmem:[%s6143_s2 + $0x90] sm:$0xff]  ;;  %v4796_v42 = vpack.c.bf16 %v61_v32, %v57_v31 }
   0xa   :  { %3293 = vmatpush1.bf16.msra.mxu0 %v4713_v14  ;;  %v70_v36 = vld [vmem:[%s6143_s2 + $0x128] sm:$0xff]  ;;  %v56_v39 = vld [vmem:[%s6143_s2 + $0xb8] sm:$0xff]  ;;  %v55_v41 = vld [vmem:[%s6143_s2 + $0xb0] sm:$0xff] }
   0xb   :  { %3295 = vmatprep.subr.bf16.mxu0 %v4722_v17  ;;  %v65_v43 = vld [vmem:[%s6143_s2 + $0x100] sm:$0xff]  ;;  %v4804_v45 = vpack.c.bf16 %v56_v39, %v52_v38  ;;  %v4807_v46 = vpack.c.bf16 %v70_v36, %v66_v35  ;;  %3325 = vmatpush1.bf16.msra.mxu1 %v4780_v37  ;;  %v74_v47 = vld [vmem:[%s6143_s2 + $0x148] sm:$0xff]  ;;  %v4813_v48 = vpack.c.bf16 %v55_v41, %v51_v40  ;;  %v60_v49 = vld [vmem:[%s6143_s2 + $0xd8] sm:$0xff] }
   0xc   :  { %v69_v44 = vld [vmem:[%s6143_s2 + $0x120] sm:$0xff]  ;;  %v64_v50 = vld [vmem:[%s6143_s2 + $0xf8] sm:$0xff]  ;;  %v78_v51 = vld [vmem:[%s6143_s2 + $0x168] sm:$0xff] }
   0xd   :  { %6206 = vst [vmem:[#allocation2_spill] sm:$0xff] %v4807_v46  ;;  %3327 = vmatprep.subr.bf16.mxu1 %v4804_v45  ;;  %v4825_v52 = vpack.c.bf16 %v64_v50, %v60_v49  ;;  %v59_v53 = vld [vmem:[%s6143_s2 + $0xd0] sm:$0xff]  ;;  %v4834_v55 = vpack.c.bf16 %v69_v44, %v65_v43  ;;  %v68_v56 = vld [vmem:[%s6143_s2 + $0x118] sm:$0xff]  ;;  %v4843_v58 = vpack.c.bf16 %v78_v51, %v74_v47  ;;  %v73_v59 = vld [vmem:[%s6143_s2 + $0x140] sm:$0xff] }
   0xe   :  { %3297 = vmatpush1.bf16.msra.mxu0 %v4747_v26  ;;  %v63_v54 = vld [vmem:[%s6143_s2 + $0xf0] sm:$0xff]  ;;  %v72_v57 = vld [vmem:[%s6143_s2 + $0x138] sm:$0xff]  ;;  %v77_v60 = vld [vmem:[%s6143_s2 + $0x160] sm:$0xff] }
   0xf   :  { %3299 = vmatprep.subr.bf16.mxu0 %v4760_v30  ;;  %6207 = vst [vmem:[#allocation3_spill] sm:$0xff] %v4834_v55  ;;  %6208 = vst [vmem:[#allocation4_spill] sm:$0xff] %v4843_v58  ;;  %3329 = vmatpush1.bf16.msra.mxu1 %v4813_v48  ;;  %v82_v61 = vld [vmem:[%s6143_s2 + $0x188] sm:$0xff]  ;;  %v4855_v62 = vpack.c.bf16 %v63_v54, %v59_v53  ;;  %v4861_v0 = vpack.c.bf16 %v72_v57, %v68_v56  ;;  %v67_v1 = vld [vmem:[%s6143_s2 + $0x110] sm:$0xff] }
  0x10   :  { %v86_v63 = vld [vmem:[%s6143_s2 + $0x1a8] sm:$0xff]  ;;  %3331 = vmatprep.subr.bf16.mxu1 %v4825_v52  ;;  %v71_v2 = vld [vmem:[%s6143_s2 + $0x130] sm:$0xff]  ;;  %v76_v5 = vld [vmem:[%s6143_s2 + $0x158] sm:$0xff]  ;;  %v4876_v7 = vpack.c.bf16 %v77_v60, %v73_v59 }
  0x11   :  { %6209 = vst [vmem:[#allocation5_spill] sm:$0xff] %v4855_v62  ;;  %6210 = vst [vmem:[#allocation6_spill] sm:$0xff] %v4861_v0  ;;  %v80_v6 = vld [vmem:[%s6143_s2 + $0x178] sm:$0xff]  ;;  %v4879_v10 = vpack.c.bf16 %v86_v63, %v82_v61  ;;  %v81_v11 = vld [vmem:[%s6143_s2 + $0x180] sm:$0xff]  ;;  %v4891_v15 = vpack.c.bf16 %v71_v2, %v67_v1 }
  0x12   :  { %3301 = vmatpush1.bf16.msra.mxu0 %v4796_v42  ;;  %6211 = vst [vmem:[#allocation7_spill] sm:$0xff] %v4876_v7  ;;  %v85_v12 = vld [vmem:[%s6143_s2 + $0x1a0] sm:$0xff]  ;;  %v90_v13 = vld [vmem:[%s6143_s2 + $0x1c8] sm:$0xff]  ;;  %v4897_v18 = vpack.c.bf16 %v80_v6, %v76_v5  ;;  %v75_v19 = vld [vmem:[%s6143_s2 + $0x150] sm:$0xff] }
  0x13   :  { %3303 = vmatprep.subr.bf16.mxu0 %v4807_v46  ;;  %6212 = vst [vmem:[#allocation8_spill] sm:$0xff] %v4879_v10  ;;  %3333 = vmatpush1.bf16.msra.mxu1 %v4855_v62  ;;  %6213 = vst [vmem:[#allocation9_spill] sm:$0xff] %v4891_v15  ;;  %v94_v16 = vld [vmem:[%s6143_s2 + $0x1e8] sm:$0xff]  ;;  %v79_v20 = vld [vmem:[%s6143_s2 + $0x170] sm:$0xff]  ;;  %v4912_v24 = vpack.c.bf16 %v85_v12, %v81_v11 }
  0x14   :  { %3335 = vmatprep.subr.bf16.mxu1 %v4861_v0  ;;  %6214 = vst [vmem:[#allocation10_spill] sm:$0xff] %v4897_v18  ;;  %v84_v21 = vld [vmem:[%s6143_s2 + $0x198] sm:$0xff]  ;;  %v4915_v27 = vpack.c.bf16 %v94_v16, %v90_v13  ;;  %v89_v28 = vld [vmem:[%s6143_s2 + $0x1c0] sm:$0xff]  ;;  %v248_v31 = vld [vmem:[%s6144_s3 + $0x8] sm:$0xff]  ;;  %v4927_v32 = vpack.c.bf16 %v79_v20, %v75_v19 }
  0x15   :  { %v88_v23 = vld [vmem:[%s6143_s2 + $0x1b8] sm:$0xff]  ;;  %6215 = vst [vmem:[#allocation11_spill] sm:$0xff] %v4912_v24  ;;  %v93_v29 = vld [vmem:[%s6143_s2 + $0x1e0] sm:$0xff]  ;;  %v252_v34 = vld [vmem:[%s6144_s3 + $0x28] sm:$0xff] }
  0x16   :  { %3305 = vmatpush1.bf16.msra.mxu0 %v4834_v55  ;;  %6216 = vst [vmem:[#allocation12_spill] sm:$0xff] %v4915_v27  ;;  %6217 = vst [vmem:[#allocation13_spill] sm:$0xff] %v4927_v32  ;;  %v4933_v35 = vpack.c.bf16 %v88_v23, %v84_v21  ;;  %v83_v36 = vld [vmem:[%s6143_s2 + $0x190] sm:$0xff]  ;;  %v92_v39 = vld [vmem:[%s6143_s2 + $0x1d8] sm:$0xff]  ;;  %v4948_v41 = vpack.c.bf16 %v93_v29, %v89_v28  ;;  %v4951_v43 = vpack.c.bf16 %v252_v34, %v248_v31 }
  0x17   :  { %3307 = vmatprep.subr.bf16.mxu0 %v4843_v58  ;;  %3337 = vmatpush1.bf16.msra.mxu1 %v4891_v15  ;;  %v87_v38 = vld [vmem:[%s6143_s2 + $0x1b0] sm:$0xff]  ;;  %v96_v40 = vld [vmem:[%s6143_s2 + $0x1f8] sm:$0xff]  ;;  %v247_v44 = vld [vmem:[%s6144_s3] sm:$0xff] }
  0x18   :  { %3339 = vmatprep.subr.bf16.mxu1 %v4897_v18  ;;  %6218 = vst [vmem:[#allocation14_spill] sm:$0xff] %v4933_v35  ;;  %6219 = vst [vmem:[#allocation15_spill] sm:$0xff] %v4948_v41  ;;  %v251_v47 = vld [vmem:[%s6144_s3 + $0x20] sm:$0xff]  ;;  %v256_v49 = vld [vmem:[%s6144_s3 + $0x48] sm:$0xff]  ;;  %v4963_v50 = vpack.c.bf16 %v87_v38, %v83_v36  ;;  %v4969_v53 = vpack.c.bf16 %v96_v40, %v92_v39 }
  0x19   :  { %6220 = vst [vmem:[#allocation16_spill] sm:$0xff] %v4951_v43  ;;  %v260_v51 = vld [vmem:[%s6144_s3 + $0x68] sm:$0xff]  ;;  %v91_v54 = vld [vmem:[%s6143_s2 + $0x1d0] sm:$0xff]  ;;  %v250_v57 = vld [vmem:[%s6144_s3 + $0x18] sm:$0xff]  ;;  %v4984_v60 = vpack.c.bf16 %v251_v47, %v247_v44 }
  0x1a   :  { %3309 = vmatpush1.bf16.msra.mxu0 %v4876_v7  ;;  %6221 = vst [vmem:[#allocation17_spill] sm:$0xff] %v4963_v50  ;;  %6222 = vst [vmem:[#allocation18_spill] sm:$0xff] %v4969_v53  ;;  %v95_v56 = vld [vmem:[%s6143_s2 + $0x1f0] sm:$0xff]  ;;  %v254_v59 = vld [vmem:[%s6144_s3 + $0x38] sm:$0xff]  ;;  %v4987_v61 = vpack.c.bf16 %v260_v51, %v256_v49 }
  0x1b   :  { %3311 = vmatprep.subr.bf16.mxu0 %v4879_v10  ;;  %3341 = vmatpush1.bf16.msra.mxu1 %v4927_v32  ;;  %v255_v63 = vld [vmem:[%s6144_s3 + $0x40] sm:$0xff]  ;;  %v264_v2 = vld [vmem:[%s6144_s3 + $0x88] sm:$0xff]  ;;  %v4999_v5 = vpack.c.bf16 %v95_v56, %v91_v54  ;;  %v5005_v11 = vpack.c.bf16 %v254_v59, %v250_v57  ;;  %v249_v12 = vld [vmem:[%s6144_s3 + $0x10] sm:$0xff] }
  0x1c   :  { %3343 = vmatprep.subr.bf16.mxu1 %v4933_v35  ;;  %v259_v1 = vld [vmem:[%s6144_s3 + $0x60] sm:$0xff]  ;;  %v268_v6 = vld [vmem:[%s6144_s3 + $0xa8] sm:$0xff]  ;;  %v253_v13 = vld [vmem:[%s6144_s3 + $0x30] sm:$0xff] }
  0x1d   :  { %6223 = vst [vmem:[#allocation19_spill] sm:$0xff] %v4999_v5  ;;  %6224 = vst [vmem:[#allocation20_spill] sm:$0xff] %v5005_v11  ;;  %v258_v16 = vld [vmem:[%s6144_s3 + $0x58] sm:$0xff]  ;;  %v5021_v20 = vpack.c.bf16 %v259_v1, %v255_v63  ;;  %v5025_v21 = vpack.c.bf16 %v268_v6, %v264_v2  ;;  %v263_v23 = vld [vmem:[%s6144_s3 + $0x80] sm:$0xff]  ;;  %v5037_v31 = vpack.c.bf16 %v253_v13, %v249_v12 }
  0x1e   :  { %3313 = vmatpush1.bf16.msra.mxu0 %v4912_v24  ;;  %v262_v19 = vld [vmem:[%s6144_s3 + $0x78] sm:$0xff]  ;;  %v267_v28 = vld [vmem:[%s6144_s3 + $0xa0] sm:$0xff]  ;;  %v272_v29 = vld [vmem:[%s6144_s3 + $0xc8] sm:$0xff] }
  0x1f   :  { %3315 = vmatprep.subr.bf16.mxu0 %v4915_v27  ;;  %3345 = vmatpush1.bf16.msra.mxu1 %v4963_v50  ;;  %v276_v34 = vld [vmem:[%s6144_s3 + $0xe8] sm:$0xff]  ;;  %v5043_v36 = vpack.c.bf16 %v262_v19, %v258_v16  ;;  %v257_v38 = vld [vmem:[%s6144_s3 + $0x50] sm:$0xff]  ;;  %v266_v40 = vld [vmem:[%s6144_s3 + $0x98] sm:$0xff]  ;;  %v5058_v47 = vpack.c.bf16 %v267_v28, %v263_v23 }
  0x20   :  { %3347 = vmatprep.subr.bf16.mxu1 %v4969_v53  ;;  %v261_v39 = vld [vmem:[%s6144_s3 + $0x70] sm:$0xff]  ;;  %v270_v44 = vld [vmem:[%s6144_s3 + $0xb8] sm:$0xff]  ;;  %v5062_v49 = vpack.c.bf16 %v276_v34, %v272_v29  ;;  %v271_v51 = vld [vmem:[%s6144_s3 + $0xc0] sm:$0xff] }
  0x21   :  { %v275_v54 = vld [vmem:[%s6144_s3 + $0xe0] sm:$0xff]  ;;  %v280_v56 = vld [vmem:[%s6144_s3 + $0x108] sm:$0xff]  ;;  %v5074_v57 = vpack.c.bf16 %v261_v39, %v257_v38  ;;  %v5080_v63 = vpack.c.bf16 %v270_v44, %v266_v40  ;;  %v265_v1 = vld [vmem:[%s6144_s3 + $0x90] sm:$0xff] }
  0x22   :  { %3317 = vmatpush1.bf16.msra.mxu0 %v4948_v41  ;;  %v284_v59 = vld [vmem:[%s6144_s3 + $0x128] sm:$0xff]  ;;  %v269_v2 = vld [vmem:[%s6144_s3 + $0xb0] sm:$0xff]  ;;  %v274_v6 = vld [vmem:[%s6144_s3 + $0xd8] sm:$0xff]  ;;  %v5096_v13 = vpack.c.bf16 %v275_v54, %v271_v51 }
  0x23   :  { %3351 = vmatprep.subr.bf16.mxu0 %v4951_v43  ;;  %3349 = vmatpush1.bf16.msra.mxu1 %v4999_v5  ;;  %v278_v12 = vld [vmem:[%s6144_s3 + $0xf8] sm:$0xff]  ;;  %v5099_v16 = vpack.c.bf16 %v284_v59, %v280_v56  ;;  %v279_v19 = vld [vmem:[%s6144_s3 + $0x100] sm:$0xff]  ;;  %v288_v28 = vld [vmem:[%s6144_s3 + $0x148] sm:$0xff]  ;;  %v5111_v29 = vpack.c.bf16 %v269_v2, %v265_v1 }
  0x24   :  { %3383 = vmatprep.subr.bf16.mxu1 %v5005_v11  ;;  %v283_v23 = vld [vmem:[%s6144_s3 + $0x120] sm:$0xff]  ;;  %v292_v34 = vld [vmem:[%s6144_s3 + $0x168] sm:$0xff]  ;;  %v5117_v38 = vpack.c.bf16 %v278_v12, %v274_v6  ;;  %v273_v39 = vld [vmem:[%s6144_s3 + $0xd0] sm:$0xff] }
  0x25   :  { %162 = vmatmul.mubr.f32.vlgmr.msra.gmra.mrb[0].mxu0 %v6152_v3  ;;  %6225 = vst [vmem:[#allocation21_spill] sm:$0xff] %v5099_v16  ;;  %v277_v40 = vld [vmem:[%s6144_s3 + $0xf0] sm:$0xff]  ;;  %v282_v44 = vld [vmem:[%s6144_s3 + $0x118] sm:$0xff]  ;;  %v5132_v54 = vpack.c.bf16 %v283_v23, %v279_v19  ;;  %v5135_v56 = vpack.c.bf16 %v292_v34, %v288_v28  ;;  %v287_v59 = vld [vmem:[%s6144_s3 + $0x140] sm:$0xff] }
  0x26   :  { %3353 = vmatpush1.bf16.msra.mxu0 %v4984_v60  ;;  %375 = vmatprep.mubr.f32.mxu0 %v6152_v3  ;;  %v286_v51 = vld [vmem:[%s6144_s3 + $0x138] sm:$0xff]  ;;  %v291_v1 = vld [vmem:[%s6144_s3 + $0x160] sm:$0xff]  ;;  %v296_v2 = vld [vmem:[%s6144_s3 + $0x188] sm:$0xff]  ;;  %v5147_v6 = vpack.c.bf16 %v277_v40, %v273_v39 }
  0x27   :  { %3355 = vmatprep.subr.bf16.mxu0 %v4987_v61  ;;  %233 = vmatmul.mubr.f32.vlgmr.msra.gmra.mrb[0].mxu1 %v6152_v3  ;;  %6226 = vst [vmem:[#allocation22_spill] sm:$0xff] %v5132_v54  ;;  %6227 = vst [vmem:[#allocation23_spill] sm:$0xff] %v5135_v56  ;;  %v300_v12 = vld [vmem:[%s6144_s3 + $0x1a8] sm:$0xff]  ;;  %v5153_v19 = vpack.c.bf16 %v286_v51, %v282_v44  ;;  %v281_v23 = vld [vmem:[%s6144_s3 + $0x110] sm:$0xff]  ;;  %v5168_v40 = vpack.c.bf16 %v291_v1, %v287_v59 }
  0x28   :  { %3385 = vmatpush1.bf16.msra.mxu1 %v5037_v31  ;;  %446 = vmatprep.mubr.f32.mxu1 %v6152_v3  ;;  %6228 = vst [vmem:[#allocation24_spill] sm:$0xff] %v5147_v6  ;;  %v285_v28 = vld [vmem:[%s6144_s3 + $0x130] sm:$0xff]  ;;  %v290_v34 = vld [vmem:[%s6144_s3 + $0x158] sm:$0xff]  ;;  %v5171_v44 = vpack.c.bf16 %v300_v12, %v296_v2  ;;  %v295_v51 = vld [vmem:[%s6144_s3 + $0x180] sm:$0xff] }
  0x29   :  { %3387 = vmatprep.subr.bf16.mxu1 %v5043_v36  ;;  %6229 = vst [vmem:[#allocation25_spill] sm:$0xff] %v5153_v19  ;;  %v294_v39 = vld [vmem:[%s6144_s3 + $0x178] sm:$0xff]  ;;  %v299_v3 = vld [vmem:[%s6144_s3 + $0x1a0] sm:$0xff]  ;;  %v5183_v59 = vpack.c.bf16 %v285_v28, %v281_v23  ;;  %v308_v1 = vld [vmem:[%s6144_s3 + $0x1e8] sm:$0xff] }
  0x2a   :  { %3357 = vmatpush1.bf16.msra.mxu0 %v5021_v20  ;;  %6230 = vst [vmem:[#allocation26_spill] sm:$0xff] %v5171_v44  ;;  %v5189_v2 = vpack.c.bf16 %v294_v39, %v290_v34  ;;  %v289_v12 = vld [vmem:[%s6144_s3 + $0x150] sm:$0xff]  ;;  %v298_v23 = vld [vmem:[%s6144_s3 + $0x198] sm:$0xff]  ;;  %v5204_v34 = vpack.c.bf16 %v299_v3, %v295_v51 }
  0x2b   :  { %3359 = vmatprep.subr.bf16.mxu0 %v5025_v21  ;;  %v302_v28 = vld [vmem:[%s6144_s3 + $0x1b8] sm:$0xff]  ;;  %v301_v51 = vld [vmem:[%s6144_s3 + $0x1b0] sm:$0xff] }
  0x2c   :  { %3389 = vmatpush1.bf16.msra.mxu1 %v5074_v57  ;;  %6231 = vst [vmem:[#allocation27_spill] sm:$0xff] %v5204_v34  ;;  %v5219_v3 = vpack.c.bf16 %v302_v28, %v298_v23 }
  0x2d   :  { %3391 = vmatprep.subr.bf16.mxu1 %v5080_v63 }
  0x2e   :  { %3361 = vmatpush1.bf16.msra.mxu0 %v5058_v47 }
  0x2f   :  { %3363 = vmatprep.subr.bf16.mxu0 %v5062_v49 }
  0x30   :  { %3393 = vmatpush1.bf16.msra.mxu1 %v5111_v29 }
  0x31   :  { %3395 = vmatprep.subr.bf16.mxu1 %v5117_v38 }
  0x32   :  { %3365 = vmatpush1.bf16.msra.mxu0 %v5096_v13 }
  0x33   :  { %3367 = vmatprep.subr.bf16.mxu0 %v5099_v16  ;;  %v307_v16 = vld [vmem:[%s6144_s3 + $0x1e0] sm:$0xff] }
  0x34   :  { %3397 = vmatpush1.bf16.msra.mxu1 %v5147_v6 }
  0x35   :  { %3399 = vmatprep.subr.bf16.mxu1 %v5153_v19  ;;  %v303_v19 = vld [vmem:[%s6144_s3 + $0x1c0] sm:$0xff] }
  0x36   :  { %3369 = vmatpush1.bf16.msra.mxu0 %v5132_v54  ;;  %v304_v54 = vld [vmem:[%s6144_s3 + $0x1c8] sm:$0xff] }
  0x37   :  { %3371 = vmatprep.subr.bf16.mxu0 %v5135_v56  ;;  %v293_v56 = vld [vmem:[%s6144_s3 + $0x170] sm:$0xff]  ;;  %v5207_v39 = vpack.c.bf16 %v308_v1, %v304_v54  ;;  %v306_v1 = vld [vmem:[%s6144_s3 + $0x1d8] sm:$0xff] }
  0x38   :  { %3401 = vmatpush1.bf16.msra.mxu1 %v5183_v59  ;;  %v5216_v6 = vpack.c.bf16 %v293_v56, %v289_v12  ;;  %v297_v54 = vld [vmem:[%s6144_s3 + $0x190] sm:$0xff]  ;;  %v310_v56 = vld [vmem:[%s6144_s3 + $0x1f8] sm:$0xff]  ;;  %v5234_v12 = vpack.c.bf16 %v307_v16, %v303_v19  ;;  %v6232_v19 = vmov 0.0  }
  0x39   :  { %3403 = vmatprep.subr.bf16.mxu1 %v5189_v2  ;;  %v5238_v23 = vpack.c.bf16 %v301_v51, %v297_v54  ;;  %v5241_v28 = vpack.c.bf16 %v310_v56, %v306_v1 }
  0x3a   :  { %3373 = vmatpush1.bf16.msra.mxu0 %v5168_v40 }
  0x3b   :  { %3375 = vmatprep.subr.bf16.mxu0 %v5171_v44  ;;  %v305_v44 = vld [vmem:[%s6144_s3 + $0x1d0] sm:$0xff] }
  0x3c   :  { %3405 = vmatpush1.bf16.msra.mxu1 %v5216_v6 }
  0x3d   :  { %3407 = vmatprep.subr.bf16.mxu1 %v5219_v3 }
  0x3e   :  { %3377 = vmatpush1.bf16.msra.mxu0 %v5204_v34  ;;  %v309_v34 = vld [vmem:[%s6144_s3 + $0x1f0] sm:$0xff] }
  0x3f   :  { %3379 = vmatprep.subr.bf16.mxu0 %v5207_v39  ;;  %v5251_v16 = vpack.c.bf16 %v309_v34, %v305_v44  ;;  %v29_v44 = vld [vmem:[%s6145_s0] sm:$0xff]  ;;  %v30_v34 = vld [vmem:[%s6145_s0 + $0x8] sm:$0xff] }
  0x40   :  { %3409 = vmatpush1.bf16.msra.mxu1 %v5238_v23 }
  0x41   :  { %3411 = vmatprep.subr.bf16.mxu1 %v5241_v28 }
  0x42   :  { %3381 = vmatpush1.bf16.msra.mxu0 %v5234_v12 }
  0x43   :  { %3415 = vmatprep.subr.bf16.mxu0 %v4684_v4 }
  0x44   :  { %3413 = vmatpush1.bf16.msra.mxu1 %v5251_v16 }
  0x45   :  { %376 = vmatmul.mubr.f32.vlgmr.msra.gmra.mrb[2].mxu0 %v6232_v19  ;;  %3447 = vmatprep.subr.bf16.mxu1 %v4736_v22 }
  0x46   :  { %3417 = vmatpush1.bf16.msra.mxu0 %v4695_v8  ;;  %573 = vmatprep.mubr.f32.mxu0 %v6232_v19 }
  0x47   :  { %3419 = vmatprep.subr.bf16.mxu0 %v4697_v9  ;;  %447 = vmatmul.mubr.f32.vlgmr.msra.gmra.mrb[2].mxu1 %v6232_v19 }
  0x48   :  { %3449 = vmatpush1.bf16.msra.mxu1 %v4744_v25  ;;  %644 = vmatprep.mubr.f32.mxu1 %v6232_v19 }
  0x49   :  { %3451 = vmatprep.subr.bf16.mxu1 %v4769_v33 }
  0x4a   :  { %3421 = vmatpush1.bf16.msra.mxu0 %v4713_v14 }
  0x4b   :  { %3423 = vmatprep.subr.bf16.mxu0 %v4722_v17 }
  0x4c   :  { %3453 = vmatpush1.bf16.msra.mxu1 %v4780_v37 }
  0x4d   :  { %3455 = vmatprep.subr.bf16.mxu1 %v4804_v45 }
  0x4e   :  { %3425 = vmatpush1.bf16.msra.mxu0 %v4747_v26 }
  0x4f   :  { %3427 = vmatprep.subr.bf16.mxu0 %v4760_v30 }
  0x50   :  { %3457 = vmatpush1.bf16.msra.mxu1 %v4813_v48 }
  0x51   :  { %3459 = vmatprep.subr.bf16.mxu1 %v4825_v52 }
  0x52   :  { %3429 = vmatpush1.bf16.msra.mxu0 %v4796_v42 }
  0x53   :  { %3431 = vmatprep.subr.bf16.mxu0 %v4807_v46 }
  0x54   :  { %3461 = vmatpush1.bf16.msra.mxu1 %v4855_v62 }
  0x55   :  { %3463 = vmatprep.subr.bf16.mxu1 %v4861_v0 }
  0x56   :  { %3433 = vmatpush1.bf16.msra.mxu0 %v4834_v55 }
  0x57   :  { %3435 = vmatprep.subr.bf16.mxu0 %v4843_v58 }
  0x58   :  { %3465 = vmatpush1.bf16.msra.mxu1 %v4891_v15 }
  0x59   :  { %3467 = vmatprep.subr.bf16.mxu1 %v4897_v18 }
  0x5a   :  { %3437 = vmatpush1.bf16.msra.mxu0 %v4876_v7 }
  0x5b   :  { %3439 = vmatprep.subr.bf16.mxu0 %v4879_v10 }
  0x5c   :  { %3469 = vmatpush1.bf16.msra.mxu1 %v4927_v32 }
  0x5d   :  { %3471 = vmatprep.subr.bf16.mxu1 %v4933_v35 }
  0x5e   :  { %3441 = vmatpush1.bf16.msra.mxu0 %v4912_v24 }
  0x5f   :  { %3443 = vmatprep.subr.bf16.mxu0 %v4915_v27 }
  0x60   :  { %3473 = vmatpush1.bf16.msra.mxu1 %v4963_v50  ;;  %v31_v50 = vld [vmem:[%s6145_s0 + $0x10] sm:$0xff] }
  0x61   :  { %3475 = vmatprep.subr.bf16.mxu1 %v4969_v53 }
  0x62   :  { %3445 = vmatpush1.bf16.msra.mxu0 %v4948_v41 }
  0x63   :  { %3479 = vmatprep.subr.bf16.mxu0 %v4951_v43 }
  0x64   :  { %3477 = vmatpush1.bf16.msra.mxu1 %v4999_v5  ;;  %v32_v5 = vld [vmem:[%s6145_s0 + $0x18] sm:$0xff] }
  0x65   :  { %3511 = vmatprep.subr.bf16.mxu1 %v5005_v11 }
  0xf8   :  { %v163_v54 = vpop.f32.mrb[0].mxu0 }
  0xf9   :  { %v239_v51 = vadd.f32 %v163_v54, %v29_v44  ;;  %v165_v1 = vpop.f32.mrb[1].mxu0 }
  0xfa   :  { %v240_v56 = vadd.f32 %v165_v1, %v30_v34  ;;  %v234_v11 = vpop.f32.mrb[0].mxu1 }
  0xfb   :  { %v3149_v41 = vmul.f32 -1.442695, %v239_v51  ;;  %v236_v53 = vpop.f32.mrb[1].mxu1  ;;  %v241_v35 = vadd.f32 %v234_v11, %v31_v50 }
  0xfc   :  { %v3150_v43 = vmul.f32 -1.442695, %v240_v56  ;;  %v242_v27 = vadd.f32 %v236_v53, %v32_v5 }
  0xfd   :  { %4369 = vpow2.f32 %v3149_v41 }
  0xfe   :  { %4371 = vpow2.f32 %v3150_v43  ;;  %v3151_v24 = vmul.f32 -1.442695, %v242_v27  ;;  %v243_v27 = vld [vmem:[%s6146_s1 + $0xe0] sm:$0xff] }
 0x100   :  { %4373 = vpow2.f32 %v3151_v24  ;;  %v244_v24 = vld [vmem:[%s6146_s1 + $0xe8] sm:$0xff] }
 0x101   :  { %4375 = vtanh.f32 %v241_v35 }
 0x107   :  { %v4370_v44 = vpop.eup %4369 }
 0x108   :  { %v4372_v34 = vpop.eup %4371  ;;  %v460_v54 = vadd.f32 1.0, %v4370_v44 }
 0x109   :  { %v466_v51 = vadd.f32 1.0, %v4372_v34 }
 0x10a   :  { %4377 = vrcp.f32 %v460_v54  ;;  %v4374_v1 = vpop.eup %4373 }
 0x10b   :  { %4379 = vrcp.f32 %v466_v51  ;;  %v4376_v41 = vpop.eup %4375  ;;  %v473_v43 = vadd.f32 1.0, %v4374_v1 }
 0x10d   :  { %4381 = vrcp.f32 %v473_v43  ;;  %v245_v43 = vld [vmem:[%s6146_s1 + $0xf0] sm:$0xff] }
 0x114   :  { %v4378_v56 = vpop.eup %4377 }
 0x115   :  { %v4380_v10 = vpop.eup %4379  ;;  %v477_v53 = vmul.f32 %v4378_v56, %v4376_v41 }
 0x116   :  { %v476_v5 = vmul.f32 0.0, %v4380_v10  ;;  %v246_v10 = vld [vmem:[%s6146_s1 + $0xf8] sm:$0xff] }
 0x118   :  { %v5311_v50 = vadd.f32 %v477_v53, %v476_v5  ;;  %v377_v35 = vpop.f32.mrb[2].mxu0  ;;  %v4382_v53 = vpop.eup %4381 }
 0x119   :  { %v453_v11 = vadd.f32 %v377_v35, %v243_v27  ;;  %v379_v44 = vpop.f32.mrb[3].mxu0 }
 0x11a   :  { %4383 = vtanh.f32 %v5311_v50  ;;  %v454_v34 = vadd.f32 %v379_v44, %v244_v24  ;;  %v448_v1 = vpop.f32.mrb[2].mxu1 }
 0x11b   :  { %v3152_v54 = vmul.f32 -1.442695, %v453_v11  ;;  %v450_v41 = vpop.f32.mrb[3].mxu1  ;;  %v455_v35 = vadd.f32 %v448_v1, %v245_v43 }
 0x11c   :  { %v3153_v51 = vmul.f32 -1.442695, %v454_v34  ;;  %v456_v56 = vadd.f32 %v450_v41, %v246_v10 }
 0x11d   :  { %4385 = vpow2.f32 %v3152_v54 }
 0x11e   :  { %4387 = vpow2.f32 %v3153_v51  ;;  %v3154_v5 = vmul.f32 -1.442695, %v456_v56  ;;  %v6233_v56 = vld [vmem:[#allocation24_spill] sm:$0xff] }
 0x120   :  { %4389 = vpow2.f32 %v3154_v5  ;;  %v6234_v5 = vld [vmem:[#allocation21_spill] sm:$0xff] }
 0x121   :  { %4391 = vtanh.f32 %v455_v35 }
 0x124   :  { %v4384_v27 = vpop.eup %4383 }
 0x125   :  { %v480_v24 = vmul.f32 %v4384_v27, %v4382_v53  ;;  %v6235_v27 = vld [vmem:[#allocation25_spill] sm:$0xff] }
 0x127   :  { %v4386_v11 = vpop.eup %4385  ;;  %574 = vmatmul.mubr.f32.vlgmr.msra.gmra.mrb[4].mxu0 %v480_v24  ;;  %645 = vmatmul.mubr.f32.vlgmr.msra.gmra.mrb[4].mxu1 %v480_v24 }
 0x128   :  { %v4388_v44 = vpop.eup %4387  ;;  %v484_v34 = vadd.f32 1.0, %v4386_v11  ;;  %3481 = vmatpush1.bf16.msra.mxu0 %v4984_v60  ;;  %3513 = vmatpush1.bf16.msra.mxu1 %v5037_v31  ;;  %v6236_v11 = vld [vmem:[#allocation22_spill] sm:$0xff] }
 0x129   :  { %v490_v54 = vadd.f32 1.0, %v4388_v44  ;;  %3483 = vmatprep.subr.bf16.mxu0 %v4987_v61  ;;  %3515 = vmatprep.subr.bf16.mxu1 %v5043_v36  ;;  %v6237_v44 = vld [vmem:[#allocation23_spill] sm:$0xff] }
 0x12a   :  { %4393 = vrcp.f32 %v484_v34  ;;  %723 = vmatprep.mubr.f32.mxu0 %v6232_v19  ;;  %794 = vmatprep.mubr.f32.mxu1 %v6232_v19  ;;  %v4390_v51 = vpop.eup %4389  ;;  %v6238_v34 = vld [vmem:[#allocation26_spill] sm:$0xff] }
 0x12b   :  { %4395 = vrcp.f32 %v490_v54  ;;  %v4392_v10 = vpop.eup %4391  ;;  %v497_v41 = vadd.f32 1.0, %v4390_v51  ;;  %v6239_v54 = vld [vmem:[#allocation27_spill] sm:$0xff] }
 0x12c   :  { %3485 = vmatpush1.bf16.msra.mxu0 %v5021_v20  ;;  %3517 = vmatpush1.bf16.msra.mxu1 %v5074_v57 }
 0x12d   :  { %3487 = vmatprep.subr.bf16.mxu0 %v5025_v21  ;;  %3519 = vmatprep.subr.bf16.mxu1 %v5080_v63  ;;  %4397 = vrcp.f32 %v497_v41  ;;  %v6240_v41 = vld [vmem:[#allocation8_spill] sm:$0xff] }
 0x130   :  { %3489 = vmatpush1.bf16.msra.mxu0 %v5058_v47  ;;  %3521 = vmatpush1.bf16.msra.mxu1 %v5111_v29 }
 0x131   :  { %3491 = vmatprep.subr.bf16.mxu0 %v5062_v49  ;;  %3523 = vmatprep.subr.bf16.mxu1 %v5117_v38 }
 0x134   :  { %v4394_v1 = vpop.eup %4393  ;;  %3493 = vmatpush1.bf16.msra.mxu0 %v5096_v13  ;;  %3525 = vmatpush1.bf16.msra.mxu1 %v6233_v56 }
 0x135   :  { %v4396_v43 = vpop.eup %4395  ;;  %v501_v53 = vmul.f32 %v4394_v1, %v4392_v10  ;;  %3495 = vmatprep.subr.bf16.mxu0 %v6234_v5  ;;  %3527 = vmatprep.subr.bf16.mxu1 %v6235_v27 }
 0x136   :  { %v500_v35 = vmul.f32 0.0, %v4396_v43  ;;  %v6241_v43 = vld [vmem:[#allocation14_spill] sm:$0xff] }
 0x137   :  { %v4398_v51 = vpop.eup %4397 }
 0x138   :  { %v5338_v24 = vadd.f32 %v501_v53, %v500_v35  ;;  %3497 = vmatpush1.bf16.msra.mxu0 %v6236_v11  ;;  %3529 = vmatpush1.bf16.msra.mxu1 %v5183_v59  ;;  %v6242_v53 = vld [vmem:[#allocation11_spill] sm:$0xff]  ;;  %v6243_v35 = vld [vmem:[#allocation17_spill] sm:$0xff] }
 0x139   :  { %3499 = vmatprep.subr.bf16.mxu0 %v6237_v44  ;;  %3531 = vmatprep.subr.bf16.mxu1 %v5189_v2 }
 0x13a   :  { %4399 = vtanh.f32 %v5338_v24 }
 0x13c   :  { %3501 = vmatpush1.bf16.msra.mxu0 %v5168_v40  ;;  %3533 = vmatpush1.bf16.msra.mxu1 %v5216_v6 }
 0x13d   :  { %3503 = vmatprep.subr.bf16.mxu0 %v6238_v34  ;;  %3535 = vmatprep.subr.bf16.mxu1 %v5219_v3 }
 0x140   :  { %3505 = vmatpush1.bf16.msra.mxu0 %v6239_v54  ;;  %3537 = vmatpush1.bf16.msra.mxu1 %v5238_v23 }
 0x141   :  { %3507 = vmatprep.subr.bf16.mxu0 %v5207_v39  ;;  %3539 = vmatprep.subr.bf16.mxu1 %v5241_v28 }
 0x144   :  { %v4400_v10 = vpop.eup %4399  ;;  %3509 = vmatpush1.bf16.msra.mxu0 %v5234_v12  ;;  %3541 = vmatpush1.bf16.msra.mxu1 %v5251_v16 }
 0x145   :  { %v504_v1 = vmul.f32 %v4400_v10, %v4398_v51  ;;  %3543 = vmatprep.subr.bf16.mxu0 %v4684_v4  ;;  %3575 = vmatprep.subr.bf16.mxu1 %v4736_v22  ;;  %v6244_v51 = vld [vmem:[#allocation12_spill] sm:$0xff]  ;;  %v6245_v10 = vld [vmem:[#allocation18_spill] sm:$0xff] }
 0x147   :  { %724 = vmatmul.mubr.f32.vlgmr.msra.gmra.mrb[6].mxu0 %v504_v1  ;;  %795 = vmatmul.mubr.f32.vlgmr.msra.gmra.mrb[6].mxu1 %v504_v1  ;;  %v6246_v1 = vld [vmem:[#allocation15_spill] sm:$0xff] }
 0x148   :  { %3545 = vmatpush1.bf16.msra.mxu0 %v4695_v8  ;;  %3577 = vmatpush1.bf16.msra.mxu1 %v4744_v25 }
 0x149   :  { %3547 = vmatprep.subr.bf16.mxu0 %v4697_v9  ;;  %3579 = vmatprep.subr.bf16.mxu1 %v4769_v33 }
 0x14a   :  { %921 = vmatprep.mubr.f32.mxu0 %v6232_v19  ;;  %992 = vmatprep.mubr.f32.mxu1 %v6232_v19 }
 0x14c   :  { %3549 = vmatpush1.bf16.msra.mxu0 %v4713_v14  ;;  %3581 = vmatpush1.bf16.msra.mxu1 %v4780_v37 }
 0x14d   :  { %3551 = vmatprep.subr.bf16.mxu0 %v4722_v17  ;;  %3583 = vmatprep.subr.bf16.mxu1 %v4804_v45 }
 0x150   :  { %3553 = vmatpush1.bf16.msra.mxu0 %v4747_v26  ;;  %3585 = vmatpush1.bf16.msra.mxu1 %v4813_v48 }
 0x151   :  { %3555 = vmatprep.subr.bf16.mxu0 %v4760_v30  ;;  %3587 = vmatprep.subr.bf16.mxu1 %v4825_v52 }
 0x154   :  { %3557 = vmatpush1.bf16.msra.mxu0 %v4796_v42  ;;  %3589 = vmatpush1.bf16.msra.mxu1 %v4855_v62 }
 0x155   :  { %3559 = vmatprep.subr.bf16.mxu0 %v4807_v46  ;;  %3591 = vmatprep.subr.bf16.mxu1 %v4861_v0 }
 0x158   :  { %3561 = vmatpush1.bf16.msra.mxu0 %v4834_v55  ;;  %3593 = vmatpush1.bf16.msra.mxu1 %v4891_v15  ;;  %v507_v55 = vld [vmem:[%s6145_s0 + $0x30] sm:$0xff] }
 0x159   :  { %3563 = vmatprep.subr.bf16.mxu0 %v4843_v58  ;;  %3595 = vmatprep.subr.bf16.mxu1 %v4897_v18  ;;  %v6247_v58 = vld [vmem:[#allocation19_spill] sm:$0xff]  ;;  %v6248_v18 = vld [vmem:[#allocation16_spill] sm:$0xff] }
 0x15c   :  { %3565 = vmatpush1.bf16.msra.mxu0 %v4876_v7  ;;  %3597 = vmatpush1.bf16.msra.mxu1 %v4927_v32  ;;  %v6249_v7 = vld [vmem:[#allocation20_spill] sm:$0xff] }
 0x15d   :  { %3567 = vmatprep.subr.bf16.mxu0 %v6240_v41  ;;  %3599 = vmatprep.subr.bf16.mxu1 %v6241_v43  ;;  %v505_v43 = vld [vmem:[%s6145_s0 + $0x20] sm:$0xff] }
 0x160   :  { %3569 = vmatpush1.bf16.msra.mxu0 %v6242_v53  ;;  %3601 = vmatpush1.bf16.msra.mxu1 %v6243_v35  ;;  %v506_v35 = vld [vmem:[%s6145_s0 + $0x28] sm:$0xff] }
 0x161   :  { %3571 = vmatprep.subr.bf16.mxu0 %v6244_v51  ;;  %3603 = vmatprep.subr.bf16.mxu1 %v6245_v10 }
 0x164   :  { %3573 = vmatpush1.bf16.msra.mxu0 %v6246_v1  ;;  %3605 = vmatpush1.bf16.msra.mxu1 %v6247_v58 }
 0x165   :  { %3607 = vmatprep.subr.bf16.mxu0 %v6248_v18  ;;  %3639 = vmatprep.subr.bf16.mxu1 %v6249_v7  ;;  %v508_v7 = vld [vmem:[%s6145_s0 + $0x38] sm:$0xff] }
 0x1fa   :  { %v575_v53 = vpop.f32.mrb[4].mxu0  ;;  %v646_v51 = vpop.f32.mrb[4].mxu1 }
 0x1fb   :  { %v651_v41 = vadd.f32 %v575_v53, %v505_v43  ;;  %v577_v10 = vpop.f32.mrb[5].mxu0  ;;  %v648_v32 = vpop.f32.mrb[5].mxu1  ;;  %v653_v46 = vadd.f32 %v646_v51, %v507_v55  ;;  %v655_v55 = vld [vmem:[%s6146_s1 + $0xc0] sm:$0xff] }
 0x1fc   :  { %v652_v1 = vadd.f32 %v577_v10, %v506_v35  ;;  %v654_v18 = vadd.f32 %v648_v32, %v508_v7 }
 0x1fd   :  { %v3155_v15 = vmul.f32 -1.442695, %v651_v41 }
 0x1fe   :  { %v3156_v58 = vmul.f32 -1.442695, %v652_v1  ;;  %v3157_v0 = vmul.f32 -1.442695, %v654_v18 }
 0x1ff   :  { %4401 = vpow2.f32 %v3155_v15 }
 0x200   :  { %4403 = vpow2.f32 %v3156_v58 }
 0x201   :  { %4405 = vpow2.f32 %v3157_v0 }
 0x202   :  { %4407 = vtanh.f32 %v653_v46 }
 0x209   :  { %v4402_v62 = vpop.eup %4401 }
 0x20a   :  { %v4404_v43 = vpop.eup %4403  ;;  %v808_v53 = vadd.f32 1.0, %v4402_v62  ;;  %v656_v62 = vld [vmem:[%s6146_s1 + $0xc8] sm:$0xff] }
 0x20b   :  { %v814_v41 = vadd.f32 1.0, %v4404_v43  ;;  %v4406_v15 = vpop.eup %4405 }
 0x20c   :  { %4409 = vrcp.f32 %v808_v53  ;;  %v4408_v35 = vpop.eup %4407  ;;  %v821_v7 = vadd.f32 1.0, %v4406_v15 }
 0x20d   :  { %4411 = vrcp.f32 %v814_v41 }
 0x20e   :  { %4413 = vrcp.f32 %v821_v7 }
 0x216   :  { %v4410_v10 = vpop.eup %4409 }
 0x217   :  { %v4412_v1 = vpop.eup %4411  ;;  %v825_v58 = vmul.f32 %v4410_v10, %v4408_v35  ;;  %v658_v35 = vld [vmem:[%s6146_s1 + $0xd8] sm:$0xff] }
 0x218   :  { %v824_v32 = vmul.f32 %v4412_v1, %v5311_v50  ;;  %v657_v1 = vld [vmem:[%s6146_s1 + $0xd0] sm:$0xff] }
 0x21a   :  { %v5410_v46 = vadd.f32 %v825_v58, %v824_v32  ;;  %v725_v0 = vpop.f32.mrb[6].mxu0  ;;  %v796_v18 = vpop.f32.mrb[6].mxu1 }
 0x21b   :  { %v801_v51 = vadd.f32 %v725_v0, %v655_v55  ;;  %v727_v43 = vpop.f32.mrb[7].mxu0  ;;  %v798_v53 = vpop.f32.mrb[7].mxu1  ;;  %v803_v55 = vadd.f32 %v796_v18, %v657_v1 }
 0x21c   :  { %v802_v41 = vadd.f32 %v727_v43, %v656_v62  ;;  %4415 = vtanh.f32 %v5410_v46  ;;  %v804_v10 = vadd.f32 %v798_v53, %v658_v35  ;;  %v4414_v58 = vpop.eup %4413 }
 0x21d   :  { %v3158_v50 = vmul.f32 -1.442695, %v801_v51 }
 0x21e   :  { %v3159_v15 = vmul.f32 -1.442695, %v802_v41  ;;  %v3160_v32 = vmul.f32 -1.442695, %v804_v10 }
 0x21f   :  { %4417 = vpow2.f32 %v3158_v50 }
 0x220   :  { %4419 = vpow2.f32 %v3159_v15 }
 0x221   :  { %4421 = vpow2.f32 %v3160_v32 }
 0x222   :  { %4423 = vtanh.f32 %v803_v55  ;;  %v6250_v55 = vld [vmem:[#allocation5_spill] sm:$0xff] }
 0x226   :  { %v4416_v7 = vpop.eup %4415 }
 0x227   :  { %v828_v62 = vmul.f32 %v4416_v7, %v4414_v58 }
 0x229   :  { %v4418_v0 = vpop.eup %4417  ;;  %922 = vmatmul.mubr.f32.vlgmr.msra.gmra.mrb[8].mxu0 %v828_v62  ;;  %993 = vmatmul.mubr.f32.vlgmr.msra.gmra.mrb[8].mxu1 %v828_v62  ;;  %v6251_v62 = vld [vmem:[#allocation2_spill] sm:$0xff] }
 0x22a   :  { %v4420_v51 = vpop.eup %4419  ;;  %v832_v43 = vadd.f32 1.0, %v4418_v0  ;;  %3609 = vmatpush1.bf16.msra.mxu0 %v4984_v60  ;;  %3641 = vmatpush1.bf16.msra.mxu1 %v5037_v31  ;;  %v6252_v0 = vld [vmem:[#allocation6_spill] sm:$0xff] }
 0x22b   :  { %v838_v53 = vadd.f32 1.0, %v4420_v51  ;;  %3611 = vmatprep.subr.bf16.mxu0 %v4987_v61  ;;  %3643 = vmatprep.subr.bf16.mxu1 %v5043_v36  ;;  %v4422_v18 = vpop.eup %4421  ;;  %v6253_v51 = vld [vmem:[#allocation3_spill] sm:$0xff] }
 0x22c   :  { %4425 = vrcp.f32 %v832_v43  ;;  %1071 = vmatprep.mubr.f32.mxu0 %v6232_v19  ;;  %1142 = vmatprep.mubr.f32.mxu1 %v6232_v19  ;;  %v4424_v41 = vpop.eup %4423  ;;  %v845_v10 = vadd.f32 1.0, %v4422_v18  ;;  %v6254_v43 = vld [vmem:[#allocation9_spill] sm:$0xff]  ;;  %v6256_v18 = vld [vmem:[#allocation10_spill] sm:$0xff] }
 0x22d   :  { %4427 = vrcp.f32 %v838_v53  ;;  %v6255_v53 = vld [vmem:[#allocation4_spill] sm:$0xff] }
 0x22e   :  { %3613 = vmatpush1.bf16.msra.mxu0 %v5021_v20  ;;  %3645 = vmatpush1.bf16.msra.mxu1 %v5074_v57  ;;  %4429 = vrcp.f32 %v845_v10  ;;  %v6261_v10 = vld [vmem:[#allocation11_spill] sm:$0xff] }
 0x22f   :  { %3615 = vmatprep.subr.bf16.mxu0 %v5025_v21  ;;  %3647 = vmatprep.subr.bf16.mxu1 %v5080_v63 }
 0x232   :  { %3617 = vmatpush1.bf16.msra.mxu0 %v5058_v47  ;;  %3649 = vmatpush1.bf16.msra.mxu1 %v5111_v29 }
 0x233   :  { %3619 = vmatprep.subr.bf16.mxu0 %v5062_v49  ;;  %3651 = vmatprep.subr.bf16.mxu1 %v5117_v38 }
 0x236   :  { %v4426_v50 = vpop.eup %4425  ;;  %3621 = vmatpush1.bf16.msra.mxu0 %v5096_v13  ;;  %3653 = vmatpush1.bf16.msra.mxu1 %v6233_v56 }
 0x237   :  { %v4428_v15 = vpop.eup %4427  ;;  %v849_v35 = vmul.f32 %v4426_v50, %v4424_v41  ;;  %3623 = vmatprep.subr.bf16.mxu0 %v6234_v5  ;;  %3655 = vmatprep.subr.bf16.mxu1 %v6235_v27  ;;  %v6257_v41 = vld [vmem:[#allocation7_spill] sm:$0xff]  ;;  %v6258_v50 = vld [vmem:[#allocation13_spill] sm:$0xff] }
 0x238   :  { %v848_v1 = vmul.f32 %v4428_v15, %v5338_v24  ;;  %v4430_v24 = vpop.eup %4429  ;;  %v6259_v15 = vld [vmem:[#allocation8_spill] sm:$0xff] }
 0x23a   :  { %v5438_v58 = vadd.f32 %v849_v35, %v848_v1  ;;  %3625 = vmatpush1.bf16.msra.mxu0 %v6236_v11  ;;  %3657 = vmatpush1.bf16.msra.mxu1 %v5183_v59  ;;  %v6260_v35 = vld [vmem:[#allocation14_spill] sm:$0xff]  ;;  %v6262_v1 = vld [vmem:[#allocation17_spill] sm:$0xff] }
 0x23b   :  { %3627 = vmatprep.subr.bf16.mxu0 %v6237_v44  ;;  %3659 = vmatprep.subr.bf16.mxu1 %v5189_v2 }
 0x23c   :  { %4431 = vtanh.f32 %v5438_v58 }
 0x23e   :  { %3629 = vmatpush1.bf16.msra.mxu0 %v5168_v40  ;;  %3661 = vmatpush1.bf16.msra.mxu1 %v5216_v6 }
 0x23f   :  { %3631 = vmatprep.subr.bf16.mxu0 %v6238_v34  ;;  %3663 = vmatprep.subr.bf16.mxu1 %v5219_v3 }
 0x242   :  { %3633 = vmatpush1.bf16.msra.mxu0 %v6239_v54  ;;  %3665 = vmatpush1.bf16.msra.mxu1 %v5238_v23 }
 0x243   :  { %3635 = vmatprep.subr.bf16.mxu0 %v5207_v39  ;;  %3667 = vmatprep.subr.bf16.mxu1 %v5241_v28 }
 0x246   :  { %v4432_v7 = vpop.eup %4431  ;;  %3637 = vmatpush1.bf16.msra.mxu0 %v5234_v12  ;;  %3669 = vmatpush1.bf16.msra.mxu1 %v5251_v16 }
 0x247   :  { %v852_v32 = vmul.f32 %v4432_v7, %v4430_v24  ;;  %3671 = vmatprep.subr.bf16.mxu0 %v4684_v4  ;;  %3703 = vmatprep.subr.bf16.mxu1 %v4736_v22  ;;  %v6263_v24 = vld [vmem:[#allocation12_spill] sm:$0xff]  ;;  %v6264_v7 = vld [vmem:[#allocation18_spill] sm:$0xff] }
 0x249   :  { %1072 = vmatmul.mubr.f32.vlgmr.msra.gmra.mrb[10].mxu0 %v852_v32  ;;  %1143 = vmatmul.mubr.f32.vlgmr.msra.gmra.mrb[10].mxu1 %v852_v32  ;;  %v6265_v32 = vld [vmem:[#allocation15_spill] sm:$0xff] }
 0x24a   :  { %3673 = vmatpush1.bf16.msra.mxu0 %v4695_v8  ;;  %3705 = vmatpush1.bf16.msra.mxu1 %v4744_v25 }
 0x24b   :  { %3675 = vmatprep.subr.bf16.mxu0 %v4697_v9  ;;  %3707 = vmatprep.subr.bf16.mxu1 %v4769_v33 }
 0x24c   :  { %1269 = vmatprep.mubr.f32.mxu0 %v6232_v19  ;;  %1340 = vmatprep.mubr.f32.mxu1 %v6232_v19 }
 0x24e   :  { %3677 = vmatpush1.bf16.msra.mxu0 %v4713_v14  ;;  %3709 = vmatpush1.bf16.msra.mxu1 %v4780_v37 }
 0x24f   :  { %3679 = vmatprep.subr.bf16.mxu0 %v4722_v17  ;;  %3711 = vmatprep.subr.bf16.mxu1 %v4804_v45 }
 0x252   :  { %3681 = vmatpush1.bf16.msra.mxu0 %v4747_v26  ;;  %3713 = vmatpush1.bf16.msra.mxu1 %v4813_v48 }
 0x253   :  { %3683 = vmatprep.subr.bf16.mxu0 %v4760_v30  ;;  %3715 = vmatprep.subr.bf16.mxu1 %v4825_v52 }
 0x256   :  { %3685 = vmatpush1.bf16.msra.mxu0 %v4796_v42  ;;  %3717 = vmatpush1.bf16.msra.mxu1 %v6250_v55 }
 0x257   :  { %3687 = vmatprep.subr.bf16.mxu0 %v6251_v62  ;;  %3719 = vmatprep.subr.bf16.mxu1 %v6252_v0 }
 0x25a   :  { %3689 = vmatpush1.bf16.msra.mxu0 %v6253_v51  ;;  %3721 = vmatpush1.bf16.msra.mxu1 %v6254_v43  ;;  %v855_v51 = vld [vmem:[%s6145_s0 + $0x50] sm:$0xff] }
 0x25b   :  { %3691 = vmatprep.subr.bf16.mxu0 %v6255_v53  ;;  %3723 = vmatprep.subr.bf16.mxu1 %v6256_v18  ;;  %v6266_v53 = vld [vmem:[#allocation19_spill] sm:$0xff]  ;;  %v6267_v18 = vld [vmem:[#allocation16_spill] sm:$0xff] }
 0x25e   :  { %3693 = vmatpush1.bf16.msra.mxu0 %v6257_v41  ;;  %3725 = vmatpush1.bf16.msra.mxu1 %v6258_v50  ;;  %v6268_v41 = vld [vmem:[#allocation20_spill] sm:$0xff] }
 0x25f   :  { %3695 = vmatprep.subr.bf16.mxu0 %v6259_v15  ;;  %3727 = vmatprep.subr.bf16.mxu1 %v6260_v35  ;;  %v853_v35 = vld [vmem:[%s6145_s0 + $0x40] sm:$0xff] }
 0x262   :  { %3697 = vmatpush1.bf16.msra.mxu0 %v6261_v10  ;;  %3729 = vmatpush1.bf16.msra.mxu1 %v6262_v1  ;;  %v854_v1 = vld [vmem:[%s6145_s0 + $0x48] sm:$0xff] }
 0x263   :  { %3699 = vmatprep.subr.bf16.mxu0 %v6263_v24  ;;  %3731 = vmatprep.subr.bf16.mxu1 %v6264_v7 }
 0x266   :  { %3701 = vmatpush1.bf16.msra.mxu0 %v6265_v32  ;;  %3733 = vmatpush1.bf16.msra.mxu1 %v6266_v53 }
 0x267   :  { %3735 = vmatprep.subr.bf16.mxu0 %v6267_v18  ;;  %3767 = vmatprep.subr.bf16.mxu1 %v6268_v41  ;;  %v856_v41 = vld [vmem:[%s6145_s0 + $0x58] sm:$0xff] }
 0x2fc   :  { %v923_v10 = vpop.f32.mrb[8].mxu0  ;;  %v994_v24 = vpop.f32.mrb[8].mxu1 }
 0x2fd   :  { %v999_v15 = vadd.f32 %v923_v10, %v853_v35  ;;  %v925_v7 = vpop.f32.mrb[9].mxu0  ;;  %v996_v50 = vpop.f32.mrb[9].mxu1  ;;  %v1001_v62 = vadd.f32 %v994_v24, %v855_v51  ;;  %v1003_v51 = vld [vmem:[%s6146_s1 + $0xa0] sm:$0xff] }
 0x2fe   :  { %v1000_v32 = vadd.f32 %v925_v7, %v854_v1  ;;  %v1002_v18 = vadd.f32 %v996_v50, %v856_v41 }
 0x2ff   :  { %v3161_v43 = vmul.f32 -1.442695, %v999_v15 }
 0x300   :  { %v3162_v53 = vmul.f32 -1.442695, %v1000_v32  ;;  %v3163_v0 = vmul.f32 -1.442695, %v1002_v18 }
 0x301   :  { %4433 = vpow2.f32 %v3161_v43 }
 0x302   :  { %4435 = vpow2.f32 %v3162_v53 }
 0x303   :  { %4437 = vpow2.f32 %v3163_v0 }
 0x304   :  { %4439 = vtanh.f32 %v1001_v62 }
 0x30b   :  { %v4434_v55 = vpop.eup %4433 }
 0x30c   :  { %v4436_v35 = vpop.eup %4435  ;;  %v1156_v10 = vadd.f32 1.0, %v4434_v55  ;;  %v1004_v55 = vld [vmem:[%s6146_s1 + $0xa8] sm:$0xff] }
 0x30d   :  { %v1162_v15 = vadd.f32 1.0, %v4436_v35  ;;  %v4438_v43 = vpop.eup %4437 }
 0x30e   :  { %4441 = vrcp.f32 %v1156_v10  ;;  %v4440_v1 = vpop.eup %4439  ;;  %v1169_v41 = vadd.f32 1.0, %v4438_v43 }
 0x30f   :  { %4443 = vrcp.f32 %v1162_v15 }
 0x310   :  { %4445 = vrcp.f32 %v1169_v41 }
 0x318   :  { %v4442_v7 = vpop.eup %4441 }
 0x319   :  { %v4444_v32 = vpop.eup %4443  ;;  %v1173_v53 = vmul.f32 %v4442_v7, %v4440_v1  ;;  %v1006_v1 = vld [vmem:[%s6146_s1 + $0xb8] sm:$0xff] }
 0x31a   :  { %v1172_v50 = vmul.f32 %v4444_v32, %v5410_v46  ;;  %v1005_v32 = vld [vmem:[%s6146_s1 + $0xb0] sm:$0xff] }
 0x31c   :  { %v5510_v62 = vadd.f32 %v1173_v53, %v1172_v50  ;;  %v1073_v0 = vpop.f32.mrb[10].mxu0  ;;  %v1144_v18 = vpop.f32.mrb[10].mxu1 }
 0x31d   :  { %v1149_v24 = vadd.f32 %v1073_v0, %v1003_v51  ;;  %v1075_v35 = vpop.f32.mrb[11].mxu0  ;;  %v1146_v10 = vpop.f32.mrb[11].mxu1  ;;  %v1151_v51 = vadd.f32 %v1144_v18, %v1005_v32 }
 0x31e   :  { %v1150_v15 = vadd.f32 %v1075_v35, %v1004_v55  ;;  %4447 = vtanh.f32 %v5510_v62  ;;  %v1152_v7 = vadd.f32 %v1146_v10, %v1006_v1  ;;  %v4446_v53 = vpop.eup %4445 }
 0x31f   :  { %v3164_v46 = vmul.f32 -1.442695, %v1149_v24 }
 0x320   :  { %v3165_v43 = vmul.f32 -1.442695, %v1150_v15  ;;  %v3166_v50 = vmul.f32 -1.442695, %v1152_v7 }
 0x321   :  { %4449 = vpow2.f32 %v3164_v46 }
 0x322   :  { %4451 = vpow2.f32 %v3165_v43 }
 0x323   :  { %4453 = vpow2.f32 %v3166_v50 }
 0x324   :  { %4455 = vtanh.f32 %v1151_v51  ;;  %v6269_v51 = vld [vmem:[#allocation5_spill] sm:$0xff] }
 0x328   :  { %v4448_v41 = vpop.eup %4447 }
 0x329   :  { %v1176_v55 = vmul.f32 %v4448_v41, %v4446_v53 }
 0x32b   :  { %v4450_v0 = vpop.eup %4449  ;;  %1270 = vmatmul.mubr.f32.vlgmr.msra.gmra.mrb[12].mxu0 %v1176_v55  ;;  %1341 = vmatmul.mubr.f32.vlgmr.msra.gmra.mrb[12].mxu1 %v1176_v55  ;;  %v6270_v55 = vld [vmem:[#allocation2_spill] sm:$0xff] }
 0x32c   :  { %v4452_v24 = vpop.eup %4451  ;;  %v1180_v35 = vadd.f32 1.0, %v4450_v0  ;;  %3737 = vmatpush1.bf16.msra.mxu0 %v4984_v60  ;;  %3769 = vmatpush1.bf16.msra.mxu1 %v5037_v31  ;;  %v6271_v0 = vld [vmem:[#allocation6_spill] sm:$0xff] }
 0x32d   :  { %v1186_v10 = vadd.f32 1.0, %v4452_v24  ;;  %3739 = vmatprep.subr.bf16.mxu0 %v4987_v61  ;;  %3771 = vmatprep.subr.bf16.mxu1 %v5043_v36  ;;  %v4454_v18 = vpop.eup %4453  ;;  %v6272_v24 = vld [vmem:[#allocation3_spill] sm:$0xff] }
 0x32e   :  { %4457 = vrcp.f32 %v1180_v35  ;;  %1419 = vmatprep.mubr.f32.mxu0 %v6232_v19  ;;  %1490 = vmatprep.mubr.f32.mxu1 %v6232_v19  ;;  %v4456_v15 = vpop.eup %4455  ;;  %v1193_v7 = vadd.f32 1.0, %v4454_v18  ;;  %v6273_v35 = vld [vmem:[#allocation9_spill] sm:$0xff]  ;;  %v6275_v18 = vld [vmem:[#allocation10_spill] sm:$0xff] }
 0x32f   :  { %4459 = vrcp.f32 %v1186_v10  ;;  %v6274_v10 = vld [vmem:[#allocation4_spill] sm:$0xff] }
 0x330   :  { %3741 = vmatpush1.bf16.msra.mxu0 %v5021_v20  ;;  %3773 = vmatpush1.bf16.msra.mxu1 %v5074_v57  ;;  %4461 = vrcp.f32 %v1193_v7  ;;  %v6280_v7 = vld [vmem:[#allocation11_spill] sm:$0xff] }
 0x331   :  { %3743 = vmatprep.subr.bf16.mxu0 %v5025_v21  ;;  %3775 = vmatprep.subr.bf16.mxu1 %v5080_v63 }
 0x334   :  { %3745 = vmatpush1.bf16.msra.mxu0 %v5058_v47  ;;  %3777 = vmatpush1.bf16.msra.mxu1 %v5111_v29 }
 0x335   :  { %3747 = vmatprep.subr.bf16.mxu0 %v5062_v49  ;;  %3779 = vmatprep.subr.bf16.mxu1 %v5117_v38 }
 0x338   :  { %v4458_v46 = vpop.eup %4457  ;;  %3749 = vmatpush1.bf16.msra.mxu0 %v5096_v13  ;;  %3781 = vmatpush1.bf16.msra.mxu1 %v6233_v56 }
 0x339   :  { %v4460_v43 = vpop.eup %4459  ;;  %v1197_v1 = vmul.f32 %v4458_v46, %v4456_v15  ;;  %3751 = vmatprep.subr.bf16.mxu0 %v6234_v5  ;;  %3783 = vmatprep.subr.bf16.mxu1 %v6235_v27  ;;  %v6276_v15 = vld [vmem:[#allocation7_spill] sm:$0xff]  ;;  %v6277_v46 = vld [vmem:[#allocation13_spill] sm:$0xff] }
 0x33a   :  { %v1196_v32 = vmul.f32 %v4460_v43, %v5438_v58  ;;  %v4462_v58 = vpop.eup %4461  ;;  %v6278_v43 = vld [vmem:[#allocation8_spill] sm:$0xff] }
 0x33c   :  { %v5538_v53 = vadd.f32 %v1197_v1, %v1196_v32  ;;  %3753 = vmatpush1.bf16.msra.mxu0 %v6236_v11  ;;  %3785 = vmatpush1.bf16.msra.mxu1 %v5183_v59  ;;  %v6279_v1 = vld [vmem:[#allocation14_spill] sm:$0xff]  ;;  %v6281_v32 = vld [vmem:[#allocation17_spill] sm:$0xff] }
 0x33d   :  { %3755 = vmatprep.subr.bf16.mxu0 %v6237_v44  ;;  %3787 = vmatprep.subr.bf16.mxu1 %v5189_v2 }
 0x33e   :  { %4463 = vtanh.f32 %v5538_v53 }
 0x340   :  { %3757 = vmatpush1.bf16.msra.mxu0 %v5168_v40  ;;  %3789 = vmatpush1.bf16.msra.mxu1 %v5216_v6 }
 0x341   :  { %3759 = vmatprep.subr.bf16.mxu0 %v6238_v34  ;;  %3791 = vmatprep.subr.bf16.mxu1 %v5219_v3 }
 0x344   :  { %3761 = vmatpush1.bf16.msra.mxu0 %v6239_v54  ;;  %3793 = vmatpush1.bf16.msra.mxu1 %v5238_v23 }
 0x345   :  { %3763 = vmatprep.subr.bf16.mxu0 %v5207_v39  ;;  %3795 = vmatprep.subr.bf16.mxu1 %v5241_v28 }
 0x348   :  { %v4464_v41 = vpop.eup %4463  ;;  %3765 = vmatpush1.bf16.msra.mxu0 %v5234_v12  ;;  %3797 = vmatpush1.bf16.msra.mxu1 %v5251_v16 }
 0x349   :  { %v1200_v50 = vmul.f32 %v4464_v41, %v4462_v58  ;;  %3799 = vmatprep.subr.bf16.mxu0 %v4684_v4  ;;  %3831 = vmatprep.subr.bf16.mxu1 %v4736_v22  ;;  %v6282_v58 = vld [vmem:[#allocation12_spill] sm:$0xff]  ;;  %v6283_v41 = vld [vmem:[#allocation18_spill] sm:$0xff] }
 0x34b   :  { %1420 = vmatmul.mubr.f32.vlgmr.msra.gmra.mrb[14].mxu0 %v1200_v50  ;;  %1491 = vmatmul.mubr.f32.vlgmr.msra.gmra.mrb[14].mxu1 %v1200_v50  ;;  %v6284_v50 = vld [vmem:[#allocation15_spill] sm:$0xff] }
 0x34c   :  { %3801 = vmatpush1.bf16.msra.mxu0 %v4695_v8  ;;  %3833 = vmatpush1.bf16.msra.mxu1 %v4744_v25 }
 0x34d   :  { %3803 = vmatprep.subr.bf16.mxu0 %v4697_v9  ;;  %3835 = vmatprep.subr.bf16.mxu1 %v4769_v33 }
 0x34e   :  { %1617 = vmatprep.mubr.f32.mxu0 %v6232_v19  ;;  %1688 = vmatprep.mubr.f32.mxu1 %v6232_v19 }
 0x350   :  { %3805 = vmatpush1.bf16.msra.mxu0 %v4713_v14  ;;  %3837 = vmatpush1.bf16.msra.mxu1 %v4780_v37 }
 0x351   :  { %3807 = vmatprep.subr.bf16.mxu0 %v4722_v17  ;;  %3839 = vmatprep.subr.bf16.mxu1 %v4804_v45 }
 0x354   :  { %3809 = vmatpush1.bf16.msra.mxu0 %v4747_v26  ;;  %3841 = vmatpush1.bf16.msra.mxu1 %v4813_v48 }
 0x355   :  { %3811 = vmatprep.subr.bf16.mxu0 %v4760_v30  ;;  %3843 = vmatprep.subr.bf16.mxu1 %v4825_v52 }
 0x358   :  { %3813 = vmatpush1.bf16.msra.mxu0 %v4796_v42  ;;  %3845 = vmatpush1.bf16.msra.mxu1 %v6269_v51 }
 0x359   :  { %3815 = vmatprep.subr.bf16.mxu0 %v6270_v55  ;;  %3847 = vmatprep.subr.bf16.mxu1 %v6271_v0 }
 0x35c   :  { %3817 = vmatpush1.bf16.msra.mxu0 %v6272_v24  ;;  %3849 = vmatpush1.bf16.msra.mxu1 %v6273_v35  ;;  %v1203_v24 = vld [vmem:[%s6145_s0 + $0x70] sm:$0xff] }
 0x35d   :  { %3819 = vmatprep.subr.bf16.mxu0 %v6274_v10  ;;  %3851 = vmatprep.subr.bf16.mxu1 %v6275_v18  ;;  %v6285_v10 = vld [vmem:[#allocation19_spill] sm:$0xff]  ;;  %v6286_v18 = vld [vmem:[#allocation16_spill] sm:$0xff] }
 0x360   :  { %3821 = vmatpush1.bf16.msra.mxu0 %v6276_v15  ;;  %3853 = vmatpush1.bf16.msra.mxu1 %v6277_v46  ;;  %v6287_v15 = vld [vmem:[#allocation20_spill] sm:$0xff] }
 0x361   :  { %3823 = vmatprep.subr.bf16.mxu0 %v6278_v43  ;;  %3855 = vmatprep.subr.bf16.mxu1 %v6279_v1  ;;  %v1201_v1 = vld [vmem:[%s6145_s0 + $0x60] sm:$0xff] }
 0x364   :  { %3825 = vmatpush1.bf16.msra.mxu0 %v6280_v7  ;;  %3857 = vmatpush1.bf16.msra.mxu1 %v6281_v32  ;;  %v1202_v32 = vld [vmem:[%s6145_s0 + $0x68] sm:$0xff] }
 0x365   :  { %3827 = vmatprep.subr.bf16.mxu0 %v6282_v58  ;;  %3859 = vmatprep.subr.bf16.mxu1 %v6283_v41 }
 0x368   :  { %3829 = vmatpush1.bf16.msra.mxu0 %v6284_v50  ;;  %3861 = vmatpush1.bf16.msra.mxu1 %v6285_v10 }
 0x369   :  { %3863 = vmatprep.subr.bf16.mxu0 %v6286_v18  ;;  %3895 = vmatprep.subr.bf16.mxu1 %v6287_v15  ;;  %v1204_v15 = vld [vmem:[%s6145_s0 + $0x78] sm:$0xff] }
 0x3fe   :  { %v1271_v7 = vpop.f32.mrb[12].mxu0  ;;  %v1342_v58 = vpop.f32.mrb[12].mxu1 }
 0x3ff   :  { %v1347_v43 = vadd.f32 %v1271_v7, %v1201_v1  ;;  %v1273_v41 = vpop.f32.mrb[13].mxu0  ;;  %v1344_v46 = vpop.f32.mrb[13].mxu1  ;;  %v1349_v55 = vadd.f32 %v1342_v58, %v1203_v24  ;;  %v1351_v24 = vld [vmem:[%s6146_s1 + $0x80] sm:$0xff] }
 0x400   :  { %v1348_v50 = vadd.f32 %v1273_v41, %v1202_v32  ;;  %v1350_v18 = vadd.f32 %v1344_v46, %v1204_v15 }
 0x401   :  { %v3167_v35 = vmul.f32 -1.442695, %v1347_v43 }
 0x402   :  { %v3168_v10 = vmul.f32 -1.442695, %v1348_v50  ;;  %v3169_v0 = vmul.f32 -1.442695, %v1350_v18 }
 0x403   :  { %4465 = vpow2.f32 %v3167_v35 }
 0x404   :  { %4467 = vpow2.f32 %v3168_v10 }
 0x405   :  { %4469 = vpow2.f32 %v3169_v0 }
 0x406   :  { %4471 = vtanh.f32 %v1349_v55 }
 0x40d   :  { %v4466_v51 = vpop.eup %4465 }
 0x40e   :  { %v4468_v1 = vpop.eup %4467  ;;  %v1504_v7 = vadd.f32 1.0, %v4466_v51  ;;  %v1352_v51 = vld [vmem:[%s6146_s1 + $0x88] sm:$0xff] }
 0x40f   :  { %v1510_v43 = vadd.f32 1.0, %v4468_v1  ;;  %v4470_v35 = vpop.eup %4469 }
 0x410   :  { %4473 = vrcp.f32 %v1504_v7  ;;  %v4472_v32 = vpop.eup %4471  ;;  %v1517_v15 = vadd.f32 1.0, %v4470_v35 }
 0x411   :  { %4475 = vrcp.f32 %v1510_v43 }
 0x412   :  { %4477 = vrcp.f32 %v1517_v15 }
 0x41a   :  { %v4474_v41 = vpop.eup %4473 }
 0x41b   :  { %v4476_v50 = vpop.eup %4475  ;;  %v1521_v10 = vmul.f32 %v4474_v41, %v4472_v32  ;;  %v1354_v32 = vld [vmem:[%s6146_s1 + $0x98] sm:$0xff] }
 0x41c   :  { %v1520_v46 = vmul.f32 %v4476_v50, %v5510_v62  ;;  %v1353_v50 = vld [vmem:[%s6146_s1 + $0x90] sm:$0xff] }
 0x41e   :  { %v5610_v55 = vadd.f32 %v1521_v10, %v1520_v46  ;;  %v1421_v0 = vpop.f32.mrb[14].mxu0  ;;  %v1492_v18 = vpop.f32.mrb[14].mxu1 }
 0x41f   :  { %v1497_v58 = vadd.f32 %v1421_v0, %v1351_v24  ;;  %v1423_v1 = vpop.f32.mrb[15].mxu0  ;;  %v1494_v7 = vpop.f32.mrb[15].mxu1  ;;  %v1499_v24 = vadd.f32 %v1492_v18, %v1353_v50 }
 0x420   :  { %v1498_v43 = vadd.f32 %v1423_v1, %v1352_v51  ;;  %4479 = vtanh.f32 %v5610_v55  ;;  %v1500_v41 = vadd.f32 %v1494_v7, %v1354_v32  ;;  %v4478_v10 = vpop.eup %4477 }
 0x421   :  { %v3170_v62 = vmul.f32 -1.442695, %v1497_v58 }
 0x422   :  { %v3171_v35 = vmul.f32 -1.442695, %v1498_v43  ;;  %v3172_v46 = vmul.f32 -1.442695, %v1500_v41 }
 0x423   :  { %4481 = vpow2.f32 %v3170_v62 }
 0x424   :  { %4483 = vpow2.f32 %v3171_v35 }
 0x425   :  { %4485 = vpow2.f32 %v3172_v46 }
 0x426   :  { %4487 = vtanh.f32 %v1499_v24  ;;  %v6288_v24 = vld [vmem:[#allocation5_spill] sm:$0xff] }
 0x42a   :  { %v4480_v15 = vpop.eup %4479 }
 0x42b   :  { %v1524_v51 = vmul.f32 %v4480_v15, %v4478_v10 }
 0x42d   :  { %v4482_v0 = vpop.eup %4481  ;;  %1618 = vmatmul.mubr.f32.vlgmr.msra.gmra.mrb[16].mxu0 %v1524_v51  ;;  %1689 = vmatmul.mubr.f32.vlgmr.msra.gmra.mrb[16].mxu1 %v1524_v51  ;;  %v6289_v51 = vld [vmem:[#allocation2_spill] sm:$0xff] }
 0x42e   :  { %v4484_v58 = vpop.eup %4483  ;;  %v1528_v1 = vadd.f32 1.0, %v4482_v0  ;;  %3865 = vmatpush1.bf16.msra.mxu0 %v4984_v60  ;;  %3897 = vmatpush1.bf16.msra.mxu1 %v5037_v31  ;;  %v6290_v0 = vld [vmem:[#allocation6_spill] sm:$0xff] }
 0x42f   :  { %v1534_v7 = vadd.f32 1.0, %v4484_v58  ;;  %3867 = vmatprep.subr.bf16.mxu0 %v4987_v61  ;;  %3899 = vmatprep.subr.bf16.mxu1 %v5043_v36  ;;  %v4486_v18 = vpop.eup %4485  ;;  %v6291_v58 = vld [vmem:[#allocation3_spill] sm:$0xff] }
 0x430   :  { %4489 = vrcp.f32 %v1528_v1  ;;  %1767 = vmatprep.mubr.f32.mxu0 %v6232_v19  ;;  %1838 = vmatprep.mubr.f32.mxu1 %v6232_v19  ;;  %v4488_v43 = vpop.eup %4487  ;;  %v1541_v41 = vadd.f32 1.0, %v4486_v18  ;;  %v6292_v1 = vld [vmem:[#allocation9_spill] sm:$0xff]  ;;  %v6294_v18 = vld [vmem:[#allocation10_spill] sm:$0xff] }
 0x431   :  { %4491 = vrcp.f32 %v1534_v7  ;;  %v6293_v7 = vld [vmem:[#allocation4_spill] sm:$0xff] }
 0x432   :  { %3869 = vmatpush1.bf16.msra.mxu0 %v5021_v20  ;;  %3901 = vmatpush1.bf16.msra.mxu1 %v5074_v57  ;;  %4493 = vrcp.f32 %v1541_v41  ;;  %v6299_v41 = vld [vmem:[#allocation11_spill] sm:$0xff] }
 0x433   :  { %3871 = vmatprep.subr.bf16.mxu0 %v5025_v21  ;;  %3903 = vmatprep.subr.bf16.mxu1 %v5080_v63 }
 0x436   :  { %3873 = vmatpush1.bf16.msra.mxu0 %v5058_v47  ;;  %3905 = vmatpush1.bf16.msra.mxu1 %v5111_v29 }
 0x437   :  { %3875 = vmatprep.subr.bf16.mxu0 %v5062_v49  ;;  %3907 = vmatprep.subr.bf16.mxu1 %v5117_v38 }
 0x43a   :  { %v4490_v62 = vpop.eup %4489  ;;  %3877 = vmatpush1.bf16.msra.mxu0 %v5096_v13  ;;  %3909 = vmatpush1.bf16.msra.mxu1 %v6233_v56 }
 0x43b   :  { %v4492_v35 = vpop.eup %4491  ;;  %v1545_v32 = vmul.f32 %v4490_v62, %v4488_v43  ;;  %3879 = vmatprep.subr.bf16.mxu0 %v6234_v5  ;;  %3911 = vmatprep.subr.bf16.mxu1 %v6235_v27  ;;  %v6295_v43 = vld [vmem:[#allocation7_spill] sm:$0xff]  ;;  %v6296_v62 = vld [vmem:[#allocation13_spill] sm:$0xff] }
 0x43c   :  { %v1544_v50 = vmul.f32 %v4492_v35, %v5538_v53  ;;  %v4494_v53 = vpop.eup %4493  ;;  %v6297_v35 = vld [vmem:[#allocation8_spill] sm:$0xff] }
 0x43e   :  { %v5638_v10 = vadd.f32 %v1545_v32, %v1544_v50  ;;  %3881 = vmatpush1.bf16.msra.mxu0 %v6236_v11  ;;  %3913 = vmatpush1.bf16.msra.mxu1 %v5183_v59  ;;  %v6298_v32 = vld [vmem:[#allocation14_spill] sm:$0xff]  ;;  %v6300_v50 = vld [vmem:[#allocation17_spill] sm:$0xff] }
 0x43f   :  { %3883 = vmatprep.subr.bf16.mxu0 %v6237_v44  ;;  %3915 = vmatprep.subr.bf16.mxu1 %v5189_v2 }
 0x440   :  { %4495 = vtanh.f32 %v5638_v10 }
 0x442   :  { %3885 = vmatpush1.bf16.msra.mxu0 %v5168_v40  ;;  %3917 = vmatpush1.bf16.msra.mxu1 %v5216_v6 }
 0x443   :  { %3887 = vmatprep.subr.bf16.mxu0 %v6238_v34  ;;  %3919 = vmatprep.subr.bf16.mxu1 %v5219_v3 }
 0x446   :  { %3889 = vmatpush1.bf16.msra.mxu0 %v6239_v54  ;;  %3921 = vmatpush1.bf16.msra.mxu1 %v5238_v23 }
 0x447   :  { %3891 = vmatprep.subr.bf16.mxu0 %v5207_v39  ;;  %3923 = vmatprep.subr.bf16.mxu1 %v5241_v28 }
 0x44a   :  { %v4496_v15 = vpop.eup %4495  ;;  %3893 = vmatpush1.bf16.msra.mxu0 %v5234_v12  ;;  %3925 = vmatpush1.bf16.msra.mxu1 %v5251_v16 }
 0x44b   :  { %v1548_v46 = vmul.f32 %v4496_v15, %v4494_v53  ;;  %3927 = vmatprep.subr.bf16.mxu0 %v4684_v4  ;;  %3959 = vmatprep.subr.bf16.mxu1 %v4736_v22  ;;  %v6301_v53 = vld [vmem:[#allocation12_spill] sm:$0xff]  ;;  %v6302_v15 = vld [vmem:[#allocation18_spill] sm:$0xff] }
 0x44d   :  { %1768 = vmatmul.mubr.f32.vlgmr.msra.gmra.mrb[18].mxu0 %v1548_v46  ;;  %1839 = vmatmul.mubr.f32.vlgmr.msra.gmra.mrb[18].mxu1 %v1548_v46  ;;  %v6303_v46 = vld [vmem:[#allocation15_spill] sm:$0xff] }
 0x44e   :  { %3929 = vmatpush1.bf16.msra.mxu0 %v4695_v8  ;;  %3961 = vmatpush1.bf16.msra.mxu1 %v4744_v25 }
 0x44f   :  { %3931 = vmatprep.subr.bf16.mxu0 %v4697_v9  ;;  %3963 = vmatprep.subr.bf16.mxu1 %v4769_v33 }
 0x450   :  { %1965 = vmatprep.mubr.f32.mxu0 %v6232_v19  ;;  %2036 = vmatprep.mubr.f32.mxu1 %v6232_v19 }
 0x452   :  { %3933 = vmatpush1.bf16.msra.mxu0 %v4713_v14  ;;  %3965 = vmatpush1.bf16.msra.mxu1 %v4780_v37 }
 0x453   :  { %3935 = vmatprep.subr.bf16.mxu0 %v4722_v17  ;;  %3967 = vmatprep.subr.bf16.mxu1 %v4804_v45 }
 0x456   :  { %3937 = vmatpush1.bf16.msra.mxu0 %v4747_v26  ;;  %3969 = vmatpush1.bf16.msra.mxu1 %v4813_v48 }
 0x457   :  { %3939 = vmatprep.subr.bf16.mxu0 %v4760_v30  ;;  %3971 = vmatprep.subr.bf16.mxu1 %v4825_v52 }
 0x45a   :  { %3941 = vmatpush1.bf16.msra.mxu0 %v4796_v42  ;;  %3973 = vmatpush1.bf16.msra.mxu1 %v6288_v24 }
 0x45b   :  { %3943 = vmatprep.subr.bf16.mxu0 %v6289_v51  ;;  %3975 = vmatprep.subr.bf16.mxu1 %v6290_v0 }
 0x45e   :  { %3945 = vmatpush1.bf16.msra.mxu0 %v6291_v58  ;;  %3977 = vmatpush1.bf16.msra.mxu1 %v6292_v1  ;;  %v1551_v58 = vld [vmem:[%s6145_s0 + $0x90] sm:$0xff] }
 0x45f   :  { %3947 = vmatprep.subr.bf16.mxu0 %v6293_v7  ;;  %3979 = vmatprep.subr.bf16.mxu1 %v6294_v18  ;;  %v6304_v7 = vld [vmem:[#allocation19_spill] sm:$0xff]  ;;  %v6305_v18 = vld [vmem:[#allocation16_spill] sm:$0xff] }
 0x462   :  { %3949 = vmatpush1.bf16.msra.mxu0 %v6295_v43  ;;  %3981 = vmatpush1.bf16.msra.mxu1 %v6296_v62  ;;  %v6306_v43 = vld [vmem:[#allocation20_spill] sm:$0xff] }
 0x463   :  { %3951 = vmatprep.subr.bf16.mxu0 %v6297_v35  ;;  %3983 = vmatprep.subr.bf16.mxu1 %v6298_v32  ;;  %v1549_v32 = vld [vmem:[%s6145_s0 + $0x80] sm:$0xff] }
 0x466   :  { %3953 = vmatpush1.bf16.msra.mxu0 %v6299_v41  ;;  %3985 = vmatpush1.bf16.msra.mxu1 %v6300_v50  ;;  %v1550_v50 = vld [vmem:[%s6145_s0 + $0x88] sm:$0xff] }
 0x467   :  { %3955 = vmatprep.subr.bf16.mxu0 %v6301_v53  ;;  %3987 = vmatprep.subr.bf16.mxu1 %v6302_v15 }
 0x46a   :  { %3957 = vmatpush1.bf16.msra.mxu0 %v6303_v46  ;;  %3989 = vmatpush1.bf16.msra.mxu1 %v6304_v7 }
 0x46b   :  { %3991 = vmatprep.subr.bf16.mxu0 %v6305_v18  ;;  %4023 = vmatprep.subr.bf16.mxu1 %v6306_v43  ;;  %v1552_v43 = vld [vmem:[%s6145_s0 + $0x98] sm:$0xff] }
 0x500   :  { %v1619_v41 = vpop.f32.mrb[16].mxu0  ;;  %v1690_v53 = vpop.f32.mrb[16].mxu1 }
 0x501   :  { %v1695_v35 = vadd.f32 %v1619_v41, %v1549_v32  ;;  %v1621_v15 = vpop.f32.mrb[17].mxu0  ;;  %v1692_v62 = vpop.f32.mrb[17].mxu1  ;;  %v1697_v51 = vadd.f32 %v1690_v53, %v1551_v58  ;;  %v1699_v58 = vld [vmem:[%s6146_s1 + $0x60] sm:$0xff] }
 0x502   :  { %v1696_v46 = vadd.f32 %v1621_v15, %v1550_v50  ;;  %v1698_v18 = vadd.f32 %v1692_v62, %v1552_v43 }
 0x503   :  { %v3173_v1 = vmul.f32 -1.442695, %v1695_v35 }
 0x504   :  { %v3174_v7 = vmul.f32 -1.442695, %v1696_v46  ;;  %v3175_v0 = vmul.f32 -1.442695, %v1698_v18 }
 0x505   :  { %4497 = vpow2.f32 %v3173_v1 }
 0x506   :  { %4499 = vpow2.f32 %v3174_v7 }
 0x507   :  { %4501 = vpow2.f32 %v3175_v0 }
 0x508   :  { %4503 = vtanh.f32 %v1697_v51 }
 0x50f   :  { %v4498_v24 = vpop.eup %4497 }
 0x510   :  { %v4500_v32 = vpop.eup %4499  ;;  %v1852_v41 = vadd.f32 1.0, %v4498_v24  ;;  %v1700_v24 = vld [vmem:[%s6146_s1 + $0x68] sm:$0xff] }
 0x511   :  { %v1858_v35 = vadd.f32 1.0, %v4500_v32  ;;  %v4502_v1 = vpop.eup %4501 }
 0x512   :  { %4505 = vrcp.f32 %v1852_v41  ;;  %v4504_v50 = vpop.eup %4503  ;;  %v1865_v43 = vadd.f32 1.0, %v4502_v1 }
 0x513   :  { %4507 = vrcp.f32 %v1858_v35 }
 0x514   :  { %4509 = vrcp.f32 %v1865_v43 }
 0x51c   :  { %v4506_v15 = vpop.eup %4505 }
 0x51d   :  { %v4508_v46 = vpop.eup %4507  ;;  %v1869_v7 = vmul.f32 %v4506_v15, %v4504_v50  ;;  %v1702_v50 = vld [vmem:[%s6146_s1 + $0x78] sm:$0xff] }
 0x51e   :  { %v1868_v62 = vmul.f32 %v4508_v46, %v5610_v55  ;;  %v1701_v46 = vld [vmem:[%s6146_s1 + $0x70] sm:$0xff] }
 0x520   :  { %v5710_v51 = vadd.f32 %v1869_v7, %v1868_v62  ;;  %v1769_v0 = vpop.f32.mrb[18].mxu0  ;;  %v1840_v18 = vpop.f32.mrb[18].mxu1 }
 0x521   :  { %v1845_v53 = vadd.f32 %v1769_v0, %v1699_v58  ;;  %v1771_v32 = vpop.f32.mrb[19].mxu0  ;;  %v1842_v41 = vpop.f32.mrb[19].mxu1  ;;  %v1847_v58 = vadd.f32 %v1840_v18, %v1701_v46 }
 0x522   :  { %v1846_v35 = vadd.f32 %v1771_v32, %v1700_v24  ;;  %4511 = vtanh.f32 %v5710_v51  ;;  %v1848_v15 = vadd.f32 %v1842_v41, %v1702_v50  ;;  %v4510_v7 = vpop.eup %4509 }
 0x523   :  { %v3176_v55 = vmul.f32 -1.442695, %v1845_v53 }
 0x524   :  { %v3177_v1 = vmul.f32 -1.442695, %v1846_v35  ;;  %v3178_v62 = vmul.f32 -1.442695, %v1848_v15 }
 0x525   :  { %4513 = vpow2.f32 %v3176_v55 }
 0x526   :  { %4515 = vpow2.f32 %v3177_v1 }
 0x527   :  { %4517 = vpow2.f32 %v3178_v62 }
 0x528   :  { %4519 = vtanh.f32 %v1847_v58  ;;  %v6307_v58 = vld [vmem:[#allocation5_spill] sm:$0xff] }
 0x52c   :  { %v4512_v43 = vpop.eup %4511 }
 0x52d   :  { %v1872_v24 = vmul.f32 %v4512_v43, %v4510_v7 }
 0x52f   :  { %v4514_v0 = vpop.eup %4513  ;;  %1966 = vmatmul.mubr.f32.vlgmr.msra.gmra.mrb[20].mxu0 %v1872_v24  ;;  %2037 = vmatmul.mubr.f32.vlgmr.msra.gmra.mrb[20].mxu1 %v1872_v24  ;;  %v6308_v24 = vld [vmem:[#allocation2_spill] sm:$0xff] }
 0x530   :  { %v4516_v53 = vpop.eup %4515  ;;  %v1876_v32 = vadd.f32 1.0, %v4514_v0  ;;  %3993 = vmatpush1.bf16.msra.mxu0 %v4984_v60  ;;  %4025 = vmatpush1.bf16.msra.mxu1 %v5037_v31  ;;  %v6309_v0 = vld [vmem:[#allocation6_spill] sm:$0xff] }
 0x531   :  { %v1882_v41 = vadd.f32 1.0, %v4516_v53  ;;  %3995 = vmatprep.subr.bf16.mxu0 %v4987_v61  ;;  %4027 = vmatprep.subr.bf16.mxu1 %v5043_v36  ;;  %v4518_v18 = vpop.eup %4517  ;;  %v6310_v53 = vld [vmem:[#allocation3_spill] sm:$0xff] }
 0x532   :  { %4521 = vrcp.f32 %v1876_v32  ;;  %2115 = vmatprep.mubr.f32.mxu0 %v6232_v19  ;;  %2186 = vmatprep.mubr.f32.mxu1 %v6232_v19  ;;  %v4520_v35 = vpop.eup %4519  ;;  %v1889_v15 = vadd.f32 1.0, %v4518_v18  ;;  %v6311_v32 = vld [vmem:[#allocation9_spill] sm:$0xff]  ;;  %v6313_v18 = vld [vmem:[#allocation10_spill] sm:$0xff] }
 0x533   :  { %4523 = vrcp.f32 %v1882_v41  ;;  %v6312_v41 = vld [vmem:[#allocation4_spill] sm:$0xff] }
 0x534   :  { %3997 = vmatpush1.bf16.msra.mxu0 %v5021_v20  ;;  %4029 = vmatpush1.bf16.msra.mxu1 %v5074_v57  ;;  %4525 = vrcp.f32 %v1889_v15  ;;  %v6318_v15 = vld [vmem:[#allocation11_spill] sm:$0xff] }
 0x535   :  { %3999 = vmatprep.subr.bf16.mxu0 %v5025_v21  ;;  %4031 = vmatprep.subr.bf16.mxu1 %v5080_v63 }
 0x538   :  { %4001 = vmatpush1.bf16.msra.mxu0 %v5058_v47  ;;  %4033 = vmatpush1.bf16.msra.mxu1 %v5111_v29 }
 0x539   :  { %4003 = vmatprep.subr.bf16.mxu0 %v5062_v49  ;;  %4035 = vmatprep.subr.bf16.mxu1 %v5117_v38 }
 0x53c   :  { %v4522_v55 = vpop.eup %4521  ;;  %4005 = vmatpush1.bf16.msra.mxu0 %v5096_v13  ;;  %4037 = vmatpush1.bf16.msra.mxu1 %v6233_v56 }
 0x53d   :  { %v4524_v1 = vpop.eup %4523  ;;  %v1893_v50 = vmul.f32 %v4522_v55, %v4520_v35  ;;  %4007 = vmatprep.subr.bf16.mxu0 %v6234_v5  ;;  %4039 = vmatprep.subr.bf16.mxu1 %v6235_v27  ;;  %v6314_v35 = vld [vmem:[#allocation7_spill] sm:$0xff]  ;;  %v6315_v55 = vld [vmem:[#allocation13_spill] sm:$0xff] }
 0x53e   :  { %v1892_v46 = vmul.f32 %v4524_v1, %v5638_v10  ;;  %v4526_v10 = vpop.eup %4525  ;;  %v6316_v1 = vld [vmem:[#allocation8_spill] sm:$0xff] }
 0x540   :  { %v5738_v7 = vadd.f32 %v1893_v50, %v1892_v46  ;;  %4009 = vmatpush1.bf16.msra.mxu0 %v6236_v11  ;;  %4041 = vmatpush1.bf16.msra.mxu1 %v5183_v59  ;;  %v6317_v50 = vld [vmem:[#allocation14_spill] sm:$0xff]  ;;  %v6319_v46 = vld [vmem:[#allocation17_spill] sm:$0xff] }
 0x541   :  { %4011 = vmatprep.subr.bf16.mxu0 %v6237_v44  ;;  %4043 = vmatprep.subr.bf16.mxu1 %v5189_v2 }
 0x542   :  { %4527 = vtanh.f32 %v5738_v7 }
 0x544   :  { %4013 = vmatpush1.bf16.msra.mxu0 %v5168_v40  ;;  %4045 = vmatpush1.bf16.msra.mxu1 %v5216_v6 }
 0x545   :  { %4015 = vmatprep.subr.bf16.mxu0 %v6238_v34  ;;  %4047 = vmatprep.subr.bf16.mxu1 %v5219_v3 }
 0x548   :  { %4017 = vmatpush1.bf16.msra.mxu0 %v6239_v54  ;;  %4049 = vmatpush1.bf16.msra.mxu1 %v5238_v23 }
 0x549   :  { %4019 = vmatprep.subr.bf16.mxu0 %v5207_v39  ;;  %4051 = vmatprep.subr.bf16.mxu1 %v5241_v28 }
 0x54c   :  { %v4528_v43 = vpop.eup %4527  ;;  %4021 = vmatpush1.bf16.msra.mxu0 %v5234_v12  ;;  %4053 = vmatpush1.bf16.msra.mxu1 %v5251_v16 }
 0x54d   :  { %v1896_v62 = vmul.f32 %v4528_v43, %v4526_v10  ;;  %4055 = vmatprep.subr.bf16.mxu0 %v4684_v4  ;;  %4087 = vmatprep.subr.bf16.mxu1 %v4736_v22  ;;  %v6320_v10 = vld [vmem:[#allocation12_spill] sm:$0xff]  ;;  %v6321_v43 = vld [vmem:[#allocation18_spill] sm:$0xff] }
 0x54f   :  { %2116 = vmatmul.mubr.f32.vlgmr.msra.gmra.mrb[22].mxu0 %v1896_v62  ;;  %2187 = vmatmul.mubr.f32.vlgmr.msra.gmra.mrb[22].mxu1 %v1896_v62  ;;  %v6322_v62 = vld [vmem:[#allocation15_spill] sm:$0xff] }
 0x550   :  { %4057 = vmatpush1.bf16.msra.mxu0 %v4695_v8  ;;  %4089 = vmatpush1.bf16.msra.mxu1 %v4744_v25 }
 0x551   :  { %4059 = vmatprep.subr.bf16.mxu0 %v4697_v9  ;;  %4091 = vmatprep.subr.bf16.mxu1 %v4769_v33 }
 0x552   :  { %2313 = vmatprep.mubr.f32.mxu0 %v6232_v19  ;;  %2384 = vmatprep.mubr.f32.mxu1 %v6232_v19 }
 0x554   :  { %4061 = vmatpush1.bf16.msra.mxu0 %v4713_v14  ;;  %4093 = vmatpush1.bf16.msra.mxu1 %v4780_v37 }
 0x555   :  { %4063 = vmatprep.subr.bf16.mxu0 %v4722_v17  ;;  %4095 = vmatprep.subr.bf16.mxu1 %v4804_v45 }
 0x558   :  { %4065 = vmatpush1.bf16.msra.mxu0 %v4747_v26  ;;  %4097 = vmatpush1.bf16.msra.mxu1 %v4813_v48 }
 0x559   :  { %4067 = vmatprep.subr.bf16.mxu0 %v4760_v30  ;;  %4099 = vmatprep.subr.bf16.mxu1 %v4825_v52 }
 0x55c   :  { %4069 = vmatpush1.bf16.msra.mxu0 %v4796_v42  ;;  %4101 = vmatpush1.bf16.msra.mxu1 %v6307_v58 }
 0x55d   :  { %4071 = vmatprep.subr.bf16.mxu0 %v6308_v24  ;;  %4103 = vmatprep.subr.bf16.mxu1 %v6309_v0 }
 0x560   :  { %4073 = vmatpush1.bf16.msra.mxu0 %v6310_v53  ;;  %4105 = vmatpush1.bf16.msra.mxu1 %v6311_v32  ;;  %v1899_v53 = vld [vmem:[%s6145_s0 + $0xb0] sm:$0xff] }
 0x561   :  { %4075 = vmatprep.subr.bf16.mxu0 %v6312_v41  ;;  %4107 = vmatprep.subr.bf16.mxu1 %v6313_v18  ;;  %v6323_v41 = vld [vmem:[#allocation19_spill] sm:$0xff]  ;;  %v6324_v18 = vld [vmem:[#allocation16_spill] sm:$0xff] }
 0x564   :  { %4077 = vmatpush1.bf16.msra.mxu0 %v6314_v35  ;;  %4109 = vmatpush1.bf16.msra.mxu1 %v6315_v55  ;;  %v6325_v35 = vld [vmem:[#allocation20_spill] sm:$0xff] }
 0x565   :  { %4079 = vmatprep.subr.bf16.mxu0 %v6316_v1  ;;  %4111 = vmatprep.subr.bf16.mxu1 %v6317_v50  ;;  %v1897_v50 = vld [vmem:[%s6145_s0 + $0xa0] sm:$0xff] }
 0x568   :  { %4081 = vmatpush1.bf16.msra.mxu0 %v6318_v15  ;;  %4113 = vmatpush1.bf16.msra.mxu1 %v6319_v46  ;;  %v1898_v46 = vld [vmem:[%s6145_s0 + $0xa8] sm:$0xff] }
 0x569   :  { %4083 = vmatprep.subr.bf16.mxu0 %v6320_v10  ;;  %4115 = vmatprep.subr.bf16.mxu1 %v6321_v43 }
 0x56c   :  { %4085 = vmatpush1.bf16.msra.mxu0 %v6322_v62  ;;  %4117 = vmatpush1.bf16.msra.mxu1 %v6323_v41 }
 0x56d   :  { %4119 = vmatprep.subr.bf16.mxu0 %v6324_v18  ;;  %4151 = vmatprep.subr.bf16.mxu1 %v6325_v35  ;;  %v1900_v35 = vld [vmem:[%s6145_s0 + $0xb8] sm:$0xff] }
 0x602   :  { %v1967_v15 = vpop.f32.mrb[20].mxu0  ;;  %v2038_v10 = vpop.f32.mrb[20].mxu1 }
 0x603   :  { %v2043_v1 = vadd.f32 %v1967_v15, %v1897_v50  ;;  %v1969_v43 = vpop.f32.mrb[21].mxu0  ;;  %v2040_v55 = vpop.f32.mrb[21].mxu1  ;;  %v2045_v24 = vadd.f32 %v2038_v10, %v1899_v53  ;;  %v2047_v53 = vld [vmem:[%s6146_s1 + $0x40] sm:$0xff] }
 0x604   :  { %v2044_v62 = vadd.f32 %v1969_v43, %v1898_v46  ;;  %v2046_v18 = vadd.f32 %v2040_v55, %v1900_v35 }
 0x605   :  { %v3179_v32 = vmul.f32 -1.442695, %v2043_v1 }
 0x606   :  { %v3180_v41 = vmul.f32 -1.442695, %v2044_v62  ;;  %v3181_v0 = vmul.f32 -1.442695, %v2046_v18 }
 0x607   :  { %4529 = vpow2.f32 %v3179_v32 }
 0x608   :  { %4531 = vpow2.f32 %v3180_v41 }
 0x609   :  { %4533 = vpow2.f32 %v3181_v0 }
 0x60a   :  { %4535 = vtanh.f32 %v2045_v24 }
 0x611   :  { %v4530_v58 = vpop.eup %4529 }
 0x612   :  { %v4532_v50 = vpop.eup %4531  ;;  %v2200_v15 = vadd.f32 1.0, %v4530_v58  ;;  %v2048_v58 = vld [vmem:[%s6146_s1 + $0x48] sm:$0xff] }
 0x613   :  { %v2206_v1 = vadd.f32 1.0, %v4532_v50  ;;  %v4534_v32 = vpop.eup %4533 }
 0x614   :  { %4537 = vrcp.f32 %v2200_v15  ;;  %v4536_v46 = vpop.eup %4535  ;;  %v2213_v35 = vadd.f32 1.0, %v4534_v32 }
 0x615   :  { %4539 = vrcp.f32 %v2206_v1 }
 0x616   :  { %4541 = vrcp.f32 %v2213_v35 }
 0x61e   :  { %v4538_v43 = vpop.eup %4537 }
 0x61f   :  { %v4540_v62 = vpop.eup %4539  ;;  %v2217_v41 = vmul.f32 %v4538_v43, %v4536_v46  ;;  %v2050_v46 = vld [vmem:[%s6146_s1 + $0x58] sm:$0xff] }
 0x620   :  { %v2216_v55 = vmul.f32 %v4540_v62, %v5710_v51  ;;  %v2049_v62 = vld [vmem:[%s6146_s1 + $0x50] sm:$0xff] }
 0x622   :  { %v5810_v24 = vadd.f32 %v2217_v41, %v2216_v55  ;;  %v2117_v0 = vpop.f32.mrb[22].mxu0  ;;  %v2188_v18 = vpop.f32.mrb[22].mxu1 }
 0x623   :  { %v2193_v10 = vadd.f32 %v2117_v0, %v2047_v53  ;;  %v2119_v50 = vpop.f32.mrb[23].mxu0  ;;  %v2190_v15 = vpop.f32.mrb[23].mxu1  ;;  %v2195_v53 = vadd.f32 %v2188_v18, %v2049_v62 }
 0x624   :  { %v2194_v1 = vadd.f32 %v2119_v50, %v2048_v58  ;;  %4543 = vtanh.f32 %v5810_v24  ;;  %v2196_v43 = vadd.f32 %v2190_v15, %v2050_v46  ;;  %v4542_v41 = vpop.eup %4541 }
 0x625   :  { %v3182_v51 = vmul.f32 -1.442695, %v2193_v10 }
 0x626   :  { %v3183_v32 = vmul.f32 -1.442695, %v2194_v1  ;;  %v3184_v55 = vmul.f32 -1.442695, %v2196_v43 }
 0x627   :  { %4545 = vpow2.f32 %v3182_v51 }
 0x628   :  { %4547 = vpow2.f32 %v3183_v32 }
 0x629   :  { %4549 = vpow2.f32 %v3184_v55 }
 0x62a   :  { %4551 = vtanh.f32 %v2195_v53  ;;  %v6341_v53 = vld [vmem:[#allocation15_spill] sm:$0xff] }
 0x62e   :  { %v4544_v35 = vpop.eup %4543 }
 0x62f   :  { %v2220_v58 = vmul.f32 %v4544_v35, %v4542_v41 }
 0x631   :  { %v4546_v0 = vpop.eup %4545  ;;  %2314 = vmatmul.mubr.f32.vlgmr.msra.gmra.mrb[24].mxu0 %v2220_v58  ;;  %2385 = vmatmul.mubr.f32.vlgmr.msra.gmra.mrb[24].mxu1 %v2220_v58  ;;  %v6342_v58 = vld [vmem:[#allocation19_spill] sm:$0xff] }
 0x632   :  { %v4548_v10 = vpop.eup %4547  ;;  %v2224_v50 = vadd.f32 1.0, %v4546_v0  ;;  %4121 = vmatpush1.bf16.msra.mxu0 %v4984_v60  ;;  %4153 = vmatpush1.bf16.msra.mxu1 %v5037_v31  ;;  %v6343_v0 = vld [vmem:[#allocation16_spill] sm:$0xff] }
 0x633   :  { %v2230_v15 = vadd.f32 1.0, %v4548_v10  ;;  %4123 = vmatprep.subr.bf16.mxu0 %v4987_v61  ;;  %4155 = vmatprep.subr.bf16.mxu1 %v5043_v36  ;;  %v4550_v18 = vpop.eup %4549  ;;  %v6344_v10 = vld [vmem:[#allocation20_spill] sm:$0xff] }
 0x634   :  { %4553 = vrcp.f32 %v2224_v50  ;;  %2463 = vmatprep.mubr.f32.mxu0 %v6232_v19  ;;  %2534 = vmatprep.mubr.f32.mxu1 %v6232_v19  ;;  %v4552_v1 = vpop.eup %4551  ;;  %v2237_v43 = vadd.f32 1.0, %v4550_v18  ;;  %v2245_v50 = vld [vmem:[%s6145_s0 + $0xc0] sm:$0xff] }
 0x635   :  { %4555 = vrcp.f32 %v2230_v15  ;;  %v2246_v15 = vld [vmem:[%s6145_s0 + $0xc8] sm:$0xff] }
 0x636   :  { %4125 = vmatpush1.bf16.msra.mxu0 %v5021_v20  ;;  %4157 = vmatpush1.bf16.msra.mxu1 %v5074_v57  ;;  %4557 = vrcp.f32 %v2237_v43 }
 0x637   :  { %4127 = vmatprep.subr.bf16.mxu0 %v5025_v21  ;;  %4159 = vmatprep.subr.bf16.mxu1 %v5080_v63 }
 0x63a   :  { %4129 = vmatpush1.bf16.msra.mxu0 %v5058_v47  ;;  %4161 = vmatpush1.bf16.msra.mxu1 %v5111_v29 }
 0x63b   :  { %4131 = vmatprep.subr.bf16.mxu0 %v5062_v49  ;;  %4163 = vmatprep.subr.bf16.mxu1 %v5117_v38 }
 0x63e   :  { %v4554_v51 = vpop.eup %4553  ;;  %4133 = vmatpush1.bf16.msra.mxu0 %v5096_v13  ;;  %4165 = vmatpush1.bf16.msra.mxu1 %v6233_v56 }
 0x63f   :  { %v4556_v32 = vpop.eup %4555  ;;  %v2241_v46 = vmul.f32 %v4554_v51, %v4552_v1  ;;  %4135 = vmatprep.subr.bf16.mxu0 %v6234_v5  ;;  %4167 = vmatprep.subr.bf16.mxu1 %v6235_v27 }
 0x640   :  { %v2240_v62 = vmul.f32 %v4556_v32, %v5738_v7  ;;  %v4558_v7 = vpop.eup %4557 }
 0x642   :  { %v5838_v41 = vadd.f32 %v2241_v46, %v2240_v62  ;;  %4137 = vmatpush1.bf16.msra.mxu0 %v6236_v11  ;;  %4169 = vmatpush1.bf16.msra.mxu1 %v5183_v59 }
 0x643   :  { %4139 = vmatprep.subr.bf16.mxu0 %v6237_v44  ;;  %4171 = vmatprep.subr.bf16.mxu1 %v5189_v2 }
 0x644   :  { %4559 = vtanh.f32 %v5838_v41 }
 0x646   :  { %4141 = vmatpush1.bf16.msra.mxu0 %v5168_v40  ;;  %4173 = vmatpush1.bf16.msra.mxu1 %v5216_v6 }
 0x647   :  { %4143 = vmatprep.subr.bf16.mxu0 %v6238_v34  ;;  %4175 = vmatprep.subr.bf16.mxu1 %v5219_v3 }
 0x64a   :  { %4145 = vmatpush1.bf16.msra.mxu0 %v6239_v54  ;;  %4177 = vmatpush1.bf16.msra.mxu1 %v5238_v23 }
 0x64b   :  { %4147 = vmatprep.subr.bf16.mxu0 %v5207_v39  ;;  %4179 = vmatprep.subr.bf16.mxu1 %v5241_v28 }
 0x64e   :  { %v4560_v35 = vpop.eup %4559  ;;  %4149 = vmatpush1.bf16.msra.mxu0 %v5234_v12  ;;  %4181 = vmatpush1.bf16.msra.mxu1 %v5251_v16 }
 0x64f   :  { %v2244_v55 = vmul.f32 %v4560_v35, %v4558_v7  ;;  %4183 = vmatprep.subr.bf16.mxu0 %v4684_v4  ;;  %4215 = vmatprep.subr.bf16.mxu1 %v4736_v22  ;;  %v6326_v4 = vld [vmem:[#allocation5_spill] sm:$0xff]  ;;  %v6331_v22 = vld [vmem:[#allocation4_spill] sm:$0xff] }
 0x650   :  { %v2248_v35 = vld [vmem:[%s6145_s0 + $0xd8] sm:$0xff] }
 0x651   :  { %2464 = vmatmul.mubr.f32.vlgmr.msra.gmra.mrb[26].mxu0 %v2244_v55  ;;  %2535 = vmatmul.mubr.f32.vlgmr.msra.gmra.mrb[26].mxu1 %v2244_v55 }
 0x652   :  { %4185 = vmatpush1.bf16.msra.mxu0 %v4695_v8  ;;  %4217 = vmatpush1.bf16.msra.mxu1 %v4744_v25  ;;  %v6327_v8 = vld [vmem:[#allocation2_spill] sm:$0xff] }
 0x653   :  { %4187 = vmatprep.subr.bf16.mxu0 %v4697_v9  ;;  %4219 = vmatprep.subr.bf16.mxu1 %v4769_v33  ;;  %v6328_v9 = vld [vmem:[#allocation6_spill] sm:$0xff]  ;;  %v6335_v33 = vld [vmem:[#allocation8_spill] sm:$0xff] }
 0x654   :  { %2661 = vmatprep.mubr.f32.mxu0 %v6232_v19  ;;  %2732 = vmatprep.mubr.f32.mxu1 %v6232_v19  ;;  %v6332_v25 = vld [vmem:[#allocation10_spill] sm:$0xff] }
 0x656   :  { %4189 = vmatpush1.bf16.msra.mxu0 %v4713_v14  ;;  %4221 = vmatpush1.bf16.msra.mxu1 %v4780_v37  ;;  %v6329_v14 = vld [vmem:[#allocation3_spill] sm:$0xff]  ;;  %v6336_v37 = vld [vmem:[#allocation14_spill] sm:$0xff] }
 0x657   :  { %4191 = vmatprep.subr.bf16.mxu0 %v4722_v17  ;;  %4223 = vmatprep.subr.bf16.mxu1 %v4804_v45  ;;  %v6330_v17 = vld [vmem:[#allocation9_spill] sm:$0xff] }
 0x658   :  { %v6338_v45 = vld [vmem:[#allocation17_spill] sm:$0xff] }
 0x65a   :  { %4193 = vmatpush1.bf16.msra.mxu0 %v4747_v26  ;;  %4225 = vmatpush1.bf16.msra.mxu1 %v4813_v48  ;;  %v6333_v26 = vld [vmem:[#allocation7_spill] sm:$0xff]  ;;  %v6339_v48 = vld [vmem:[#allocation12_spill] sm:$0xff] }
 0x65b   :  { %4195 = vmatprep.subr.bf16.mxu0 %v4760_v30  ;;  %4227 = vmatprep.subr.bf16.mxu1 %v4825_v52  ;;  %v6334_v30 = vld [vmem:[#allocation13_spill] sm:$0xff]  ;;  %v6340_v52 = vld [vmem:[#allocation18_spill] sm:$0xff] }
 0x65e   :  { %4197 = vmatpush1.bf16.msra.mxu0 %v4796_v42  ;;  %4229 = vmatpush1.bf16.msra.mxu1 %v6326_v4  ;;  %v6337_v42 = vld [vmem:[#allocation11_spill] sm:$0xff]  ;;  %v2247_v4 = vld [vmem:[%s6145_s0 + $0xd0] sm:$0xff] }
 0x65f   :  { %4199 = vmatprep.subr.bf16.mxu0 %v6327_v8  ;;  %4231 = vmatprep.subr.bf16.mxu1 %v6328_v9 }
 0x662   :  { %4201 = vmatpush1.bf16.msra.mxu0 %v6329_v14  ;;  %4233 = vmatpush1.bf16.msra.mxu1 %v6330_v17 }
 0x663   :  { %4203 = vmatprep.subr.bf16.mxu0 %v6331_v22  ;;  %4235 = vmatprep.subr.bf16.mxu1 %v6332_v25 }
 0x666   :  { %4205 = vmatpush1.bf16.msra.mxu0 %v6333_v26  ;;  %4237 = vmatpush1.bf16.msra.mxu1 %v6334_v30 }
 0x667   :  { %4207 = vmatprep.subr.bf16.mxu0 %v6335_v33  ;;  %4239 = vmatprep.subr.bf16.mxu1 %v6336_v37 }
 0x66a   :  { %4209 = vmatpush1.bf16.msra.mxu0 %v6337_v42  ;;  %4241 = vmatpush1.bf16.msra.mxu1 %v6338_v45 }
 0x66b   :  { %4211 = vmatprep.subr.bf16.mxu0 %v6339_v48  ;;  %4243 = vmatprep.subr.bf16.mxu1 %v6340_v52  ;;  %v2395_v52 = vld [vmem:[%s6146_s1 + $0x20] sm:$0xff] }
 0x66e   :  { %4213 = vmatpush1.bf16.msra.mxu0 %v6341_v53  ;;  %4245 = vmatpush1.bf16.msra.mxu1 %v6342_v58  ;;  %v2396_v53 = vld [vmem:[%s6146_s1 + $0x28] sm:$0xff] }
 0x66f   :  { %4247 = vmatprep.subr.bf16.mxu0 %v6343_v0  ;;  %4279 = vmatprep.subr.bf16.mxu1 %v6344_v10 }
 0x704   :  { %v2315_v18 = vpop.f32.mrb[24].mxu0  ;;  %v2386_v1 = vpop.f32.mrb[24].mxu1 }
 0x705   :  { %v2391_v51 = vadd.f32 %v2315_v18, %v2245_v50  ;;  %v2317_v32 = vpop.f32.mrb[25].mxu0  ;;  %v2388_v46 = vpop.f32.mrb[25].mxu1  ;;  %v2393_v9 = vadd.f32 %v2386_v1, %v2247_v4 }
 0x706   :  { %v2392_v43 = vadd.f32 %v2317_v32, %v2246_v15  ;;  %v2394_v55 = vadd.f32 %v2388_v46, %v2248_v35  ;;  %v2398_v32 = vld [vmem:[%s6146_s1 + $0x38] sm:$0xff] }
 0x707   :  { %v3185_v62 = vmul.f32 -1.442695, %v2391_v51 }
 0x708   :  { %v3186_v7 = vmul.f32 -1.442695, %v2392_v43  ;;  %v3187_v8 = vmul.f32 -1.442695, %v2394_v55  ;;  %v2397_v43 = vld [vmem:[%s6146_s1 + $0x30] sm:$0xff] }
 0x709   :  { %4561 = vpow2.f32 %v3185_v62 }
 0x70a   :  { %4563 = vpow2.f32 %v3186_v7 }
 0x70b   :  { %4565 = vpow2.f32 %v3187_v8 }
 0x70c   :  { %4567 = vtanh.f32 %v2393_v9 }
 0x713   :  { %v4562_v14 = vpop.eup %4561 }
 0x714   :  { %v4564_v17 = vpop.eup %4563  ;;  %v2548_v22 = vadd.f32 1.0, %v4562_v14 }
 0x715   :  { %v2554_v25 = vadd.f32 1.0, %v4564_v17  ;;  %v4566_v26 = vpop.eup %4565 }
 0x716   :  { %4569 = vrcp.f32 %v2548_v22  ;;  %v4568_v30 = vpop.eup %4567  ;;  %v2561_v45 = vadd.f32 1.0, %v4566_v26  ;;  %v2948_v26 = vld [vmem:[%s6147_s4 + $0x38] sm:$0xff] }
 0x717   :  { %4571 = vrcp.f32 %v2554_v25  ;;  %v2947_v25 = vld [vmem:[%s6147_s4 + $0x30] sm:$0xff] }
 0x718   :  { %4573 = vrcp.f32 %v2561_v45 }
 0x720   :  { %v4570_v33 = vpop.eup %4569 }
 0x721   :  { %v4572_v37 = vpop.eup %4571  ;;  %v2565_v42 = vmul.f32 %v4570_v33, %v4568_v30  ;;  %v4324_v30 = vpack.c.bf16 %v2948_v26, %v2947_v25  ;;  %v2965_v33 = vld [vmem:[%s6147_s4 + $0xc0] sm:$0xff] }
 0x722   :  { %v2564_v48 = vmul.f32 %v4572_v37, %v5810_v24  ;;  %v4574_v62 = vpop.eup %4573  ;;  %v2966_v37 = vld [vmem:[%s6147_s4 + $0xc8] sm:$0xff] }
 0x723   :  { %v4326_v45 = vpack.c.bf16 %v2966_v37, %v2965_v33 }
 0x724   :  { %v5910_v58 = vadd.f32 %v2565_v42, %v2564_v48  ;;  %v2465_v0 = vpop.f32.mrb[26].mxu0  ;;  %v2536_v10 = vpop.f32.mrb[26].mxu1  ;;  %v2949_v42 = vld [vmem:[%s6147_s4 + $0x40] sm:$0xff]  ;;  %v2950_v48 = vld [vmem:[%s6147_s4 + $0x48] sm:$0xff] }
 0x725   :  { %v2541_v50 = vadd.f32 %v2465_v0, %v2395_v52  ;;  %v2467_v15 = vpop.f32.mrb[27].mxu0  ;;  %v2538_v18 = vpop.f32.mrb[27].mxu1  ;;  %v2543_v55 = vadd.f32 %v2536_v10, %v2397_v43  ;;  %v2967_v52 = vld [vmem:[%s6147_s4 + $0xd0] sm:$0xff]  ;;  %v4328_v0 = vpack.c.bf16 %v2950_v48, %v2949_v42 }
 0x726   :  { %v2542_v1 = vadd.f32 %v2467_v15, %v2396_v53  ;;  %4575 = vtanh.f32 %v5910_v58  ;;  %v2544_v46 = vadd.f32 %v2538_v18, %v2398_v32  ;;  %v2968_v53 = vld [vmem:[%s6147_s4 + $0xd8] sm:$0xff]  ;;  %v2969_v18 = vld [vmem:[%s6147_s4 + $0xe0] sm:$0xff]  ;;  %v2971_v43 = vld [vmem:[%s6147_s4 + $0xf0] sm:$0xff] }
 0x727   :  { %v3188_v24 = vmul.f32 -1.442695, %v2541_v50  ;;  %v4330_v10 = vpack.c.bf16 %v2968_v53, %v2967_v52  ;;  %v2951_v50 = vld [vmem:[%s6147_s4 + $0x50] sm:$0xff]  ;;  %v2952_v15 = vld [vmem:[%s6147_s4 + $0x58] sm:$0xff]  ;;  %v2953_v32 = vld [vmem:[%s6147_s4 + $0x60] sm:$0xff] }
 0x728   :  { %v3189_v51 = vmul.f32 -1.442695, %v2542_v1  ;;  %v3190_v35 = vmul.f32 -1.442695, %v2544_v46  ;;  %v2970_v1 = vld [vmem:[%s6147_s4 + $0xe8] sm:$0xff] }
 0x729   :  { %4577 = vpow2.f32 %v3188_v24  ;;  %v4332_v24 = vpack.c.bf16 %v2952_v15, %v2951_v50  ;;  %v2954_v46 = vld [vmem:[%s6147_s4 + $0x68] sm:$0xff] }
 0x72a   :  { %4579 = vpow2.f32 %v3189_v51  ;;  %v4334_v51 = vpack.c.bf16 %v2970_v1, %v2969_v18  ;;  %v2744_v50 = vld [vmem:[%s6146_s1 + $0x8] sm:$0xff] }
 0x72b   :  { %4581 = vpow2.f32 %v3190_v35 }
 0x72c   :  { %4583 = vtanh.f32 %v2543_v55  ;;  %v2955_v55 = vld [vmem:[%s6147_s4 + $0x70] sm:$0xff] }
 0x730   :  { %v4576_v7 = vpop.eup %4575 }
 0x731   :  { %v2568_v4 = vmul.f32 %v4576_v7, %v4574_v62  ;;  %v2972_v62 = vld [vmem:[%s6147_s4 + $0xf8] sm:$0xff]  ;;  %v4336_v7 = vpack.c.bf16 %v2954_v46, %v2953_v32 }
 0x732   :  { %v4338_v35 = vpack.c.bf16 %v2972_v62, %v2971_v43 }
 0x733   :  { %v4578_v8 = vpop.eup %4577  ;;  %2662 = vmatmul.mubr.f32.vlgmr.msra.gmra.mrb[28].mxu0 %v2568_v4  ;;  %2733 = vmatmul.mubr.f32.vlgmr.msra.gmra.mrb[28].mxu1 %v2568_v4  ;;  %v2956_v4 = vld [vmem:[%s6147_s4 + $0x78] sm:$0xff] }
 0x734   :  { %v4580_v9 = vpop.eup %4579  ;;  %v2572_v14 = vadd.f32 1.0, %v4578_v8  ;;  %4249 = vmatpush1.bf16.msra.mxu0 %v4984_v60  ;;  %4281 = vmatpush1.bf16.msra.mxu1 %v5037_v31  ;;  %v4340_v8 = vpack.c.bf16 %v2956_v4, %v2955_v55 }
 0x735   :  { %v2578_v17 = vadd.f32 1.0, %v4580_v9  ;;  %4251 = vmatprep.subr.bf16.mxu0 %v4987_v61  ;;  %4283 = vmatprep.subr.bf16.mxu1 %v5043_v36  ;;  %v4582_v60 = vpop.eup %4581  ;;  %v4626_v9 = vmov 0.0|0.0  }
 0x736   :  { %4585 = vrcp.f32 %v2572_v14  ;;  %2811 = vmatprep.mubr.f32.mxu0 %v6232_v19  ;;  %2882 = vmatprep.mubr.f32.mxu1 %v6232_v19  ;;  %v4584_v61 = vpop.eup %4583  ;;  %v3051_v14 = vld [vmem:[%s6148_s6] sm:$0xff] }
 0x737   :  { %4587 = vrcp.f32 %v2578_v17  ;;  %v3052_v17 = vld [vmem:[%s6148_s6 + $0x8] sm:$0xff] }
 0x738   :  { %4253 = vmatpush1.bf16.msra.mxu0 %v5021_v20  ;;  %4285 = vmatpush1.bf16.msra.mxu1 %v5074_v57 }
 0x739   :  { %4255 = vmatprep.subr.bf16.mxu0 %v5025_v21  ;;  %4287 = vmatprep.subr.bf16.mxu1 %v5080_v63  ;;  %v2585_v21 = vadd.f32 1.0, %v4582_v60  ;;  %v3053_v60 = vld [vmem:[%s6148_s6 + $0x10] sm:$0xff] }
 0x73b   :  { %4589 = vrcp.f32 %v2585_v21  ;;  %v3056_v21 = vld [vmem:[%s6148_s6 + $0x28] sm:$0xff] }
 0x73c   :  { %4257 = vmatpush1.bf16.msra.mxu0 %v5058_v47  ;;  %4289 = vmatpush1.bf16.msra.mxu1 %v5111_v29  ;;  %v2957_v29 = vld [vmem:[%s6147_s4 + $0x80] sm:$0xff] }
 0x73d   :  { %4259 = vmatprep.subr.bf16.mxu0 %v5062_v49  ;;  %4291 = vmatprep.subr.bf16.mxu1 %v5117_v38  ;;  %v2958_v38 = vld [vmem:[%s6147_s4 + $0x88] sm:$0xff] }
 0x740   :  { %v4586_v31 = vpop.eup %4585  ;;  %4261 = vmatpush1.bf16.msra.mxu0 %v5096_v13  ;;  %4293 = vmatpush1.bf16.msra.mxu1 %v6233_v56  ;;  %v2961_v56 = vld [vmem:[%s6147_s4 + $0xa0] sm:$0xff] }
 0x741   :  { %v4588_v20 = vpop.eup %4587  ;;  %v2589_v36 = vmul.f32 %v4586_v31, %v4584_v61  ;;  %4263 = vmatprep.subr.bf16.mxu0 %v6234_v5  ;;  %4295 = vmatprep.subr.bf16.mxu1 %v6235_v27  ;;  %v2962_v5 = vld [vmem:[%s6147_s4 + $0xa8] sm:$0xff]  ;;  %v4343_v61 = vpack.c.bf16 %v3052_v17, %v3051_v14  ;;  %v3054_v31 = vld [vmem:[%s6148_s6 + $0x18] sm:$0xff] }
 0x742   :  { %v2588_v47 = vmul.f32 %v4588_v20, %v5838_v41  ;;  %v4318_v27 = vpack.c.bf16 %v2962_v5, %v2961_v56  ;;  %v2964_v41 = vld [vmem:[%s6147_s4 + $0xb8] sm:$0xff]  ;;  %v4346_v20 = vpack.c.bf16 %v3054_v31, %v3053_v60 }
 0x744   :  { %v5938_v57 = vadd.f32 %v2589_v36, %v2588_v47  ;;  %4265 = vmatpush1.bf16.msra.mxu0 %v6236_v11  ;;  %4297 = vmatpush1.bf16.msra.mxu1 %v5183_v59  ;;  %v2942_v59 = vld [vmem:[%s6147_s4 + $0x8] sm:$0xff]  ;;  %v2945_v11 = vld [vmem:[%s6147_s4 + $0x20] sm:$0xff] }
 0x745   :  { %4267 = vmatprep.subr.bf16.mxu0 %v6237_v44  ;;  %4299 = vmatprep.subr.bf16.mxu1 %v5189_v2  ;;  %v4590_v49 = vpop.eup %4589  ;;  %v2946_v44 = vld [vmem:[%s6147_s4 + $0x28] sm:$0xff]  ;;  %v3055_v36 = vld [vmem:[%s6148_s6 + $0x20] sm:$0xff] }
 0x746   :  { %4591 = vtanh.f32 %v5938_v57  ;;  %v4349_v47 = vpack.c.bf16 %v3056_v21, %v3055_v36 }
 0x748   :  { %4269 = vmatpush1.bf16.msra.mxu0 %v5168_v40  ;;  %4301 = vmatpush1.bf16.msra.mxu1 %v5216_v6  ;;  %v4310_v6 = vpack.c.bf16 %v2958_v38, %v2957_v29  ;;  %v2941_v40 = vld [vmem:[%s6147_s4] sm:$0xff]  ;;  %v3060_v38 = vld [vmem:[%s6148_s6 + $0x48] sm:$0xff] }
 0x749   :  { %4271 = vmatprep.subr.bf16.mxu0 %v6238_v34  ;;  %4303 = vmatprep.subr.bf16.mxu1 %v5219_v3  ;;  %v4312_v2 = vpack.c.bf16 %v2942_v59, %v2941_v40  ;;  %v2960_v3 = vld [vmem:[%s6147_s4 + $0x98] sm:$0xff]  ;;  %v4320_v34 = vpack.c.bf16 %v2946_v44, %v2945_v11  ;;  %v3059_v29 = vld [vmem:[%s6148_s6 + $0x40] sm:$0xff]  ;;  %v3061_v40 = vld [vmem:[%s6148_s6 + $0x50] sm:$0xff] }
 0x74a   :  { %v3062_v59 = vld [vmem:[%s6148_s6 + $0x58] sm:$0xff] }
 0x74b   :  { %v2596_v44 = vld [vmem:[%s6145_s0 + $0xf8] sm:$0xff] }
 0x74c   :  { %4273 = vmatpush1.bf16.msra.mxu0 %v6239_v54  ;;  %4305 = vmatpush1.bf16.msra.mxu1 %v5238_v23  ;;  %v2943_v23 = vld [vmem:[%s6147_s4 + $0x10] sm:$0xff] }
 0x74d   :  { %4275 = vmatprep.subr.bf16.mxu0 %v5207_v39  ;;  %4307 = vmatprep.subr.bf16.mxu1 %v5241_v28  ;;  %v2959_v39 = vld [vmem:[%s6147_s4 + $0x90] sm:$0xff]  ;;  %v2944_v28 = vld [vmem:[%s6147_s4 + $0x18] sm:$0xff] }
 0x74e   :  { %v2963_v54 = vld [vmem:[%s6147_s4 + $0xb0] sm:$0xff] }
 0x74f   :  { %v4322_v22 = vpack.c.bf16 %v2964_v41, %v2963_v54  ;;  %v2595_v54 = vld [vmem:[%s6145_s0 + $0xf0] sm:$0xff] }
 0x750   :  { %v4592_v63 = vpop.eup %4591  ;;  %4277 = vmatpush1.bf16.msra.mxu0 %v5234_v12  ;;  %4309 = vmatpush1.bf16.msra.mxu1 %v5251_v16  ;;  %v4314_v12 = vpack.c.bf16 %v2960_v3, %v2959_v39  ;;  %v4316_v16 = vpack.c.bf16 %v2944_v28, %v2943_v23  ;;  %v2593_v39 = vld [vmem:[%s6145_s0 + $0xe0] sm:$0xff]  ;;  %v2594_v3 = vld [vmem:[%s6145_s0 + $0xe8] sm:$0xff] }
 0x751   :  { %v2592_v13 = vmul.f32 %v4592_v63, %v4590_v49  ;;  %4311 = vmatprep.subr.bf16.mxu0 %v4310_v6  ;;  %4342 = vmatprep.subr.bf16.mxu1 %v4626_v9  ;;  %v3057_v49 = vld [vmem:[%s6148_s6 + $0x30] sm:$0xff]  ;;  %v3058_v63 = vld [vmem:[%s6148_s6 + $0x38] sm:$0xff]  ;;  %v4355_v6 = vpack.c.bf16 %v3060_v38, %v3059_v29 }
 0x753   :  { %2812 = vmatmul.mubr.f32.vlgmr.msra.gmra.mrb[30].mxu0 %v2592_v13  ;;  %2883 = vmatmul.mubr.f32.vlgmr.msra.gmra.mrb[30].mxu1 %v2592_v13  ;;  %v4352_v13 = vpack.c.bf16 %v3058_v63, %v3057_v49 }
 0x754   :  { %4313 = vmatpush3.bf16.msra.mxu0 %v4312_v2  ;;  %4344 = vmatpush3.bf16.msra.mxu1 %v4343_v61  ;;  %v4358_v2 = vpack.c.bf16 %v3062_v59, %v3061_v40 }
 0x755   :  { %4315 = vmatprep.subr.bf16.mxu0 %v4314_v12  ;;  %4345 = vmatprep.subr.bf16.mxu1 %v4626_v9 }
 0x756   :  { %3283 = vmatprep.mubr.msk.f32.mxu1 %vm4627_vm0, %v6232_v19 }
 0x758   :  { %4317 = vmatpush3.bf16.msra.mxu0 %v4316_v16  ;;  %4347 = vmatpush3.bf16.msra.mxu1 %v4346_v20 }
 0x759   :  { %4319 = vmatprep.subr.bf16.mxu0 %v4318_v27  ;;  %4348 = vmatprep.subr.bf16.mxu1 %v4626_v9 }
 0x75c   :  { %4321 = vmatpush3.bf16.msra.mxu0 %v4320_v34  ;;  %4350 = vmatpush3.bf16.msra.mxu1 %v4349_v47 }
 0x75d   :  { %4323 = vmatprep.subr.bf16.mxu0 %v4322_v22  ;;  %4351 = vmatprep.subr.bf16.mxu1 %v4626_v9 }
 0x760   :  { %4325 = vmatpush3.bf16.msra.mxu0 %v4324_v30  ;;  %4353 = vmatpush3.bf16.msra.mxu1 %v4352_v13 }
 0x761   :  { %4327 = vmatprep.subr.bf16.mxu0 %v4326_v45  ;;  %4354 = vmatprep.subr.bf16.mxu1 %v4626_v9 }
 0x764   :  { %4329 = vmatpush3.bf16.msra.mxu0 %v4328_v0  ;;  %4356 = vmatpush3.bf16.msra.mxu1 %v4355_v6 }
 0x765   :  { %4331 = vmatprep.subr.bf16.mxu0 %v4330_v10  ;;  %4357 = vmatprep.subr.bf16.mxu1 %v4626_v9  ;;  %v2743_v10 = vld [vmem:[%s6146_s1] sm:$0xff] }
 0x768   :  { %4333 = vmatpush3.bf16.msra.mxu0 %v4332_v24  ;;  %4359 = vmatpush3.bf16.msra.mxu1 %v4358_v2  ;;  %v3063_v2 = vld [vmem:[%s6148_s6 + $0x60] sm:$0xff] }
 0x769   :  { %4335 = vmatprep.subr.bf16.mxu0 %v4334_v51  ;;  %4360 = vmatprep.subr.bf16.mxu1 %v4626_v9 }
 0x76c   :  { %4337 = vmatpush3.bf16.msra.mxu0 %v4336_v7 }
 0x76d   :  { %4339 = vmatprep.subr.bf16.mxu0 %v4338_v35  ;;  %v2745_v35 = vld [vmem:[%s6146_s1 + $0x10] sm:$0xff] }
 0x770   :  { %4341 = vmatpush3.bf16.msra.mxu0 %v4340_v8 }
 0x806   :  { %v2663_v12 = vpop.f32.mrb[28].mxu0  ;;  %v2734_v23 = vpop.f32.mrb[28].mxu1 }
 0x807   :  { %v2739_v28 = vadd.f32 %v2663_v12, %v2593_v39  ;;  %v2665_v16 = vpop.f32.mrb[29].mxu0  ;;  %v2736_v56 = vpop.f32.mrb[29].mxu1  ;;  %v2741_v22 = vadd.f32 %v2734_v23, %v2595_v54  ;;  %v3064_v39 = vld [vmem:[%s6148_s6 + $0x68] sm:$0xff]  ;;  %v3066_v12 = vld [vmem:[%s6148_s6 + $0x78] sm:$0xff] }
 0x808   :  { %v2740_v5 = vadd.f32 %v2665_v16, %v2594_v3  ;;  %v2742_v34 = vadd.f32 %v2736_v56, %v2596_v44  ;;  %v4361_v3 = vpack.c.bf16 %v3064_v39, %v3063_v2  ;;  %v3197_v16 = vld [vmem:[%s6149_s5] ss:$0 sm:$0xff] }
 0x809   :  { %v3191_v27 = vmul.f32 -1.442695, %v2739_v28 }
 0x80a   :  { %v3192_v11 = vmul.f32 -1.442695, %v2740_v5  ;;  %v3193_v41 = vmul.f32 -1.442695, %v2742_v34  ;;  %4362 = vmatpush3.bf16.msra.mxu1 %v4361_v3 }
 0x80b   :  { %4593 = vpow2.f32 %v3191_v27  ;;  %4363 = vmatprep.subr.bf16.mxu1 %v4626_v9 }
 0x80c   :  { %4595 = vpow2.f32 %v3192_v11  ;;  %v3198_v11 = vld [vmem:[%s6150_s7] ss:$0 sm:$0xff] }
 0x80d   :  { %4597 = vpow2.f32 %v3193_v41 }
 0x80e   :  { %4599 = vtanh.f32 %v2741_v22 }
 0x815   :  { %v4594_v25 = vpop.eup %4593 }
 0x816   :  { %v4596_v26 = vpop.eup %4595  ;;  %v2896_v30 = vadd.f32 1.0, %v4594_v25 }
 0x817   :  { %v2902_v33 = vadd.f32 1.0, %v4596_v26  ;;  %v4598_v37 = vpop.eup %4597 }
 0x818   :  { %4601 = vrcp.f32 %v2896_v30  ;;  %v4600_v42 = vpop.eup %4599  ;;  %v2909_v53 = vadd.f32 1.0, %v4598_v37 }
 0x819   :  { %4603 = vrcp.f32 %v2902_v33 }
 0x81a   :  { %4605 = vrcp.f32 %v2909_v53 }
 0x822   :  { %v4602_v45 = vpop.eup %4601 }
 0x823   :  { %v4604_v48 = vpop.eup %4603  ;;  %v2913_v52 = vmul.f32 %v4602_v45, %v4600_v42 }
 0x824   :  { %v2912_v0 = vmul.f32 %v4604_v48, %v5910_v58  ;;  %v2746_v58 = vld [vmem:[%s6146_s1 + $0x18] sm:$0xff]  ;;  %v4606_v55 = vpop.eup %4605 }
 0x826   :  { %v2914_v15 = vadd.f32 %v2913_v52, %v2912_v0  ;;  %v2813_v18 = vpop.f32.mrb[30].mxu0  ;;  %v2884_v1 = vpop.f32.mrb[30].mxu1 }
 0x827   :  { %v2889_v24 = vadd.f32 %v2813_v18, %v2743_v10  ;;  %v2815_v51 = vpop.f32.mrb[31].mxu0  ;;  %v2886_v32 = vpop.f32.mrb[31].mxu1  ;;  %v2891_v14 = vadd.f32 %v2884_v1, %v2745_v35 }
 0x828   :  { %4607 = vtanh.f32 %v2914_v15  ;;  %v2890_v46 = vadd.f32 %v2815_v51, %v2744_v50  ;;  %v2892_v7 = vadd.f32 %v2886_v32, %v2746_v58 }
 0x829   :  { %v3194_v43 = vmul.f32 -1.442695, %v2889_v24 }
 0x82a   :  { %v3195_v62 = vmul.f32 -1.442695, %v2890_v46  ;;  %v3196_v8 = vmul.f32 -1.442695, %v2892_v7 }
 0x82b   :  { %4609 = vpow2.f32 %v3194_v43 }
 0x82c   :  { %4611 = vpow2.f32 %v3195_v62 }
 0x82d   :  { %4613 = vpow2.f32 %v3196_v8 }
 0x82e   :  { %4615 = vtanh.f32 %v2891_v14 }
 0x832   :  { %v4608_v4 = vpop.eup %4607 }
 0x833   :  { %v2916_v17 = vmul.f32 %v4608_v4, %v4606_v55 }
 0x835   :  { %v4610_v60 = vpop.eup %4609 }
 0x836   :  { %v4612_v61 = vpop.eup %4611  ;;  %v2920_v31 = vadd.f32 1.0, %v4610_v60 }
 0x837   :  { %v2926_v20 = vadd.f32 1.0, %v4612_v61  ;;  %v4614_v36 = vpop.eup %4613 }
 0x838   :  { %4617 = vrcp.f32 %v2920_v31  ;;  %v4616_v21 = vpop.eup %4615  ;;  %v2933_v13 = vadd.f32 1.0, %v4614_v36 }
 0x839   :  { %4619 = vrcp.f32 %v2926_v20 }
 0x83a   :  { %4621 = vrcp.f32 %v2933_v13 }
 0x842   :  { %v4618_v47 = vpop.eup %4617 }
 0x843   :  { %v4620_v49 = vpop.eup %4619  ;;  %v2937_v63 = vmul.f32 %v4618_v47, %v4616_v21 }
 0x844   :  { %v2936_v29 = vmul.f32 %v4620_v49, %v5938_v57  ;;  %v4622_v6 = vpop.eup %4621  ;;  %v3065_v57 = vld [vmem:[%s6148_s6 + $0x70] sm:$0xff] }
 0x845   :  { %v4364_v23 = vpack.c.bf16 %v3066_v12, %v3065_v57 }
 0x846   :  { %v2938_v38 = vadd.f32 %v2937_v63, %v2936_v29 }
 0x847   :  { %4365 = vmatpush3.bf16.msra.mxu1 %v4364_v23 }
 0x848   :  { %4623 = vtanh.f32 %v2938_v38 }
 0x852   :  { %v4624_v40 = vpop.eup %4623 }
 0x853   :  { %v2940_v59 = vmul.f32 %v4624_v40, %v4622_v6 }
 0x855   :  { %3044 = vmatprep.mubr.f32.mxu0 %v2940_v59 }
 0x856   :  { %3045 = vmatmul.mubr.f32.vlgmr.msra.gmra.mrb[32].mxu0 %v2916_v17 }
 0x929   :  { %v3231_v28 = vpop.f32.mrb[32].mxu0 }
 0x92a   :  { %v3232_v56 = vpop.f32.mrb[33].mxu0 }
 0x92b   :  { %v3233_v9 = vadd.f32 %v3232_v56, %v3231_v28 }
 0x92d   :  { %v3047_v5 = vadd.f32 %v3233_v9, %v3197_v16 }
 0x92f   :  { %v3050_v27 = vmax.f32 %v3047_v5, 0.0 }
 0x931   :  { %3284 = vmatmul.mubr.f32.vlgmr.msra.gmra.mrb[32].mxu1 %v3050_v27 }
 0xa04   :  { %v3140_v44 = vpop.f32.mrb[32].mxu1 }
 0xa05   :  { %v3141_v34 = vadd.f32 %v3198_v11, %v3140_v44  ;;  %v3285_v54 = vpop.f32.mrb[33].mxu1 }
 0xa07   :  { %3144 = vst [vmem:[%s6151_s8] sm:$0xff] %v3141_v34 }

</bundles_post_ra>
